<compile_context>
chip_gen: v7x
topology: tpu7x:2x2x1
jax: 0.10.0
libtpu: 0.0.40
codegen_flags: <defaults>
</compile_context>

<pallas_src>
import functools
import math

import jax
import jax.numpy as jnp
from jax import lax
from jax.experimental import pallas as pl
from jax.experimental.pallas import tpu as pltpu


def _round_up(x: int, m: int) -> int:
    return (x + m - 1) // m * m


def _pick_tile(n: int, cap: int, min_blocks: int) -> int:
    """Largest power-of-two tile (>=128) dividing n, <= cap, giving >= min_blocks blocks."""
    for t in (1024, 512, 256, 128):
        if t <= cap and n % t == 0 and n // t >= min_blocks:
            return t
    return 128


# --------------------------------------------------------------------------
# Kernel 1: fused QKV projection for all heads in a single wide matmul.
# --------------------------------------------------------------------------
def _qkv_proj_kernel(x_ref, w_ref, b_ref, qkv_ref, *, n_slices, dh8):
    x = x_ref[...]                                           # (TR, Cin_pad) bf16
    acc = jnp.dot(x, w_ref[...], preferred_element_type=jnp.float32)
    acc = acc + b_ref[...]                                   # (TR, Mpad) f32
    for sh in range(n_slices):                               # 3*H static slices
        qkv_ref[sh] = acc[:, sh * dh8:(sh + 1) * dh8].astype(qkv_ref.dtype)


def _qkv_projection(x_bf16, wqkv, bqkv, *, npad, tr, num_heads, dh8):
    cin_pad = x_bf16.shape[1]
    mpad = wqkv.shape[1]
    n_slices = 3 * num_heads
    cost = pl.CostEstimate(
        flops=2 * npad * cin_pad * mpad,
        transcendentals=0,
        bytes_accessed=(npad * cin_pad * 2 + cin_pad * mpad * 2
                        + n_slices * npad * dh8 * 2),
    )
    return pl.pallas_call(
        functools.partial(_qkv_proj_kernel, n_slices=n_slices, dh8=dh8),
        out_shape=jax.ShapeDtypeStruct((n_slices, npad, dh8), jnp.bfloat16),
        grid_spec=pltpu.PrefetchScalarGridSpec(
            num_scalar_prefetch=0,
            grid=(npad // tr,),
            in_specs=[
                pl.BlockSpec((tr, cin_pad), lambda i: (i, 0)),
                pl.BlockSpec((cin_pad, mpad), lambda i: (0, 0)),   # resident weight
                pl.BlockSpec((1, mpad), lambda i: (0, 0)),
            ],
            out_specs=pl.BlockSpec((n_slices, tr, dh8), lambda i: (0, i, 0)),
        ),
        compiler_params=pltpu.CompilerParams(
            dimension_semantics=("parallel",)),
        cost_estimate=cost,
    )(x_bf16, wqkv, bqkv)


# --------------------------------------------------------------------------
# Kernel 2: flash attention + sparse-aware edge bias + fused out-proj,
#           residual and LayerNorm, accumulating into the resident output block.
# --------------------------------------------------------------------------
def _flash_attn_kernel(*refs, add_residual, out_channels, num_nodes, tk):
    if add_residual:
        (slots_ref, q_ref, k_ref, v_ref, bias_ref, wo_ref, bo_ref,
         gamma_ref, beta_ref, res_ref, out_ref, m_scr, l_scr, acc_scr) = refs
    else:
        (slots_ref, q_ref, k_ref, v_ref, bias_ref, wo_ref, bo_ref,
         gamma_ref, beta_ref, out_ref, m_scr, l_scr, acc_scr) = refs
        res_ref = None
    del slots_ref  # consumed by the index maps only

    h = pl.program_id(1)
    j = pl.program_id(2)
    last_h = pl.num_programs(1) - 1
    last_j = pl.num_programs(2) - 1

    @pl.when(jnp.logical_and(h == 0, j == 0))
    def _():
        out_ref[...] = jnp.zeros_like(out_ref)

    @pl.when(j == 0)
    def _():
        m_scr[...] = jnp.full_like(m_scr, -jnp.inf)
        l_scr[...] = jnp.zeros_like(l_scr)
        acc_scr[...] = jnp.zeros_like(acc_scr)

    q = q_ref[0]                                             # (TQ, Dh8) bf16 (scaled)
    k = k_ref[0]                                             # (TK, Dh8) bf16
    v = v_ref[0]                                             # (TK, Dh8) bf16

    s = jnp.einsum('qd,kd->qk', q, k, preferred_element_type=jnp.float32)
    s = s + bias_ref[0].astype(jnp.float32)                  # (TQ, TK)

    # in-kernel key-padding mask (padded key columns never contribute)
    col = j * tk + lax.broadcasted_iota(jnp.int32, (1, tk), 1)
    valid = col < num_nodes
    s = jnp.where(valid, s, -1e30)

    # online softmax update (f32 statistics)
    m_prev = m_scr[...]
    m_new = jnp.maximum(m_prev, jnp.max(s, axis=-1, keepdims=True))
    alpha = jnp.exp(m_prev - m_new)
    p = jnp.exp(s - m_new)
    p = jnp.where(valid, p, 0.0)
    l_scr[...] = alpha * l_scr[...] + jnp.sum(p, axis=-1, keepdims=True)
    acc_scr[...] = alpha * acc_scr[...] + jnp.dot(
        p.astype(v.dtype), v, preferred_element_type=jnp.float32)
    m_scr[...] = m_new
    # TODO(synk): attention dropout omitted (eval-mode semantics).

    # finalize this head: exact normalization, fold into the output projection.
    @pl.when(j == last_j)
    def _():
        head_out = (acc_scr[...] / l_scr[...]).astype(wo_ref.dtype)   # (TQ, Dh8)
        out_ref[...] += jnp.dot(head_out, wo_ref[0],
                                preferred_element_type=jnp.float32)

    # epilogue: out-proj bias, residual, LayerNorm (masked to real out_channels).
    @pl.when(jnp.logical_and(h == last_h, j == last_j))
    def _():
        out = out_ref[...] + bo_ref[...]                     # (TQ, Cpad) f32
        if add_residual:
            out = out + res_ref[...]
        cpad = out.shape[-1]
        ccol = lax.broadcasted_iota(jnp.int32, (1, cpad), 1)
        cmask = (ccol < out_channels).astype(jnp.float32)
        out = out * cmask
        inv_c = 1.0 / out_channels
        mu = jnp.sum(out, axis=-1, keepdims=True) * inv_c
        cen = (out - mu) * cmask
        var = jnp.sum(cen * cen, axis=-1, keepdims=True) * inv_c
        normed = cen * lax.rsqrt(var + 1e-5)
        out_ref[...] = (normed * gamma_ref[...] + beta_ref[...]).astype(out_ref.dtype)


def _flash_attention(slots, qkv, bias, wo, bo, gamma, beta, residual, *,
                     num_heads, dh8, out_channels, cpad, npad, num_nodes,
                     tq, tk, add_residual):
    nq = npad // tq
    nk = npad // tk
    nqk = nq * nk

    def q_map(i, h, j, s): return (h, i, 0)
    def k_map(i, h, j, s): return (num_heads + h, j, 0)
    def v_map(i, h, j, s): return (2 * num_heads + h, j, 0)
    # data-dependent bias tile: empty tiles are redirected to the zero band (row 0).
    def bias_map(i, h, j, s): return (h, s[i * nk + j], s[nqk + i * nk + j])
    def wo_map(i, h, j, s): return (h, 0, 0)
    def vec_map(i, h, j, s): return (0, 0)
    def row_map(i, h, j, s): return (i, 0)

    in_specs = [
        pl.BlockSpec((1, tq, dh8), q_map),
        pl.BlockSpec((1, tk, dh8), k_map),
        pl.BlockSpec((1, tk, dh8), v_map),
        pl.BlockSpec((1, tq, tk), bias_map),
        pl.BlockSpec((1, dh8, cpad), wo_map),
        pl.BlockSpec((1, cpad), vec_map),     # bo
        pl.BlockSpec((1, cpad), vec_map),     # gamma
        pl.BlockSpec((1, cpad), vec_map),     # beta
    ]
    operands = [qkv, qkv, qkv, bias, wo, bo, gamma, beta]
    if add_residual:
        in_specs.append(pl.BlockSpec((tq, cpad), row_map))
        operands.append(residual)

    kernel = functools.partial(_flash_attn_kernel,
                               add_residual=add_residual,
                               out_channels=out_channels,
                               num_nodes=num_nodes,
                               tk=tk)

    # VMEM budget estimate (double-buffered inputs + resident output + scratch).
    est = (2 * tq * tk * 2                       # bias tiles (bf16, double-buffered)
           + 2 * (tq + 2 * tk) * dh8 * 2         # q/k/v tiles
           + tq * cpad * 4                       # resident f32 output block
           + (2 * tq * cpad * 4 if add_residual else 0)
           + 2 * dh8 * cpad * 2                  # Wo
           + tq * (dh8 + 2) * 4                  # scratch
           + 4 * tq * tk * 4)                    # score/prob temporaries
    vmem_limit = int(min(64 * 1024 * 1024, max(32 * 1024 * 1024, 2 * est)))

    cost = pl.CostEstimate(
        flops=(4 * num_heads * npad * npad * dh8
               + 2 * num_heads * npad * dh8 * cpad),
        transcendentals=num_heads * npad * npad,
        bytes_accessed=(num_heads * npad * npad * 2                 # bias upper bound
                        + 3 * num_heads * npad * dh8 * 2 * (1 + nq)
                        + npad * cpad * 4 * (2 if add_residual else 1)),
    )

    return pl.pallas_call(
        kernel,
        out_shape=jax.ShapeDtypeStruct((npad, cpad), jnp.float32),
        grid_spec=pltpu.PrefetchScalarGridSpec(
            num_scalar_prefetch=1,
            grid=(nq, num_heads, nk),
            in_specs=in_specs,
            out_specs=pl.BlockSpec((tq, cpad), row_map),
            scratch_shapes=[
                pltpu.VMEM((tq, 1), jnp.float32),      # m
                pltpu.VMEM((tq, 1), jnp.float32),      # l
                pltpu.VMEM((tq, dh8), jnp.float32),    # per-head PV accumulator
            ]),
        compiler_params=pltpu.CompilerParams(
            dimension_semantics=("parallel", "arbitrary", "arbitrary"),
            vmem_limit_bytes=vmem_limit),
        cost_estimate=cost,
    )(slots, *operands)


# --------------------------------------------------------------------------
# Wrapper: parameter packing / padding (JAX glue) + the two pallas_calls.
# --------------------------------------------------------------------------
def graph_attention_forward(x, edge_index, edge_attr, params, *, num_heads):
    """Forward pass matching GraphAttentionLayer.forward (eval mode)."""
    num_nodes, in_channels = x.shape
    out_channels = params["wq"].shape[1]
    head_dim = out_channels // num_heads
    add_residual = (in_channels == out_channels)

    cin_pad = _round_up(in_channels, 128)
    cpad = _round_up(out_channels, 128)
    dh8 = _round_up(head_dim, 8)               # no padding to 128 anymore
    npad = _round_up(num_nodes, 128)
    tq = _pick_tile(npad, cap=512, min_blocks=2)   # >=2 q-blocks for megacore / v7x
    tk = _pick_tile(npad, cap=512, min_blocks=1)
    tr = tq
    nq, nk = npad // tq, npad // tk

    f32 = jnp.float32
    bf16 = jnp.bfloat16
    scale = 1.0 / math.sqrt(head_dim)

    def pack_head_weight(w, b, s=1.0):
        # nn.Linear stored as (fan_in, fan_out): y = x @ w + b
        w = (w * s).reshape(in_channels, num_heads, head_dim)
        w = jnp.pad(w, ((0, cin_pad - in_channels), (0, 0), (0, dh8 - head_dim)))
        b = (b.reshape(num_heads, head_dim) * s)
        b = jnp.pad(b, ((0, 0), (0, dh8 - head_dim)))
        return w.reshape(cin_pad, num_heads * dh8), b.reshape(num_heads * dh8)

    wq, bq = pack_head_weight(params["wq"], params["bq"], scale)
    wk, bk = pack_head_weight(params["wk"], params["bk"])
    wv, bv = pack_head_weight(params["wv"], params["bv"])
    m_real = 3 * num_heads * dh8
    mpad = _round_up(m_real, 128)
    wqkv = jnp.concatenate([wq, wk, wv], axis=1)
    wqkv = jnp.pad(wqkv, ((0, 0), (0, mpad - m_real))).astype(bf16)
    bqkv = jnp.concatenate([bq, bk, bv])
    bqkv = jnp.pad(bqkv, (0, mpad - m_real)).reshape(1, mpad).astype(f32)

    wo = params["wo"].reshape(num_heads, head_dim, out_channels)
    wo = jnp.pad(wo, ((0, 0), (0, dh8 - head_dim), (0, cpad - out_channels)))
    wo = wo.astype(bf16)                                     # (H, Dh8, Cpad)
    bo = jnp.pad(params["bo"], ((0, 0), (0, cpad - out_channels))).astype(f32)
    gamma = jnp.pad(params["gamma"], ((0, 0), (0, cpad - out_channels))).astype(f32)
    beta = jnp.pad(params["beta"], ((0, 0), (0, cpad - out_channels))).astype(f32)

    x_pad = jnp.pad(x, ((0, npad - num_nodes),
                        (0, cin_pad - in_channels))).astype(f32)
    x_bf16 = x_pad.astype(bf16)

    # Edge bias: bf16-only build with a leading all-zero row band; per-tile slot
    # table (scalar-prefetched) redirects edge-free (q,k) tiles to the zero band so
    # their bias DMA can be skipped inside the flash kernel.
    # TODO(synk): fully sparse CSR-style in-kernel bias construction would remove
    # the O(H*N^2) densification entirely.
    have_edges = (edge_attr is not None) and (params.get("we") is not None)
    if have_edges:
        ev = (edge_attr @ params["we"] + params["be"]).astype(bf16)     # (E, H)
        src, dst = edge_index[0], edge_index[1]
        bias = jnp.zeros((num_heads, tq + npad, npad), bf16)
        bias = bias.at[:, src + tq, dst].set(ev.T)
        has = jnp.zeros((nq, nk), jnp.bool_).at[src // tq, dst // tk].set(True)
        slot_r = jnp.where(has, jnp.arange(1, nq + 1, dtype=jnp.int32)[:, None], 0)
        slot_c = jnp.where(has, jnp.arange(nk, dtype=jnp.int32)[None, :], 0)
        slots = jnp.concatenate([slot_r.reshape(-1),
                                 slot_c.reshape(-1)]).astype(jnp.int32)
    else:
        bias = jnp.zeros((num_heads, tq, npad), bf16)        # only the zero band
        slots = jnp.zeros((2 * nq * nk,), jnp.int32)

    qkv = _qkv_projection(x_bf16, wqkv, bqkv, npad=npad, tr=tr,
                          num_heads=num_heads, dh8=dh8)

    out_pad = _flash_attention(
        slots, qkv, bias, wo, bo, gamma, beta,
        x_pad if add_residual else None,
        num_heads=num_heads, dh8=dh8, out_channels=out_channels, cpad=cpad,
        npad=npad, num_nodes=num_nodes, tq=tq, tk=tk, add_residual=add_residual)

    return out_pad[:num_nodes, :out_channels]


def init_params(key, in_channels, out_channels, num_heads, edge_dim):
    """Deterministic parameter init (nn.Linear-style uniform bounds)."""
    keys = jax.random.split(key, 10)

    def linear(kw, kb, fan_in, fan_out):
        bound = 1.0 / math.sqrt(fan_in)
        w = jax.random.uniform(kw, (fan_in, fan_out), jnp.float32, -bound, bound)
        b = jax.random.uniform(kb, (1, fan_out), jnp.float32, -bound, bound)
        return w, b

    wq, bq = linear(keys[0], keys[1], in_channels, out_channels)
    wk, bk = linear(keys[2], keys[3], in_channels, out_channels)
    wv, bv = linear(keys[4], keys[5], in_channels, out_channels)
    wo, bo = linear(keys[6], keys[7], out_channels, out_channels)
    params = dict(
        wq=wq, bq=bq, wk=wk, bk=bk, wv=wv, bv=bv, wo=wo, bo=bo,
        gamma=jnp.ones((1, out_channels), jnp.float32),
        beta=jnp.zeros((1, out_channels), jnp.float32),
    )
    if edge_dim is not None:
        we, be = linear(keys[8], keys[9], edge_dim, num_heads)
        params["we"] = we
        params["be"] = be.reshape(num_heads)
    return params


if __name__ == "__main__":
    # Small synthetic graph consistent with the module's forward.
    num_nodes = 16
    in_channels = 32
    out_channels = 32
    num_heads = 4
    edge_dim = 8
    num_edges = 24

    key = jax.random.PRNGKey(0)
    k_x, k_e, k_src, k_dst, k_p = jax.random.split(key, 5)

    x = jax.random.normal(k_x, (num_nodes, in_channels), jnp.float32)
    edge_attr = jax.random.normal(k_e, (num_edges, edge_dim), jnp.float32)
    src = jax.random.randint(k_src, (num_edges,), 0, num_nodes)
    dst = jax.random.randint(k_dst, (num_edges,), 0, num_nodes)
    edge_index = jnp.stack([src, dst], axis=0)               # (2, E)

    params = init_params(k_p, in_channels, out_channels, num_heads, edge_dim)

    fwd = jax.jit(graph_attention_forward, static_argnames=("num_heads",))
    out = fwd(x, edge_index, edge_attr, params, num_heads=num_heads)
    out = jax.block_until_ready(out)

    assert out.shape == (num_nodes, out_channels)
    assert jnp.all(jnp.isfinite(out))
    print("KERNEL_OK")
</pallas_src>

<mosaic_0001>
module attributes {stable_mosaic.version = 11 : i64} {
  func.func @_qkv_proj_kernel(%arg0: i32, %arg1: memref<128x128xbf16, #tpu.memory_space<vmem>>, %arg2: memref<128x128xbf16, #tpu.memory_space<vmem>>, %arg3: memref<1x128xf32, #tpu.memory_space<vmem>>, %arg4: memref<12x128x8xbf16, #tpu.memory_space<vmem>>) attributes {dimension_semantics = [#tpu.dimension_semantics<parallel>], iteration_bounds = array<i64: 1>, scalar_prefetch = 0 : i64, scratch_operands = 0 : i64, tpu.core_type = #tpu.core_type<tc>, window_params = [{transform_indices = @transform_0, window_bounds = array<i64: 128, 128>}, {pipeline_mode = #tpu.pipeline_mode<synchronous>, transform_indices = @transform_1, window_bounds = array<i64: 128, 128>}, {pipeline_mode = #tpu.pipeline_mode<synchronous>, transform_indices = @transform_2, window_bounds = array<i64: 1, 128>}, {transform_indices = @transform_3, window_bounds = array<i64: 12, 128, 8>}]} {
    %c0 = arith.constant 0 : index
    %c0_0 = arith.constant 0 : index
    %0 = vector.load %arg1[%c0, %c0_0] : memref<128x128xbf16, #tpu.memory_space<vmem>>, vector<128x128xbf16>
    %c0_1 = arith.constant 0 : index
    %c0_2 = arith.constant 0 : index
    %1 = vector.load %arg2[%c0_1, %c0_2] : memref<128x128xbf16, #tpu.memory_space<vmem>>, vector<128x128xbf16>
    %cst = arith.constant dense<0.000000e+00> : vector<128x128xf32>
    %2 = tpu.matmul %0, %1, %cst {dimension_numbers = #tpu.dot_dimension_numbers<[1], [0], [0], [1], [0, 0, 1, 1], [], []>} : vector<128x128xbf16>, vector<128x128xbf16>, vector<128x128xf32> -> vector<128x128xf32>
    %c0_3 = arith.constant 0 : index
    %c0_4 = arith.constant 0 : index
    %3 = vector.load %arg3[%c0_3, %c0_4] : memref<1x128xf32, #tpu.memory_space<vmem>>, vector<1x128xf32>
    %4 = vector.broadcast %3 : vector<1x128xf32> to vector<128x128xf32>
    %5 = arith.addf %2, %4 : vector<128x128xf32>
    %6 = vector.extract_strided_slice %5 {offsets = [0, 0], sizes = [128, 8], strides = [1, 1]} : vector<128x128xf32> to vector<128x8xf32>
    %7 = arith.truncf %6 : vector<128x8xf32> to vector<128x8xbf16>
    %c0_5 = arith.constant 0 : index
    %c0_6 = arith.constant 0 : index
    %c0_7 = arith.constant 0 : index
    %8 = vector.load %arg4[%c0_5, %c0_6, %c0_7] : memref<12x128x8xbf16, #tpu.memory_space<vmem>>, vector<1x128x8xbf16>
    %9 = vector.shape_cast %8 : vector<1x128x8xbf16> to vector<128x8xbf16>
    %10 = vector.shape_cast %7 : vector<128x8xbf16> to vector<1x128x8xbf16>
    tpu.vector_store %arg4[%c0_5, %c0_6, %c0_7], %10 {strides = array<i32>} : memref<12x128x8xbf16, #tpu.memory_space<vmem>>, vector<1x128x8xbf16>,
    %11 = vector.extract_strided_slice %5 {offsets = [0, 8], sizes = [128, 8], strides = [1, 1]} : vector<128x128xf32> to vector<128x8xf32>
    %12 = arith.truncf %11 : vector<128x8xf32> to vector<128x8xbf16>
    %c1 = arith.constant 1 : index
    %c0_8 = arith.constant 0 : index
    %c0_9 = arith.constant 0 : index
    %13 = vector.load %arg4[%c1, %c0_8, %c0_9] : memref<12x128x8xbf16, #tpu.memory_space<vmem>>, vector<1x128x8xbf16>
    %14 = vector.shape_cast %13 : vector<1x128x8xbf16> to vector<128x8xbf16>
    %15 = vector.shape_cast %12 : vector<128x8xbf16> to vector<1x128x8xbf16>
    tpu.vector_store %arg4[%c1, %c0_8, %c0_9], %15 {strides = array<i32>} : memref<12x128x8xbf16, #tpu.memory_space<vmem>>, vector<1x128x8xbf16>,
    %16 = vector.extract_strided_slice %5 {offsets = [0, 16], sizes = [128, 8], strides = [1, 1]} : vector<128x128xf32> to vector<128x8xf32>
    %17 = arith.truncf %16 : vector<128x8xf32> to vector<128x8xbf16>
    %c2 = arith.constant 2 : index
    %c0_10 = arith.constant 0 : index
    %c0_11 = arith.constant 0 : index
    %18 = vector.load %arg4[%c2, %c0_10, %c0_11] : memref<12x128x8xbf16, #tpu.memory_space<vmem>>, vector<1x128x8xbf16>
    %19 = vector.shape_cast %18 : vector<1x128x8xbf16> to vector<128x8xbf16>
    %20 = vector.shape_cast %17 : vector<128x8xbf16> to vector<1x128x8xbf16>
    tpu.vector_store %arg4[%c2, %c0_10, %c0_11], %20 {strides = array<i32>} : memref<12x128x8xbf16, #tpu.memory_space<vmem>>, vector<1x128x8xbf16>,
    %21 = vector.extract_strided_slice %5 {offsets = [0, 24], sizes = [128, 8], strides = [1, 1]} : vector<128x128xf32> to vector<128x8xf32>
    %22 = arith.truncf %21 : vector<128x8xf32> to vector<128x8xbf16>
    %c3 = arith.constant 3 : index
    %c0_12 = arith.constant 0 : index
    %c0_13 = arith.constant 0 : index
    %23 = vector.load %arg4[%c3, %c0_12, %c0_13] : memref<12x128x8xbf16, #tpu.memory_space<vmem>>, vector<1x128x8xbf16>
    %24 = vector.shape_cast %23 : vector<1x128x8xbf16> to vector<128x8xbf16>
    %25 = vector.shape_cast %22 : vector<128x8xbf16> to vector<1x128x8xbf16>
    tpu.vector_store %arg4[%c3, %c0_12, %c0_13], %25 {strides = array<i32>} : memref<12x128x8xbf16, #tpu.memory_space<vmem>>, vector<1x128x8xbf16>,
    %26 = vector.extract_strided_slice %5 {offsets = [0, 32], sizes = [128, 8], strides = [1, 1]} : vector<128x128xf32> to vector<128x8xf32>
    %27 = arith.truncf %26 : vector<128x8xf32> to vector<128x8xbf16>
    %c4 = arith.constant 4 : index
    %c0_14 = arith.constant 0 : index
    %c0_15 = arith.constant 0 : index
    %28 = vector.load %arg4[%c4, %c0_14, %c0_15] : memref<12x128x8xbf16, #tpu.memory_space<vmem>>, vector<1x128x8xbf16>
    %29 = vector.shape_cast %28 : vector<1x128x8xbf16> to vector<128x8xbf16>
    %30 = vector.shape_cast %27 : vector<128x8xbf16> to vector<1x128x8xbf16>
    tpu.vector_store %arg4[%c4, %c0_14, %c0_15], %30 {strides = array<i32>} : memref<12x128x8xbf16, #tpu.memory_space<vmem>>, vector<1x128x8xbf16>,
    %31 = vector.extract_strided_slice %5 {offsets = [0, 40], sizes = [128, 8], strides = [1, 1]} : vector<128x128xf32> to vector<128x8xf32>
    %32 = arith.truncf %31 : vector<128x8xf32> to vector<128x8xbf16>
    %c5 = arith.constant 5 : index
    %c0_16 = arith.constant 0 : index
    %c0_17 = arith.constant 0 : index
    %33 = vector.load %arg4[%c5, %c0_16, %c0_17] : memref<12x128x8xbf16, #tpu.memory_space<vmem>>, vector<1x128x8xbf16>
    %34 = vector.shape_cast %33 : vector<1x128x8xbf16> to vector<128x8xbf16>
    %35 = vector.shape_cast %32 : vector<128x8xbf16> to vector<1x128x8xbf16>
    tpu.vector_store %arg4[%c5, %c0_16, %c0_17], %35 {strides = array<i32>} : memref<12x128x8xbf16, #tpu.memory_space<vmem>>, vector<1x128x8xbf16>,
    %36 = vector.extract_strided_slice %5 {offsets = [0, 48], sizes = [128, 8], strides = [1, 1]} : vector<128x128xf32> to vector<128x8xf32>
    %37 = arith.truncf %36 : vector<128x8xf32> to vector<128x8xbf16>
    %c6 = arith.constant 6 : index
    %c0_18 = arith.constant 0 : index
    %c0_19 = arith.constant 0 : index
    %38 = vector.load %arg4[%c6, %c0_18, %c0_19] : memref<12x128x8xbf16, #tpu.memory_space<vmem>>, vector<1x128x8xbf16>
    %39 = vector.shape_cast %38 : vector<1x128x8xbf16> to vector<128x8xbf16>
    %40 = vector.shape_cast %37 : vector<128x8xbf16> to vector<1x128x8xbf16>
    tpu.vector_store %arg4[%c6, %c0_18, %c0_19], %40 {strides = array<i32>} : memref<12x128x8xbf16, #tpu.memory_space<vmem>>, vector<1x128x8xbf16>,
    %41 = vector.extract_strided_slice %5 {offsets = [0, 56], sizes = [128, 8], strides = [1, 1]} : vector<128x128xf32> to vector<128x8xf32>
    %42 = arith.truncf %41 : vector<128x8xf32> to vector<128x8xbf16>
    %c7 = arith.constant 7 : index
    %c0_20 = arith.constant 0 : index
    %c0_21 = arith.constant 0 : index
    %43 = vector.load %arg4[%c7, %c0_20, %c0_21] : memref<12x128x8xbf16, #tpu.memory_space<vmem>>, vector<1x128x8xbf16>
    %44 = vector.shape_cast %43 : vector<1x128x8xbf16> to vector<128x8xbf16>
    %45 = vector.shape_cast %42 : vector<128x8xbf16> to vector<1x128x8xbf16>
    tpu.vector_store %arg4[%c7, %c0_20, %c0_21], %45 {strides = array<i32>} : memref<12x128x8xbf16, #tpu.memory_space<vmem>>, vector<1x128x8xbf16>,
    %46 = vector.extract_strided_slice %5 {offsets = [0, 64], sizes = [128, 8], strides = [1, 1]} : vector<128x128xf32> to vector<128x8xf32>
    %47 = arith.truncf %46 : vector<128x8xf32> to vector<128x8xbf16>
    %c8 = arith.constant 8 : index
    %c0_22 = arith.constant 0 : index
    %c0_23 = arith.constant 0 : index
    %48 = vector.load %arg4[%c8, %c0_22, %c0_23] : memref<12x128x8xbf16, #tpu.memory_space<vmem>>, vector<1x128x8xbf16>
    %49 = vector.shape_cast %48 : vector<1x128x8xbf16> to vector<128x8xbf16>
    %50 = vector.shape_cast %47 : vector<128x8xbf16> to vector<1x128x8xbf16>
    tpu.vector_store %arg4[%c8, %c0_22, %c0_23], %50 {strides = array<i32>} : memref<12x128x8xbf16, #tpu.memory_space<vmem>>, vector<1x128x8xbf16>,
    %51 = vector.extract_strided_slice %5 {offsets = [0, 72], sizes = [128, 8], strides = [1, 1]} : vector<128x128xf32> to vector<128x8xf32>
    %52 = arith.truncf %51 : vector<128x8xf32> to vector<128x8xbf16>
    %c9 = arith.constant 9 : index
    %c0_24 = arith.constant 0 : index
    %c0_25 = arith.constant 0 : index
    %53 = vector.load %arg4[%c9, %c0_24, %c0_25] : memref<12x128x8xbf16, #tpu.memory_space<vmem>>, vector<1x128x8xbf16>
    %54 = vector.shape_cast %53 : vector<1x128x8xbf16> to vector<128x8xbf16>
    %55 = vector.shape_cast %52 : vector<128x8xbf16> to vector<1x128x8xbf16>
    tpu.vector_store %arg4[%c9, %c0_24, %c0_25], %55 {strides = array<i32>} : memref<12x128x8xbf16, #tpu.memory_space<vmem>>, vector<1x128x8xbf16>,
    %56 = vector.extract_strided_slice %5 {offsets = [0, 80], sizes = [128, 8], strides = [1, 1]} : vector<128x128xf32> to vector<128x8xf32>
    %57 = arith.truncf %56 : vector<128x8xf32> to vector<128x8xbf16>
    %c10 = arith.constant 10 : index
    %c0_26 = arith.constant 0 : index
    %c0_27 = arith.constant 0 : index
    %58 = vector.load %arg4[%c10, %c0_26, %c0_27] : memref<12x128x8xbf16, #tpu.memory_space<vmem>>, vector<1x128x8xbf16>
    %59 = vector.shape_cast %58 : vector<1x128x8xbf16> to vector<128x8xbf16>
    %60 = vector.shape_cast %57 : vector<128x8xbf16> to vector<1x128x8xbf16>
    tpu.vector_store %arg4[%c10, %c0_26, %c0_27], %60 {strides = array<i32>} : memref<12x128x8xbf16, #tpu.memory_space<vmem>>, vector<1x128x8xbf16>,
    %61 = vector.extract_strided_slice %5 {offsets = [0, 88], sizes = [128, 8], strides = [1, 1]} : vector<128x128xf32> to vector<128x8xf32>
    %62 = arith.truncf %61 : vector<128x8xf32> to vector<128x8xbf16>
    %c11 = arith.constant 11 : index
    %c0_28 = arith.constant 0 : index
    %c0_29 = arith.constant 0 : index
    %63 = vector.load %arg4[%c11, %c0_28, %c0_29] : memref<12x128x8xbf16, #tpu.memory_space<vmem>>, vector<1x128x8xbf16>
    %64 = vector.shape_cast %63 : vector<1x128x8xbf16> to vector<128x8xbf16>
    %65 = vector.shape_cast %62 : vector<128x8xbf16> to vector<1x128x8xbf16>
    tpu.vector_store %arg4[%c11, %c0_28, %c0_29], %65 {strides = array<i32>} : memref<12x128x8xbf16, #tpu.memory_space<vmem>>, vector<1x128x8xbf16>,
    return
  }
  func.func @transform_0(%arg0: i32) -> (i32, i32) {
    %c0_i32 = arith.constant 0 : i32
    %c0_i32_0 = arith.constant 0 : i32
    return %arg0, %c0_i32 : i32, i32
  }
  func.func @transform_1(%arg0: i32) -> (i32, i32) {
    %c0_i32 = arith.constant 0 : i32
    %c0_i32_0 = arith.constant 0 : i32
    %c0_i32_1 = arith.constant 0 : i32
    return %c0_i32, %c0_i32_0 : i32, i32
  }
  func.func @transform_2(%arg0: i32) -> (i32, i32) {
    %c0_i32 = arith.constant 0 : i32
    %c0_i32_0 = arith.constant 0 : i32
    %c0_i32_1 = arith.constant 0 : i32
    return %c0_i32, %c0_i32_0 : i32, i32
  }
  func.func @transform_3(%arg0: i32) -> (i32, i32, i32) {
    %c0_i32 = arith.constant 0 : i32
    %c0_i32_0 = arith.constant 0 : i32
    %c0_i32_1 = arith.constant 0 : i32
    return %c0_i32, %arg0, %c0_i32_0 : i32, i32, i32
  }
}

module attributes {stable_mosaic.version = 11 : i64} {
  func.func @_flash_attn_kernel(%arg0: i32, %arg1: i32, %arg2: i32, %arg3: memref<2xi32, #tpu.memory_space<smem>>, %arg4: memref<1x128x8xbf16, #tpu.memory_space<vmem>>, %arg5: memref<1x128x8xbf16, #tpu.memory_space<vmem>>, %arg6: memref<1x128x8xbf16, #tpu.memory_space<vmem>>, %arg7: memref<1x128x128xbf16, #tpu.memory_space<vmem>>, %arg8: memref<1x8x128xbf16, #tpu.memory_space<vmem>>, %arg9: memref<1x128xf32, #tpu.memory_space<vmem>>, %arg10: memref<1x128xf32, #tpu.memory_space<vmem>>, %arg11: memref<1x128xf32, #tpu.memory_space<vmem>>, %arg12: memref<128x128xf32, #tpu.memory_space<vmem>>, %arg13: memref<128x128xf32, #tpu.memory_space<vmem>>, %arg14: memref<128x1xf32, #tpu.memory_space<vmem>>, %arg15: memref<128x1xf32, #tpu.memory_space<vmem>>, %arg16: memref<128x8xf32, #tpu.memory_space<vmem>>) attributes {dimension_semantics = [#tpu.dimension_semantics<parallel>, #tpu.dimension_semantics<arbitrary>, #tpu.dimension_semantics<arbitrary>], iteration_bounds = array<i64: 1, 4, 1>, scalar_prefetch = 1 : i64, scratch_operands = 3 : i64, tpu.core_type = #tpu.core_type<tc>, window_params = [{transform_indices = @transform_0, window_bounds = array<i64: 1, 128, 8>}, {transform_indices = @transform_1, window_bounds = array<i64: 1, 128, 8>}, {transform_indices = @transform_2, window_bounds = array<i64: 1, 128, 8>}, {transform_indices = @transform_3, window_bounds = array<i64: 1, 128, 128>}, {transform_indices = @transform_4, window_bounds = array<i64: 1, 8, 128>}, {pipeline_mode = #tpu.pipeline_mode<synchronous>, transform_indices = @transform_5, window_bounds = array<i64: 1, 128>}, {pipeline_mode = #tpu.pipeline_mode<synchronous>, transform_indices = @transform_6, window_bounds = array<i64: 1, 128>}, {pipeline_mode = #tpu.pipeline_mode<synchronous>, transform_indices = @transform_7, window_bounds = array<i64: 1, 128>}, {transform_indices = @transform_8, window_bounds = array<i64: 128, 128>}, {transform_indices = @transform_9, window_bounds = array<i64: 128, 128>}]} {
    %c0_i32 = arith.constant 0 : i32
    %0 = arith.cmpi eq, %arg1, %c0_i32 : i32
    %c0_i32_0 = arith.constant 0 : i32
    %1 = arith.cmpi eq, %arg2, %c0_i32_0 : i32
    %2 = arith.andi %0, %1 : i1
    %3 = arith.extui %2 : i1 to i32
    %c0_i32_1 = arith.constant 0 : i32
    %4 = arith.cmpi ne, %3, %c0_i32_1 : i32
    scf.if %4 {
      %cst_36 = arith.constant 0.000000e+00 : f32
      %64 = vector.broadcast %cst_36 : f32 to vector<128x128xf32>
      %c0_37 = arith.constant 0 : index
      %c0_38 = arith.constant 0 : index
      %65 = vector.load %arg13[%c0_37, %c0_38] : memref<128x128xf32, #tpu.memory_space<vmem>>, vector<128x128xf32>
      tpu.vector_store %arg13[%c0_37, %c0_38], %64 {strides = array<i32>} : memref<128x128xf32, #tpu.memory_space<vmem>>, vector<128x128xf32>,
    } else {
    }
    %c0_i32_2 = arith.constant 0 : i32
    %5 = arith.cmpi eq, %arg2, %c0_i32_2 : i32
    %6 = arith.extui %5 : i1 to i32
    %c0_i32_3 = arith.constant 0 : i32
    %7 = arith.cmpi ne, %6, %c0_i32_3 : i32
    scf.if %7 {
      %cst_36 = arith.constant 0xFF800000 : f32
      %64 = vector.broadcast %cst_36 : f32 to vector<128x1xf32>
      %c0_37 = arith.constant 0 : index
      %c0_38 = arith.constant 0 : index
      %65 = vector.load %arg14[%c0_37, %c0_38] : memref<128x1xf32, #tpu.memory_space<vmem>>, vector<128x1xf32>
      tpu.vector_store %arg14[%c0_37, %c0_38], %64 {strides = array<i32>} : memref<128x1xf32, #tpu.memory_space<vmem>>, vector<128x1xf32>,
      %cst_39 = arith.constant 0.000000e+00 : f32
      %66 = vector.broadcast %cst_39 : f32 to vector<128x1xf32>
      %c0_40 = arith.constant 0 : index
      %c0_41 = arith.constant 0 : index
      %67 = vector.load %arg15[%c0_40, %c0_41] : memref<128x1xf32, #tpu.memory_space<vmem>>, vector<128x1xf32>
      tpu.vector_store %arg15[%c0_40, %c0_41], %66 {strides = array<i32>} : memref<128x1xf32, #tpu.memory_space<vmem>>, vector<128x1xf32>,
      %cst_42 = arith.constant 0.000000e+00 : f32
      %68 = vector.broadcast %cst_42 : f32 to vector<128x8xf32>
      %c0_43 = arith.constant 0 : index
      %c0_44 = arith.constant 0 : index
      %69 = vector.load %arg16[%c0_43, %c0_44] : memref<128x8xf32, #tpu.memory_space<vmem>>, vector<128x8xf32>
      tpu.vector_store %arg16[%c0_43, %c0_44], %68 {strides = array<i32>} : memref<128x8xf32, #tpu.memory_space<vmem>>, vector<128x8xf32>,
    } else {
    }
    %c0 = arith.constant 0 : index
    %c0_4 = arith.constant 0 : index
    %c0_5 = arith.constant 0 : index
    %8 = vector.load %arg4[%c0, %c0_4, %c0_5] : memref<1x128x8xbf16, #tpu.memory_space<vmem>>, vector<1x128x8xbf16>
    %9 = vector.shape_cast %8 : vector<1x128x8xbf16> to vector<128x8xbf16>
    %c0_6 = arith.constant 0 : index
    %c0_7 = arith.constant 0 : index
    %c0_8 = arith.constant 0 : index
    %10 = vector.load %arg5[%c0_6, %c0_7, %c0_8] : memref<1x128x8xbf16, #tpu.memory_space<vmem>>, vector<1x128x8xbf16>
    %11 = vector.shape_cast %10 : vector<1x128x8xbf16> to vector<128x8xbf16>
    %c0_9 = arith.constant 0 : index
    %c0_10 = arith.constant 0 : index
    %c0_11 = arith.constant 0 : index
    %12 = vector.load %arg6[%c0_9, %c0_10, %c0_11] : memref<1x128x8xbf16, #tpu.memory_space<vmem>>, vector<1x128x8xbf16>
    %13 = vector.shape_cast %12 : vector<1x128x8xbf16> to vector<128x8xbf16>
    "tpu.trace_start"() <{level = 10 : i32, message = "qd,kd->qk"}> : () -> ()
    %cst = arith.constant dense<0.000000e+00> : vector<128x128xf32>
    %14 = tpu.matmul %9, %11, %cst {dimension_numbers = #tpu.dot_dimension_numbers<[1], [1], [0], [0], [0, 0, 1, 0], [], []>} : vector<128x8xbf16>, vector<128x8xbf16>, vector<128x128xf32> -> vector<128x128xf32>
    "tpu.trace_stop"() : () -> ()
    %c0_12 = arith.constant 0 : index
    %c0_13 = arith.constant 0 : index
    %c0_14 = arith.constant 0 : index
    %15 = vector.load %arg7[%c0_12, %c0_13, %c0_14] : memref<1x128x128xbf16, #tpu.memory_space<vmem>>, vector<1x128x128xbf16>
    %16 = vector.shape_cast %15 : vector<1x128x128xbf16> to vector<128x128xbf16>
    %17 = arith.extf %16 : vector<128x128xbf16> to vector<128x128xf32>
    %18 = arith.addf %14, %17 : vector<128x128xf32>
    %c128_i32 = arith.constant 128 : i32
    %19 = arith.muli %arg2, %c128_i32 : i32
    %20 = tpu.iota {dimensions = array<i32: 1>} : vector<1x128xi32>
    %21 = vector.broadcast %19 : i32 to vector<1x128xi32>
    %22 = arith.addi %21, %20 : vector<1x128xi32>
    %c16_i32 = arith.constant 16 : i32
    %23 = vector.broadcast %c16_i32 : i32 to vector<1x128xi32>
    %24 = arith.cmpi slt, %22, %23 : vector<1x128xi32>
    %cst_15 = arith.constant -1.000000e+30 : f32
    %25 = vector.shape_cast %24 : vector<1x128xi1> to vector<1x128xi1>
    %26 = vector.broadcast %25 : vector<1x128xi1> to vector<128x128xi1>
    %27 = vector.broadcast %cst_15 : f32 to vector<128x128xf32>
    %28 = arith.select %26, %18, %27 : vector<128x128xi1>, vector<128x128xf32>
    %c0_16 = arith.constant 0 : index
    %c0_17 = arith.constant 0 : index
    %29 = vector.load %arg14[%c0_16, %c0_17] : memref<128x1xf32, #tpu.memory_space<vmem>>, vector<128x1xf32>
    %cst_18 = arith.constant dense<0xFF800000> : vector<128xf32>
    %30 = vector.multi_reduction <maximumf>, %28, %cst_18 [1] : vector<128x128xf32> to vector<128xf32>
    %31 = vector.shape_cast %30 : vector<128xf32> to vector<128x1xf32>
    %32 = arith.maximumf %29, %31 : vector<128x1xf32>
    %33 = arith.subf %29, %32 : vector<128x1xf32>
    %34 = math.exp %33 : vector<128x1xf32>
    %35 = vector.broadcast %32 : vector<128x1xf32> to vector<128x128xf32>
    %36 = arith.subf %28, %35 : vector<128x128xf32>
    %37 = math.exp %36 : vector<128x128xf32>
    %cst_19 = arith.constant 0.000000e+00 : f32
    %38 = vector.shape_cast %24 : vector<1x128xi1> to vector<1x128xi1>
    %39 = vector.broadcast %38 : vector<1x128xi1> to vector<128x128xi1>
    %40 = vector.broadcast %cst_19 : f32 to vector<128x128xf32>
    %41 = arith.select %39, %37, %40 : vector<128x128xi1>, vector<128x128xf32>
    %c0_20 = arith.constant 0 : index
    %c0_21 = arith.constant 0 : index
    %42 = vector.load %arg15[%c0_20, %c0_21] : memref<128x1xf32, #tpu.memory_space<vmem>>, vector<128x1xf32>
    %43 = arith.mulf %34, %42 : vector<128x1xf32>
    %cst_22 = arith.constant dense<0.000000e+00> : vector<128xf32>
    %44 = vector.multi_reduction <add>, %41, %cst_22 [1] : vector<128x128xf32> to vector<128xf32>
    %45 = vector.shape_cast %44 : vector<128xf32> to vector<128x1xf32>
    %46 = arith.addf %43, %45 : vector<128x1xf32>
    %c0_23 = arith.constant 0 : index
    %c0_24 = arith.constant 0 : index
    %47 = vector.load %arg15[%c0_23, %c0_24] : memref<128x1xf32, #tpu.memory_space<vmem>>, vector<128x1xf32>
    tpu.vector_store %arg15[%c0_23, %c0_24], %46 {strides = array<i32>} : memref<128x1xf32, #tpu.memory_space<vmem>>, vector<128x1xf32>,
    %c0_25 = arith.constant 0 : index
    %c0_26 = arith.constant 0 : index
    %48 = vector.load %arg16[%c0_25, %c0_26] : memref<128x8xf32, #tpu.memory_space<vmem>>, vector<128x8xf32>
    %49 = vector.broadcast %34 : vector<128x1xf32> to vector<128x8xf32>
    %50 = arith.mulf %49, %48 : vector<128x8xf32>
    %51 = arith.truncf %41 : vector<128x128xf32> to vector<128x128xbf16>
    %cst_27 = arith.constant dense<0.000000e+00> : vector<128x8xf32>
    %52 = tpu.matmul %51, %13, %cst_27 {dimension_numbers = #tpu.dot_dimension_numbers<[1], [0], [0], [1], [0, 0, 1, 1], [], []>} : vector<128x128xbf16>, vector<128x8xbf16>, vector<128x8xf32> -> vector<128x8xf32>
    %53 = arith.addf %50, %52 : vector<128x8xf32>
    %c0_28 = arith.constant 0 : index
    %c0_29 = arith.constant 0 : index
    %54 = vector.load %arg16[%c0_28, %c0_29] : memref<128x8xf32, #tpu.memory_space<vmem>>, vector<128x8xf32>
    tpu.vector_store %arg16[%c0_28, %c0_29], %53 {strides = array<i32>} : memref<128x8xf32, #tpu.memory_space<vmem>>, vector<128x8xf32>,
    %c0_30 = arith.constant 0 : index
    %c0_31 = arith.constant 0 : index
    %55 = vector.load %arg14[%c0_30, %c0_31] : memref<128x1xf32, #tpu.memory_space<vmem>>, vector<128x1xf32>
    tpu.vector_store %arg14[%c0_30, %c0_31], %32 {strides = array<i32>} : memref<128x1xf32, #tpu.memory_space<vmem>>, vector<128x1xf32>,
    %c0_i32_32 = arith.constant 0 : i32
    %56 = arith.cmpi eq, %arg2, %c0_i32_32 : i32
    %57 = arith.extui %56 : i1 to i32
    %c0_i32_33 = arith.constant 0 : i32
    %58 = arith.cmpi ne, %57, %c0_i32_33 : i32
    scf.if %58 {
      %c0_36 = arith.constant 0 : index
      %c0_37 = arith.constant 0 : index
      %64 = vector.load %arg16[%c0_36, %c0_37] : memref<128x8xf32, #tpu.memory_space<vmem>>, vector<128x8xf32>
      %c0_38 = arith.constant 0 : index
      %c0_39 = arith.constant 0 : index
      %65 = vector.load %arg15[%c0_38, %c0_39] : memref<128x1xf32, #tpu.memory_space<vmem>>, vector<128x1xf32>
      %66 = vector.broadcast %65 : vector<128x1xf32> to vector<128x8xf32>
      %67 = arith.divf %64, %66 : vector<128x8xf32>
      %68 = arith.truncf %67 : vector<128x8xf32> to vector<128x8xbf16>
      %c0_40 = arith.constant 0 : index
      %c0_41 = arith.constant 0 : index
      %69 = vector.load %arg13[%c0_40, %c0_41] : memref<128x128xf32, #tpu.memory_space<vmem>>, vector<128x128xf32>
      %c0_42 = arith.constant 0 : index
      %c0_43 = arith.constant 0 : index
      %c0_44 = arith.constant 0 : index
      %70 = vector.load %arg8[%c0_42, %c0_43, %c0_44] : memref<1x8x128xbf16, #tpu.memory_space<vmem>>, vector<1x8x128xbf16>
      %71 = vector.shape_cast %70 : vector<1x8x128xbf16> to vector<8x128xbf16>
      %cst_45 = arith.constant dense<0.000000e+00> : vector<128x128xf32>
      %72 = tpu.matmul %68, %71, %cst_45 {dimension_numbers = #tpu.dot_dimension_numbers<[1], [0], [0], [1], [0, 0, 1, 1], [], []>} : vector<128x8xbf16>, vector<8x128xbf16>, vector<128x128xf32> -> vector<128x128xf32>
      %73 = arith.addf %69, %72 : vector<128x128xf32>
      %c0_46 = arith.constant 0 : index
      %c0_47 = arith.constant 0 : index
      %74 = vector.load %arg13[%c0_46, %c0_47] : memref<128x128xf32, #tpu.memory_space<vmem>>, vector<128x128xf32>
      tpu.vector_store %arg13[%c0_46, %c0_47], %73 {strides = array<i32>} : memref<128x128xf32, #tpu.memory_space<vmem>>, vector<128x128xf32>,
    } else {
    }
    %c3_i32 = arith.constant 3 : i32
    %59 = arith.cmpi eq, %arg1, %c3_i32 : i32
    %c0_i32_34 = arith.constant 0 : i32
    %60 = arith.cmpi eq, %arg2, %c0_i32_34 : i32
    %61 = arith.andi %59, %60 : i1
    %62 = arith.extui %61 : i1 to i32
    %c0_i32_35 = arith.constant 0 : i32
    %63 = arith.cmpi ne, %62, %c0_i32_35 : i32
    scf.if %63 {
      %c0_36 = arith.constant 0 : index
      %c0_37 = arith.constant 0 : index
      %64 = vector.load %arg13[%c0_36, %c0_37] : memref<128x128xf32, #tpu.memory_space<vmem>>, vector<128x128xf32>
      %c0_38 = arith.constant 0 : index
      %c0_39 = arith.constant 0 : index
      %65 = vector.load %arg9[%c0_38, %c0_39] : memref<1x128xf32, #tpu.memory_space<vmem>>, vector<1x128xf32>
      %66 = vector.broadcast %65 : vector<1x128xf32> to vector<128x128xf32>
      %67 = arith.addf %64, %66 : vector<128x128xf32>
      %c0_40 = arith.constant 0 : index
      %c0_41 = arith.constant 0 : index
      %68 = vector.load %arg12[%c0_40, %c0_41] : memref<128x128xf32, #tpu.memory_space<vmem>>, vector<128x128xf32>
      %69 = arith.addf %67, %68 : vector<128x128xf32>
      %70 = tpu.iota {dimensions = array<i32: 1>} : vector<1x128xi32>
      %c32_i32 = arith.constant 32 : i32
      %71 = vector.broadcast %c32_i32 : i32 to vector<1x128xi32>
      %72 = arith.cmpi slt, %70, %71 : vector<1x128xi32>
      %73 = arith.extui %72 : vector<1x128xi1> to vector<1x128xi32>
      %74 = arith.sitofp %73 : vector<1x128xi32> to vector<1x128xf32>
      %75 = vector.broadcast %74 : vector<1x128xf32> to vector<128x128xf32>
      %76 = arith.mulf %69, %75 : vector<128x128xf32>
      %cst_42 = arith.constant dense<0.000000e+00> : vector<128xf32>
      %77 = vector.multi_reduction <add>, %76, %cst_42 [1] : vector<128x128xf32> to vector<128xf32>
      %78 = vector.shape_cast %77 : vector<128xf32> to vector<128x1xf32>
      %cst_43 = arith.constant 3.125000e-02 : f32
      %79 = vector.broadcast %cst_43 : f32 to vector<128x1xf32>
      %80 = arith.mulf %78, %79 : vector<128x1xf32>
      %81 = vector.broadcast %80 : vector<128x1xf32> to vector<128x128xf32>
      %82 = arith.subf %76, %81 : vector<128x128xf32>
      %83 = vector.broadcast %74 : vector<1x128xf32> to vector<128x128xf32>
      %84 = arith.mulf %82, %83 : vector<128x128xf32>
      %85 = arith.mulf %84, %84 : vector<128x128xf32>
      %cst_44 = arith.constant dense<0.000000e+00> : vector<128xf32>
      %86 = vector.multi_reduction <add>, %85, %cst_44 [1] : vector<128x128xf32> to vector<128xf32>
      %87 = vector.shape_cast %86 : vector<128xf32> to vector<128x1xf32>
      %cst_45 = arith.constant 3.125000e-02 : f32
      %88 = vector.broadcast %cst_45 : f32 to vector<128x1xf32>
      %89 = arith.mulf %87, %88 : vector<128x1xf32>
      %cst_46 = arith.constant 9.99999974E-6 : f32
      %90 = vector.broadcast %cst_46 : f32 to vector<128x1xf32>
      %91 = arith.addf %89, %90 : vector<128x1xf32>
      %92 = math.rsqrt %91 : vector<128x1xf32>
      %93 = vector.broadcast %92 : vector<128x1xf32> to vector<128x128xf32>
      %94 = arith.mulf %84, %93 : vector<128x128xf32>
      %c0_47 = arith.constant 0 : index
      %c0_48 = arith.constant 0 : index
      %95 = vector.load %arg10[%c0_47, %c0_48] : memref<1x128xf32, #tpu.memory_space<vmem>>, vector<1x128xf32>
      %96 = vector.broadcast %95 : vector<1x128xf32> to vector<128x128xf32>
      %97 = arith.mulf %94, %96 : vector<128x128xf32>
      %c0_49 = arith.constant 0 : index
      %c0_50 = arith.constant 0 : index
      %98 = vector.load %arg11[%c0_49, %c0_50] : memref<1x128xf32, #tpu.memory_space<vmem>>, vector<1x128xf32>
      %99 = vector.broadcast %98 : vector<1x128xf32> to vector<128x128xf32>
      %100 = arith.addf %97, %99 : vector<128x128xf32>
      %c0_51 = arith.constant 0 : index
      %c0_52 = arith.constant 0 : index
      %101 = vector.load %arg13[%c0_51, %c0_52] : memref<128x128xf32, #tpu.memory_space<vmem>>, vector<128x128xf32>
      tpu.vector_store %arg13[%c0_51, %c0_52], %100 {strides = array<i32>} : memref<128x128xf32, #tpu.memory_space<vmem>>, vector<128x128xf32>,
    } else {
    }
    return
  }
  func.func @transform_0(%arg0: i32, %arg1: i32, %arg2: i32, %arg3: memref<2xi32, #tpu.memory_space<smem>>) -> (i32, i32, i32) {
    %c0_i32 = arith.constant 0 : i32
    %c0_i32_0 = arith.constant 0 : i32
    return %arg1, %arg0, %c0_i32 : i32, i32, i32
  }
  func.func @transform_1(%arg0: i32, %arg1: i32, %arg2: i32, %arg3: memref<2xi32, #tpu.memory_space<smem>>) -> (i32, i32, i32) {
    %c4_i32 = arith.constant 4 : i32
    %0 = arith.addi %c4_i32, %arg1 : i32
    %c0_i32 = arith.constant 0 : i32
    %c0_i32_0 = arith.constant 0 : i32
    return %0, %arg2, %c0_i32 : i32, i32, i32
  }
  func.func @transform_2(%arg0: i32, %arg1: i32, %arg2: i32, %arg3: memref<2xi32, #tpu.memory_space<smem>>) -> (i32, i32, i32) {
    %c8_i32 = arith.constant 8 : i32
    %0 = arith.addi %c8_i32, %arg1 : i32
    %c0_i32 = arith.constant 0 : i32
    %c0_i32_0 = arith.constant 0 : i32
    return %0, %arg2, %c0_i32 : i32, i32, i32
  }
  func.func @transform_3(%arg0: i32, %arg1: i32, %arg2: i32, %arg3: memref<2xi32, #tpu.memory_space<smem>>) -> (i32, i32, i32) {
    %c1_i32 = arith.constant 1 : i32
    %0 = arith.muli %arg0, %c1_i32 : i32
    %1 = arith.addi %0, %arg2 : i32
    %2 = arith.index_cast %1 : i32 to index
    %3 = memref.load %arg3[%2] : memref<2xi32, #tpu.memory_space<smem>>
    %c1_i32_0 = arith.constant 1 : i32
    %4 = arith.muli %arg0, %c1_i32_0 : i32
    %c1_i32_1 = arith.constant 1 : i32
    %5 = arith.addi %c1_i32_1, %4 : i32
    %6 = arith.addi %5, %arg2 : i32
    %7 = arith.index_cast %6 : i32 to index
    %8 = memref.load %arg3[%7] : memref<2xi32, #tpu.memory_space<smem>>
    %c0_i32 = arith.constant 0 : i32
    return %arg1, %3, %8 : i32, i32, i32
  }
  func.func @transform_4(%arg0: i32, %arg1: i32, %arg2: i32, %arg3: memref<2xi32, #tpu.memory_space<smem>>) -> (i32, i32, i32) {
    %c0_i32 = arith.constant 0 : i32
    %c0_i32_0 = arith.constant 0 : i32
    %c0_i32_1 = arith.constant 0 : i32
    return %arg1, %c0_i32, %c0_i32_0 : i32, i32, i32
  }
  func.func @transform_5(%arg0: i32, %arg1: i32, %arg2: i32, %arg3: memref<2xi32, #tpu.memory_space<smem>>) -> (i32, i32) {
    %c0_i32 = arith.constant 0 : i32
    %c0_i32_0 = arith.constant 0 : i32
    %c0_i32_1 = arith.constant 0 : i32
    return %c0_i32, %c0_i32_0 : i32, i32
  }
  func.func @transform_6(%arg0: i32, %arg1: i32, %arg2: i32, %arg3: memref<2xi32, #tpu.memory_space<smem>>) -> (i32, i32) {
    %c0_i32 = arith.constant 0 : i32
    %c0_i32_0 = arith.constant 0 : i32
    %c0_i32_1 = arith.constant 0 : i32
    return %c0_i32, %c0_i32_0 : i32, i32
  }
  func.func @transform_7(%arg0: i32, %arg1: i32, %arg2: i32, %arg3: memref<2xi32, #tpu.memory_space<smem>>) -> (i32, i32) {
    %c0_i32 = arith.constant 0 : i32
    %c0_i32_0 = arith.constant 0 : i32
    %c0_i32_1 = arith.constant 0 : i32
    return %c0_i32, %c0_i32_0 : i32, i32
  }
  func.func @transform_8(%arg0: i32, %arg1: i32, %arg2: i32, %arg3: memref<2xi32, #tpu.memory_space<smem>>) -> (i32, i32) {
    %c0_i32 = arith.constant 0 : i32
    %c0_i32_0 = arith.constant 0 : i32
    return %arg0, %c0_i32 : i32, i32
  }
  func.func @transform_9(%arg0: i32, %arg1: i32, %arg2: i32, %arg3: memref<2xi32, #tpu.memory_space<smem>>) -> (i32, i32) {
    %c0_i32 = arith.constant 0 : i32
    %c0_i32_0 = arith.constant 0 : i32
    return %arg0, %c0_i32 : i32, i32
  }
}

</mosaic_0001>

<bundles_post_ra>
// kernel: graph_attention_forward.2
= control target key start
LH: loop header
LB: loop body
LE: loop exit
PB: predicated region body
PF: predicated region fallthrough
CT: control target
= control target key end

     0   :  { %vm311_vm0 = vcmask 60416   ;;  %s1363_s20 = smov 120   ;;  %s1364_s6 = smov 112   ;;  %s2613_s1 = inlined_call_operand.vmem [shape: bf16[128,128], index: 1, kind: input, shape index: {}]   ;;  %s2614_s0 = inlined_call_operand.vmem [shape: bf16[128,128], index: 0, kind: input, shape index: {}]   ;;  %s2615_s2 = inlined_call_operand.vmem [shape: f32[1,128], index: 2, kind: input, shape index: {}]   ;;  %s2616_s3 = inlined_call_operand.vmem [shape: bf16[12,128,8], index: 3, kind: output, shape index: {}]  }
   0x1   :  { %v1347_v0 = vld [vmem:[%s2613_s1] sm:$0xff]   ;;  %v1348_v1 = vld [vmem:[%s2613_s1 + $0x8] sm:$0xff]   ;;  %v1349_v2 = vld [vmem:[%s2613_s1 + $0x10] sm:$0xff]   ;;  %s1365_s21 = smov 104   ;;  %s1366_s22 = smov 96  }
   0x2   :  { %1288 = vmatprep.subr.bf16.mxu0 %v1347_v0  ;;  %1320 = vmatprep.subr.bf16.mxu1 %v1347_v0  ;;  %v1350_v3 = vld [vmem:[%s2613_s1 + $0x18] sm:$0xff]   ;;  %v1355_v4 = vld [vmem:[%s2614_s0] sm:$0xff]   ;;  %v1352_v7 = vld [vmem:[%s2613_s1 + $0x28] sm:$0xff]   ;;  %s1367_s23 = smov 88   ;;  %s1368_s24 = smov 80  }
   0x3   :  { %1289 = vmatpush3.bf16.msra.mxu0 %v1347_v0  ;;  %1328 = vmatpush3.bf16.msra.mxu1 %v1347_v0  ;;  %v1356_v5 = vld [vmem:[%s2614_s0 + $0x20] sm:$0xff]   ;;  %v1353_v8 = vld [vmem:[%s2613_s1 + $0x30] sm:$0xff]   ;;  %v1354_v9 = vld [vmem:[%s2613_s1 + $0x38] sm:$0xff]   ;;  %s1369_s25 = smov 72   ;;  %s1370_s26 = smov 64  }
   0x4   :  { %1290 = vmatprep.subr.bf16.mxu0 %v1348_v1  ;;  %1321 = vmatprep.subr.bf16.mxu1 %v1348_v1  ;;  %v1351_v6 = vld [vmem:[%s2613_s1 + $0x20] sm:$0xff]   ;;  %v1357_v10 = vld [vmem:[%s2614_s0 + $0x8] sm:$0xff]   ;;  %v1359_v12 = vld [vmem:[%s2614_s0 + $0x10] sm:$0xff]   ;;  %s1371_s27 = smov 56   ;;  %s1372_s12 = smov 48  }
   0x5   :  { %1304 = vmatprep.mubr.bf16.mxu0 %v1355_v4  ;;  %1312 = vmatprep.mubr.bf16.mxu1 %v1356_v5  ;;  %v1358_v11 = vld [vmem:[%s2614_s0 + $0x28] sm:$0xff]   ;;  %v1361_v13 = vld [vmem:[%s2614_s0 + $0x30] sm:$0xff]   ;;  %v1360_v14 = vld [vmem:[%s2614_s0 + $0x18] sm:$0xff]   ;;  %s1373_s13 = smov 40  }
   0x6   :  { %v1362_v15 = vld [vmem:[%s2614_s0 + $0x38] sm:$0xff]   ;;  %v1047_v16 = vld [vmem:[%s2615_s2] ss:$0 sm:$0xff] }
   0x7   :  { %1291 = vmatpush3.bf16.msra.mxu0 %v1348_v1  ;;  %1329 = vmatpush3.bf16.msra.mxu1 %v1348_v1 }
   0x8   :  { %1292 = vmatprep.subr.bf16.mxu0 %v1349_v2  ;;  %1322 = vmatprep.subr.bf16.mxu1 %v1349_v2 }
   0xb   :  { %1293 = vmatpush3.bf16.msra.mxu0 %v1349_v2  ;;  %1330 = vmatpush3.bf16.msra.mxu1 %v1349_v2 }
   0xc   :  { %1294 = vmatprep.subr.bf16.mxu0 %v1350_v3  ;;  %1323 = vmatprep.subr.bf16.mxu1 %v1350_v3 }
   0xf   :  { %1295 = vmatpush3.bf16.msra.mxu0 %v1350_v3  ;;  %1331 = vmatpush3.bf16.msra.mxu1 %v1350_v3 }
  0x10   :  { %1296 = vmatprep.subr.bf16.mxu0 %v1351_v6  ;;  %1324 = vmatprep.subr.bf16.mxu1 %v1351_v6 }
  0x13   :  { %1297 = vmatpush3.bf16.msra.mxu0 %v1351_v6  ;;  %1332 = vmatpush3.bf16.msra.mxu1 %v1351_v6 }
  0x14   :  { %1298 = vmatprep.subr.bf16.mxu0 %v1352_v7  ;;  %1325 = vmatprep.subr.bf16.mxu1 %v1352_v7 }
  0x17   :  { %1299 = vmatpush3.bf16.msra.mxu0 %v1352_v7  ;;  %1333 = vmatpush3.bf16.msra.mxu1 %v1352_v7 }
  0x18   :  { %1300 = vmatprep.subr.bf16.mxu0 %v1353_v8  ;;  %1326 = vmatprep.subr.bf16.mxu1 %v1353_v8 }
  0x1b   :  { %1301 = vmatpush3.bf16.msra.mxu0 %v1353_v8  ;;  %1334 = vmatpush3.bf16.msra.mxu1 %v1353_v8 }
  0x1c   :  { %1302 = vmatprep.subr.bf16.mxu0 %v1354_v9  ;;  %1327 = vmatprep.subr.bf16.mxu1 %v1354_v9 }
  0x1f   :  { %1303 = vmatpush3.bf16.msra.mxu0 %v1354_v9  ;;  %1335 = vmatpush3.bf16.msra.mxu1 %v1354_v9 }
  0x22   :  { %1305 = vmatmul.mubr.bf16.vlgmr.msra.gmra.mrb[0].mxu0 %v1357_v10  ;;  %1313 = vmatmul.mubr.bf16.vlgmr.msra.gmra.mrb[0].mxu1 %v1358_v11 }
  0x23   :  { %1308 = vmatprep.mubr.bf16.mxu0 %v1359_v12  ;;  %1316 = vmatprep.mubr.bf16.mxu1 %v1361_v13 }
  0x2a   :  { %1309 = vmatmul.mubr.bf16.gmra.mrb[4].mxu0 %v1360_v14  ;;  %1317 = vmatmul.mubr.bf16.gmra.mrb[4].mxu1 %v1362_v15 }
  0xf5   :  { %v1306_v17 = vpop.f32.mrb[0].mxu0  ;;  %v1314_v18 = vpop.f32.mrb[0].mxu1 }
  0xf6   :  { %v193_v19 = vadd.f32 %v1306_v17, %v1047_v16  ;;  %v225_v20 = vadd.f32 %v1314_v18, %v1047_v16  ;;  %v184_v21 = vpop.f32.mrb[1].mxu0  ;;  %v216_v22 = vpop.f32.mrb[1].mxu1 }
  0xf7   :  { %v185_v23 = vadd.f32 %v1047_v16, %v184_v21  ;;  %v217_v24 = vadd.f32 %v1047_v16, %v216_v22  ;;  %v1307_v25 = vpop.f32.mrb[2].mxu0  ;;  %v1315_v26 = vpop.f32.mrb[2].mxu1 }
  0xf8   :  { %v1445_v27 = vpack.c.bf16 %v193_v19, %v193_v19  ;;  %v1447_v28 = vpack.c.bf16 %v225_v20, %v225_v20  ;;  %v196_v29 = vadd.f32 %v1307_v25, %v1047_v16  ;;  %v228_v30 = vadd.f32 %v1315_v26, %v1047_v16  ;;  %v187_v31 = vpop.f32.mrb[3].mxu0  ;;  %v219_v32 = vpop.f32.mrb[3].mxu1 }
  0xf9   :  { %v1449_v33 = vpack.c.bf16 %v185_v23, %v185_v23  ;;  %v1451_v34 = vpack.c.bf16 %v217_v24, %v217_v24  ;;  %v188_v35 = vadd.f32 %v1047_v16, %v187_v31  ;;  %v220_v36 = vadd.f32 %v1047_v16, %v219_v32 }
  0xfa   :  { %314 = vst.msk [vmem:[%s2616_s3 + $0x8] sm:$0xf] %vm311_vm0, %v1445_v27  ;;  %322 = vst.msk [vmem:[%s2616_s3 + $0x28] sm:$0xf] %vm311_vm0, %v1447_v28  ;;  %v1463_v37 = vpack.c.bf16 %v196_v29, %v196_v29  ;;  %v1465_v38 = vpack.c.bf16 %v228_v30, %v228_v30  ;;  %348 = vrot.lane.b32.xlu0 %v1447_v28, %s1363_s20  ;;  %332 = vrot.lane.b32.xlu1 %v1445_v27, %s1363_s20 }
  0xfb   :  { %312 = vst.msk [vmem:[%s2616_s3] sm:$0xf] %vm311_vm0, %v1449_v33  ;;  %320 = vst.msk [vmem:[%s2616_s3 + $0x20] sm:$0xf] %vm311_vm0, %v1451_v34  ;;  %v1481_v39 = vpack.c.bf16 %v188_v35, %v188_v35  ;;  %v1483_v40 = vpack.c.bf16 %v220_v36, %v220_v36 }
  0xfc   :  { %315 = vst.msk [vmem:[%s2616_s3 + $0xc] sm:$0xf] %vm311_vm0, %v1463_v37  ;;  %323 = vst.msk [vmem:[%s2616_s3 + $0x2c] sm:$0xf] %vm311_vm0, %v1465_v38 }
  0xfd   :  { %313 = vst.msk [vmem:[%s2616_s3 + $0x4] sm:$0xf] %vm311_vm0, %v1481_v39  ;;  %321 = vst.msk [vmem:[%s2616_s3 + $0x24] sm:$0xf] %vm311_vm0, %v1483_v40  ;;  %v1310_v41 = vpop.f32.mrb[4].mxu0  ;;  %v1318_v42 = vpop.f32.mrb[4].mxu1 }
  0xfe   :  { %397 = vrot.lane.b32.xlu0 %v1445_v27, %s1364_s6  ;;  %334 = vrot.lane.b32.xlu1 %v1463_v37, %s1363_s20  ;;  %v209_v43 = vadd.f32 %v1310_v41, %v1047_v16  ;;  %v200_v44 = vpop.f32.mrb[5].mxu0  ;;  %v241_v45 = vadd.f32 %v1318_v42, %v1047_v16  ;;  %v232_v46 = vpop.f32.mrb[5].mxu1 }
  0xff   :  { %v201_v47 = vadd.f32 %v1047_v16, %v200_v44  ;;  %v1311_v48 = vpop.f32.mrb[6].mxu0  ;;  %v233_v49 = vadd.f32 %v1047_v16, %v232_v46  ;;  %v1319_v50 = vpop.f32.mrb[6].mxu1 }
 0x100   :  { %v1509_v51 = vpack.c.bf16 %v209_v43, %v209_v43  ;;  %v212_v52 = vadd.f32 %v1311_v48, %v1047_v16  ;;  %v203_v53 = vpop.f32.mrb[7].mxu0  ;;  %v1511_v54 = vpack.c.bf16 %v241_v45, %v241_v45  ;;  %v244_v55 = vadd.f32 %v1319_v50, %v1047_v16  ;;  %v235_v56 = vpop.f32.mrb[7].mxu1 }
 0x101   :  { %v1513_v57 = vpack.c.bf16 %v201_v47, %v201_v47  ;;  %v204_v58 = vadd.f32 %v1047_v16, %v203_v53  ;;  %v1515_v59 = vpack.c.bf16 %v233_v49, %v233_v49  ;;  %v236_v60 = vadd.f32 %v1047_v16, %v235_v56 }
 0x102   :  { %413 = vrot.lane.b32.xlu0 %v1447_v28, %s1364_s6  ;;  %350 = vrot.lane.b32.xlu1 %v1465_v38, %s1363_s20  ;;  %318 = vst.msk [vmem:[%s2616_s3 + $0x18] sm:$0xf] %vm311_vm0, %v1509_v51  ;;  %v1526_v61 = vpack.c.bf16 %v212_v52, %v212_v52  ;;  %326 = vst.msk [vmem:[%s2616_s3 + $0x38] sm:$0xf] %vm311_vm0, %v1511_v54  ;;  %v1533_v62 = vpack.c.bf16 %v244_v55, %v244_v55 }
 0x103   :  { %316 = vst.msk [vmem:[%s2616_s3 + $0x10] sm:$0xf] %vm311_vm0, %v1513_v57  ;;  %v1540_v63 = vpack.c.bf16 %v204_v58, %v204_v58  ;;  %324 = vst.msk [vmem:[%s2616_s3 + $0x30] sm:$0xf] %vm311_vm0, %v1515_v59  ;;  %v1547_v0 = vpack.c.bf16 %v236_v60, %v236_v60 }
 0x104   :  { %319 = vst.msk [vmem:[%s2616_s3 + $0x1c] sm:$0xf] %vm311_vm0, %v1526_v61  ;;  %327 = vst.msk [vmem:[%s2616_s3 + $0x3c] sm:$0xf] %vm311_vm0, %v1533_v62 }
 0x105   :  { %317 = vst.msk [vmem:[%s2616_s3 + $0x14] sm:$0xf] %vm311_vm0, %v1540_v63  ;;  %325 = vst.msk [vmem:[%s2616_s3 + $0x34] sm:$0xf] %vm311_vm0, %v1547_v0 }
 0x106   :  { %462 = vrot.lane.b32.xlu0 %v1445_v27, %s1365_s21  ;;  %399 = vrot.lane.b32.xlu1 %v1463_v37, %s1364_s6 }
 0x10a   :  { %478 = vrot.lane.b32.xlu0 %v1447_v28, %s1365_s21  ;;  %415 = vrot.lane.b32.xlu1 %v1465_v38, %s1364_s6 }
 0x10e   :  { %527 = vrot.lane.b32.xlu0 %v1445_v27, %s1366_s22  ;;  %464 = vrot.lane.b32.xlu1 %v1463_v37, %s1365_s21 }
 0x112   :  { %543 = vrot.lane.b32.xlu0 %v1447_v28, %s1366_s22  ;;  %480 = vrot.lane.b32.xlu1 %v1465_v38, %s1365_s21 }
 0x116   :  { %592 = vrot.lane.b32.xlu0 %v1445_v27, %s1367_s23  ;;  %529 = vrot.lane.b32.xlu1 %v1463_v37, %s1366_s22 }
 0x11a   :  { %608 = vrot.lane.b32.xlu0 %v1447_v28, %s1367_s23  ;;  %545 = vrot.lane.b32.xlu1 %v1465_v38, %s1366_s22 }
 0x11e   :  { %657 = vrot.lane.b32.xlu0 %v1445_v27, %s1368_s24  ;;  %594 = vrot.lane.b32.xlu1 %v1463_v37, %s1367_s23 }
 0x122   :  { %673 = vrot.lane.b32.xlu0 %v1447_v28, %s1368_s24  ;;  %610 = vrot.lane.b32.xlu1 %v1465_v38, %s1367_s23 }
 0x126   :  { %722 = vrot.lane.b32.xlu0 %v1445_v27, %s1369_s25  ;;  %659 = vrot.lane.b32.xlu1 %v1463_v37, %s1368_s24 }
 0x12a   :  { %738 = vrot.lane.b32.xlu0 %v1447_v28, %s1369_s25  ;;  %675 = vrot.lane.b32.xlu1 %v1465_v38, %s1368_s24 }
 0x12e   :  { %787 = vrot.lane.b32.xlu0 %v1445_v27, %s1370_s26  ;;  %724 = vrot.lane.b32.xlu1 %v1463_v37, %s1369_s25 }
 0x132   :  { %803 = vrot.lane.b32.xlu0 %v1447_v28, %s1370_s26  ;;  %740 = vrot.lane.b32.xlu1 %v1465_v38, %s1369_s25 }
 0x136   :  { %852 = vrot.lane.b32.xlu0 %v1445_v27, %s1371_s27  ;;  %789 = vrot.lane.b32.xlu1 %v1463_v37, %s1370_s26 }
 0x13a   :  { %805 = vrot.lane.b32.xlu1 %v1465_v38, %s1370_s26  ;;  %328 = vrot.lane.b32.xlu0 %v1449_v33, %s1363_s20 }
 0x13e   :  { %854 = vrot.lane.b32.xlu1 %v1463_v37, %s1371_s27  ;;  %344 = vrot.lane.b32.xlu0 %v1451_v34, %s1363_s20 }
 0x142   :  { %346 = vrot.lane.b32.xlu1 %v1483_v40, %s1363_s20  ;;  %393 = vrot.lane.b32.xlu0 %v1449_v33, %s1364_s6 }
 0x146   :  { %395 = vrot.lane.b32.xlu1 %v1481_v39, %s1364_s6  ;;  %409 = vrot.lane.b32.xlu0 %v1451_v34, %s1364_s6 }
 0x14a   :  { %411 = vrot.lane.b32.xlu1 %v1483_v40, %s1364_s6  ;;  %458 = vrot.lane.b32.xlu0 %v1449_v33, %s1365_s21 }
 0x14e   :  { %460 = vrot.lane.b32.xlu1 %v1481_v39, %s1365_s21  ;;  %474 = vrot.lane.b32.xlu0 %v1451_v34, %s1365_s21 }
 0x152   :  { %476 = vrot.lane.b32.xlu1 %v1483_v40, %s1365_s21  ;;  %523 = vrot.lane.b32.xlu0 %v1449_v33, %s1366_s22 }
 0x156   :  { %525 = vrot.lane.b32.xlu1 %v1481_v39, %s1366_s22  ;;  %539 = vrot.lane.b32.xlu0 %v1451_v34, %s1366_s22 }
 0x15a   :  { %541 = vrot.lane.b32.xlu1 %v1483_v40, %s1366_s22  ;;  %588 = vrot.lane.b32.xlu0 %v1449_v33, %s1367_s23 }
 0x15e   :  { %590 = vrot.lane.b32.xlu1 %v1481_v39, %s1367_s23  ;;  %604 = vrot.lane.b32.xlu0 %v1451_v34, %s1367_s23 }
 0x162   :  { %606 = vrot.lane.b32.xlu1 %v1483_v40, %s1367_s23  ;;  %653 = vrot.lane.b32.xlu0 %v1449_v33, %s1368_s24 }
 0x166   :  { %655 = vrot.lane.b32.xlu1 %v1481_v39, %s1368_s24  ;;  %669 = vrot.lane.b32.xlu0 %v1451_v34, %s1368_s24 }
 0x16a   :  { %671 = vrot.lane.b32.xlu1 %v1483_v40, %s1368_s24  ;;  %718 = vrot.lane.b32.xlu0 %v1449_v33, %s1369_s25 }
 0x16c   :  { %v349_v1 = vpop.permute.xlu0 %348  ;;  %v333_v2 = vpop.permute.xlu1 %332 }
 0x16d   :  { %1090 = vst.msk [vmem:[%s2616_s3 + $0x68] sm:$0xf] %vm311_vm0, %v349_v1  ;;  %1082 = vst.msk [vmem:[%s2616_s3 + $0x48] sm:$0xf] %vm311_vm0, %v333_v2 }
 0x16e   :  { %720 = vrot.lane.b32.xlu1 %v1481_v39, %s1369_s25  ;;  %734 = vrot.lane.b32.xlu0 %v1451_v34, %s1369_s25 }
 0x170   :  { %v398_v3 = vpop.permute.xlu0 %397  ;;  %v335_v4 = vpop.permute.xlu1 %334 }
 0x171   :  { %1098 = vst.msk [vmem:[%s2616_s3 + $0x88] sm:$0xf] %vm311_vm0, %v398_v3  ;;  %1083 = vst.msk [vmem:[%s2616_s3 + $0x4c] sm:$0xf] %vm311_vm0, %v335_v4 }
 0x172   :  { %736 = vrot.lane.b32.xlu1 %v1483_v40, %s1369_s25  ;;  %783 = vrot.lane.b32.xlu0 %v1449_v33, %s1370_s26 }
 0x174   :  { %v414_v5 = vpop.permute.xlu0 %413  ;;  %v351_v6 = vpop.permute.xlu1 %350 }
 0x175   :  { %1106 = vst.msk [vmem:[%s2616_s3 + $0xa8] sm:$0xf] %vm311_vm0, %v414_v5  ;;  %1091 = vst.msk [vmem:[%s2616_s3 + $0x6c] sm:$0xf] %vm311_vm0, %v351_v6 }
 0x176   :  { %785 = vrot.lane.b32.xlu1 %v1481_v39, %s1370_s26  ;;  %799 = vrot.lane.b32.xlu0 %v1451_v34, %s1370_s26 }
 0x178   :  { %v463_v7 = vpop.permute.xlu0 %462  ;;  %v400_v8 = vpop.permute.xlu1 %399 }
 0x179   :  { %1114 = vst.msk [vmem:[%s2616_s3 + $0xc8] sm:$0xf] %vm311_vm0, %v463_v7  ;;  %1099 = vst.msk [vmem:[%s2616_s3 + $0x8c] sm:$0xf] %vm311_vm0, %v400_v8 }
 0x17a   :  { %801 = vrot.lane.b32.xlu1 %v1483_v40, %s1370_s26  ;;  %848 = vrot.lane.b32.xlu0 %v1449_v33, %s1371_s27 }
 0x17c   :  { %v479_v9 = vpop.permute.xlu0 %478  ;;  %v416_v10 = vpop.permute.xlu1 %415 }
 0x17d   :  { %1122 = vst.msk [vmem:[%s2616_s3 + $0xe8] sm:$0xf] %vm311_vm0, %v479_v9  ;;  %1107 = vst.msk [vmem:[%s2616_s3 + $0xac] sm:$0xf] %vm311_vm0, %v416_v10 }
 0x17e   :  { %850 = vrot.lane.b32.xlu1 %v1481_v39, %s1371_s27  ;;  %330 = vrot.lane.b32.xlu0 %v1481_v39, %s1363_s20 }
 0x180   :  { %v528_v11 = vpop.permute.xlu0 %527  ;;  %v465_v12 = vpop.permute.xlu1 %464 }
 0x181   :  { %1130 = vst.msk [vmem:[%s2616_s3 + $0x108] sm:$0xf] %vm311_vm0, %v528_v11  ;;  %1115 = vst.msk [vmem:[%s2616_s3 + $0xcc] sm:$0xf] %vm311_vm0, %v465_v12 }
 0x182   :  { %342 = vrot.lane.b32.xlu1 %v1526_v61, %s1363_s20  ;;  %340 = vrot.lane.b32.xlu0 %v1509_v51, %s1363_s20 }
 0x184   :  { %v544_v13 = vpop.permute.xlu0 %543  ;;  %v481_v14 = vpop.permute.xlu1 %480 }
 0x185   :  { %1138 = vst.msk [vmem:[%s2616_s3 + $0x128] sm:$0xf] %vm311_vm0, %v544_v13  ;;  %1123 = vst.msk [vmem:[%s2616_s3 + $0xec] sm:$0xf] %vm311_vm0, %v481_v14 }
 0x186   :  { %358 = vrot.lane.b32.xlu1 %v1533_v62, %s1363_s20  ;;  %356 = vrot.lane.b32.xlu0 %v1511_v54, %s1363_s20 }
 0x188   :  { %v593_v15 = vpop.permute.xlu0 %592  ;;  %v530_v16 = vpop.permute.xlu1 %529 }
 0x189   :  { %1146 = vst.msk [vmem:[%s2616_s3 + $0x148] sm:$0xf] %vm311_vm0, %v593_v15  ;;  %1131 = vst.msk [vmem:[%s2616_s3 + $0x10c] sm:$0xf] %vm311_vm0, %v530_v16 }
 0x18a   :  { %407 = vrot.lane.b32.xlu1 %v1526_v61, %s1364_s6  ;;  %405 = vrot.lane.b32.xlu0 %v1509_v51, %s1364_s6 }
 0x18c   :  { %v609_v17 = vpop.permute.xlu0 %608  ;;  %v546_v18 = vpop.permute.xlu1 %545 }
 0x18d   :  { %1154 = vst.msk [vmem:[%s2616_s3 + $0x168] sm:$0xf] %vm311_vm0, %v609_v17  ;;  %1139 = vst.msk [vmem:[%s2616_s3 + $0x12c] sm:$0xf] %vm311_vm0, %v546_v18 }
 0x18e   :  { %423 = vrot.lane.b32.xlu1 %v1533_v62, %s1364_s6  ;;  %421 = vrot.lane.b32.xlu0 %v1511_v54, %s1364_s6 }
 0x190   :  { %v658_v19 = vpop.permute.xlu0 %657  ;;  %v595_v20 = vpop.permute.xlu1 %594 }
 0x191   :  { %1162 = vst.msk [vmem:[%s2616_s3 + $0x188] sm:$0xf] %vm311_vm0, %v658_v19  ;;  %1147 = vst.msk [vmem:[%s2616_s3 + $0x14c] sm:$0xf] %vm311_vm0, %v595_v20 }
 0x192   :  { %472 = vrot.lane.b32.xlu1 %v1526_v61, %s1365_s21  ;;  %470 = vrot.lane.b32.xlu0 %v1509_v51, %s1365_s21 }
 0x194   :  { %v674_v21 = vpop.permute.xlu0 %673  ;;  %v611_v22 = vpop.permute.xlu1 %610 }
 0x195   :  { %1170 = vst.msk [vmem:[%s2616_s3 + $0x1a8] sm:$0xf] %vm311_vm0, %v674_v21  ;;  %1155 = vst.msk [vmem:[%s2616_s3 + $0x16c] sm:$0xf] %vm311_vm0, %v611_v22 }
 0x196   :  { %488 = vrot.lane.b32.xlu1 %v1533_v62, %s1365_s21  ;;  %486 = vrot.lane.b32.xlu0 %v1511_v54, %s1365_s21 }
 0x198   :  { %v723_v23 = vpop.permute.xlu0 %722  ;;  %v660_v24 = vpop.permute.xlu1 %659 }
 0x199   :  { %1178 = vst.msk [vmem:[%s2616_s3 + $0x1c8] sm:$0xf] %vm311_vm0, %v723_v23  ;;  %1163 = vst.msk [vmem:[%s2616_s3 + $0x18c] sm:$0xf] %vm311_vm0, %v660_v24 }
 0x19a   :  { %537 = vrot.lane.b32.xlu1 %v1526_v61, %s1366_s22  ;;  %535 = vrot.lane.b32.xlu0 %v1509_v51, %s1366_s22 }
 0x19c   :  { %v739_v25 = vpop.permute.xlu0 %738  ;;  %v676_v26 = vpop.permute.xlu1 %675 }
 0x19d   :  { %1186 = vst.msk [vmem:[%s2616_s3 + $0x1e8] sm:$0xf] %vm311_vm0, %v739_v25  ;;  %1171 = vst.msk [vmem:[%s2616_s3 + $0x1ac] sm:$0xf] %vm311_vm0, %v676_v26 }
 0x19e   :  { %553 = vrot.lane.b32.xlu1 %v1533_v62, %s1366_s22  ;;  %551 = vrot.lane.b32.xlu0 %v1511_v54, %s1366_s22 }
 0x1a0   :  { %v788_v29 = vpop.permute.xlu0 %787  ;;  %v725_v30 = vpop.permute.xlu1 %724 }
 0x1a1   :  { %1194 = vst.msk [vmem:[%s2616_s3 + $0x208] sm:$0xf] %vm311_vm0, %v788_v29  ;;  %1179 = vst.msk [vmem:[%s2616_s3 + $0x1cc] sm:$0xf] %vm311_vm0, %v725_v30 }
 0x1a2   :  { %602 = vrot.lane.b32.xlu1 %v1526_v61, %s1367_s23  ;;  %600 = vrot.lane.b32.xlu0 %v1509_v51, %s1367_s23 }
 0x1a4   :  { %v804_v31 = vpop.permute.xlu0 %803  ;;  %v741_v32 = vpop.permute.xlu1 %740 }
 0x1a5   :  { %1202 = vst.msk [vmem:[%s2616_s3 + $0x228] sm:$0xf] %vm311_vm0, %v804_v31  ;;  %1187 = vst.msk [vmem:[%s2616_s3 + $0x1ec] sm:$0xf] %vm311_vm0, %v741_v32 }
 0x1a6   :  { %618 = vrot.lane.b32.xlu1 %v1533_v62, %s1367_s23  ;;  %616 = vrot.lane.b32.xlu0 %v1511_v54, %s1367_s23 }
 0x1a8   :  { %v853_v35 = vpop.permute.xlu0 %852  ;;  %v790_v36 = vpop.permute.xlu1 %789 }
 0x1a9   :  { %1210 = vst.msk [vmem:[%s2616_s3 + $0x248] sm:$0xf] %vm311_vm0, %v853_v35  ;;  %1195 = vst.msk [vmem:[%s2616_s3 + $0x20c] sm:$0xf] %vm311_vm0, %v790_v36 }
 0x1aa   :  { %667 = vrot.lane.b32.xlu1 %v1526_v61, %s1368_s24  ;;  %665 = vrot.lane.b32.xlu0 %v1509_v51, %s1368_s24 }
 0x1ac   :  { %v806_v41 = vpop.permute.xlu1 %805  ;;  %v329_v42 = vpop.permute.xlu0 %328 }
 0x1ad   :  { %1203 = vst.msk [vmem:[%s2616_s3 + $0x22c] sm:$0xf] %vm311_vm0, %v806_v41  ;;  %1080 = vst.msk [vmem:[%s2616_s3 + $0x40] sm:$0xf] %vm311_vm0, %v329_v42 }
 0x1ae   :  { %683 = vrot.lane.b32.xlu1 %v1533_v62, %s1368_s24  ;;  %681 = vrot.lane.b32.xlu0 %v1511_v54, %s1368_s24 }
 0x1b0   :  { %v855_v43 = vpop.permute.xlu1 %854  ;;  %v345_v44 = vpop.permute.xlu0 %344 }
 0x1b1   :  { %1211 = vst.msk [vmem:[%s2616_s3 + $0x24c] sm:$0xf] %vm311_vm0, %v855_v43  ;;  %1088 = vst.msk [vmem:[%s2616_s3 + $0x60] sm:$0xf] %vm311_vm0, %v345_v44 }
 0x1b2   :  { %732 = vrot.lane.b32.xlu1 %v1526_v61, %s1369_s25  ;;  %730 = vrot.lane.b32.xlu0 %v1509_v51, %s1369_s25 }
 0x1b4   :  { %v347_v45 = vpop.permute.xlu1 %346  ;;  %v394_v46 = vpop.permute.xlu0 %393 }
 0x1b5   :  { %1089 = vst.msk [vmem:[%s2616_s3 + $0x64] sm:$0xf] %vm311_vm0, %v347_v45  ;;  %1096 = vst.msk [vmem:[%s2616_s3 + $0x80] sm:$0xf] %vm311_vm0, %v394_v46 }
 0x1b6   :  { %748 = vrot.lane.b32.xlu1 %v1533_v62, %s1369_s25  ;;  %746 = vrot.lane.b32.xlu0 %v1511_v54, %s1369_s25 }
 0x1b8   :  { %v396_v47 = vpop.permute.xlu1 %395  ;;  %v410_v48 = vpop.permute.xlu0 %409 }
 0x1b9   :  { %1097 = vst.msk [vmem:[%s2616_s3 + $0x84] sm:$0xf] %vm311_vm0, %v396_v47  ;;  %1104 = vst.msk [vmem:[%s2616_s3 + $0xa0] sm:$0xf] %vm311_vm0, %v410_v48 }
 0x1ba   :  { %797 = vrot.lane.b32.xlu1 %v1526_v61, %s1370_s26  ;;  %795 = vrot.lane.b32.xlu0 %v1509_v51, %s1370_s26 }
 0x1bc   :  { %v412_v49 = vpop.permute.xlu1 %411  ;;  %v459_v50 = vpop.permute.xlu0 %458 }
 0x1bd   :  { %1105 = vst.msk [vmem:[%s2616_s3 + $0xa4] sm:$0xf] %vm311_vm0, %v412_v49  ;;  %1112 = vst.msk [vmem:[%s2616_s3 + $0xc0] sm:$0xf] %vm311_vm0, %v459_v50 }
 0x1be   :  { %813 = vrot.lane.b32.xlu1 %v1533_v62, %s1370_s26  ;;  %811 = vrot.lane.b32.xlu0 %v1511_v54, %s1370_s26 }
 0x1c0   :  { %v461_v52 = vpop.permute.xlu1 %460  ;;  %v475_v53 = vpop.permute.xlu0 %474 }
 0x1c1   :  { %1113 = vst.msk [vmem:[%s2616_s3 + $0xc4] sm:$0xf] %vm311_vm0, %v461_v52  ;;  %1120 = vst.msk [vmem:[%s2616_s3 + $0xe0] sm:$0xf] %vm311_vm0, %v475_v53 }
 0x1c2   :  { %338 = vrot.lane.b32.xlu1 %v1540_v63, %s1363_s20  ;;  %336 = vrot.lane.b32.xlu0 %v1513_v57, %s1363_s20 }
 0x1c4   :  { %v477_v55 = vpop.permute.xlu1 %476  ;;  %v524_v56 = vpop.permute.xlu0 %523 }
 0x1c5   :  { %1121 = vst.msk [vmem:[%s2616_s3 + $0xe4] sm:$0xf] %vm311_vm0, %v477_v55  ;;  %1128 = vst.msk [vmem:[%s2616_s3 + $0x100] sm:$0xf] %vm311_vm0, %v524_v56 }
 0x1c6   :  { %354 = vrot.lane.b32.xlu1 %v1547_v0, %s1363_s20  ;;  %352 = vrot.lane.b32.xlu0 %v1515_v59, %s1363_s20 }
 0x1c8   :  { %v526_v58 = vpop.permute.xlu1 %525  ;;  %v540_v60 = vpop.permute.xlu0 %539 }
 0x1c9   :  { %1129 = vst.msk [vmem:[%s2616_s3 + $0x104] sm:$0xf] %vm311_vm0, %v526_v58  ;;  %1136 = vst.msk [vmem:[%s2616_s3 + $0x120] sm:$0xf] %vm311_vm0, %v540_v60 }
 0x1ca   :  { %403 = vrot.lane.b32.xlu1 %v1540_v63, %s1364_s6  ;;  %401 = vrot.lane.b32.xlu0 %v1513_v57, %s1364_s6 }
 0x1cc   :  { %v542_v1 = vpop.permute.xlu1 %541  ;;  %v589_v2 = vpop.permute.xlu0 %588 }
 0x1cd   :  { %1137 = vst.msk [vmem:[%s2616_s3 + $0x124] sm:$0xf] %vm311_vm0, %v542_v1  ;;  %1144 = vst.msk [vmem:[%s2616_s3 + $0x140] sm:$0xf] %vm311_vm0, %v589_v2 }
 0x1ce   :  { %419 = vrot.lane.b32.xlu1 %v1547_v0, %s1364_s6  ;;  %417 = vrot.lane.b32.xlu0 %v1515_v59, %s1364_s6 }
 0x1d0   :  { %v591_v3 = vpop.permute.xlu1 %590  ;;  %v605_v4 = vpop.permute.xlu0 %604 }
 0x1d1   :  { %1145 = vst.msk [vmem:[%s2616_s3 + $0x144] sm:$0xf] %vm311_vm0, %v591_v3  ;;  %1152 = vst.msk [vmem:[%s2616_s3 + $0x160] sm:$0xf] %vm311_vm0, %v605_v4 }
 0x1d2   :  { %468 = vrot.lane.b32.xlu1 %v1540_v63, %s1365_s21  ;;  %466 = vrot.lane.b32.xlu0 %v1513_v57, %s1365_s21 }
 0x1d4   :  { %v607_v5 = vpop.permute.xlu1 %606  ;;  %v654_v6 = vpop.permute.xlu0 %653 }
 0x1d5   :  { %1153 = vst.msk [vmem:[%s2616_s3 + $0x164] sm:$0xf] %vm311_vm0, %v607_v5  ;;  %1160 = vst.msk [vmem:[%s2616_s3 + $0x180] sm:$0xf] %vm311_vm0, %v654_v6 }
 0x1d6   :  { %484 = vrot.lane.b32.xlu1 %v1547_v0, %s1365_s21  ;;  %482 = vrot.lane.b32.xlu0 %v1515_v59, %s1365_s21 }
 0x1d8   :  { %v656_v7 = vpop.permute.xlu1 %655  ;;  %v670_v8 = vpop.permute.xlu0 %669 }
 0x1d9   :  { %1161 = vst.msk [vmem:[%s2616_s3 + $0x184] sm:$0xf] %vm311_vm0, %v656_v7  ;;  %1168 = vst.msk [vmem:[%s2616_s3 + $0x1a0] sm:$0xf] %vm311_vm0, %v670_v8 }
 0x1da   :  { %533 = vrot.lane.b32.xlu1 %v1540_v63, %s1366_s22  ;;  %531 = vrot.lane.b32.xlu0 %v1513_v57, %s1366_s22 }
 0x1dc   :  { %v672_v9 = vpop.permute.xlu1 %671  ;;  %v719_v10 = vpop.permute.xlu0 %718 }
 0x1dd   :  { %1169 = vst.msk [vmem:[%s2616_s3 + $0x1a4] sm:$0xf] %vm311_vm0, %v672_v9  ;;  %1176 = vst.msk [vmem:[%s2616_s3 + $0x1c0] sm:$0xf] %vm311_vm0, %v719_v10 }
 0x1de   :  { %549 = vrot.lane.b32.xlu1 %v1547_v0, %s1366_s22  ;;  %547 = vrot.lane.b32.xlu0 %v1515_v59, %s1366_s22 }
 0x1e0   :  { %v721_v11 = vpop.permute.xlu1 %720  ;;  %v735_v12 = vpop.permute.xlu0 %734 }
 0x1e1   :  { %1177 = vst.msk [vmem:[%s2616_s3 + $0x1c4] sm:$0xf] %vm311_vm0, %v721_v11  ;;  %1184 = vst.msk [vmem:[%s2616_s3 + $0x1e0] sm:$0xf] %vm311_vm0, %v735_v12 }
 0x1e2   :  { %598 = vrot.lane.b32.xlu1 %v1540_v63, %s1367_s23  ;;  %596 = vrot.lane.b32.xlu0 %v1513_v57, %s1367_s23 }
 0x1e4   :  { %v737_v13 = vpop.permute.xlu1 %736  ;;  %v784_v14 = vpop.permute.xlu0 %783 }
 0x1e5   :  { %1185 = vst.msk [vmem:[%s2616_s3 + $0x1e4] sm:$0xf] %vm311_vm0, %v737_v13  ;;  %1192 = vst.msk [vmem:[%s2616_s3 + $0x200] sm:$0xf] %vm311_vm0, %v784_v14 }
 0x1e6   :  { %614 = vrot.lane.b32.xlu1 %v1547_v0, %s1367_s23  ;;  %612 = vrot.lane.b32.xlu0 %v1515_v59, %s1367_s23 }
 0x1e8   :  { %v786_v15 = vpop.permute.xlu1 %785  ;;  %v800_v16 = vpop.permute.xlu0 %799 }
 0x1e9   :  { %1193 = vst.msk [vmem:[%s2616_s3 + $0x204] sm:$0xf] %vm311_vm0, %v786_v15  ;;  %1200 = vst.msk [vmem:[%s2616_s3 + $0x220] sm:$0xf] %vm311_vm0, %v800_v16 }
 0x1ea   :  { %663 = vrot.lane.b32.xlu1 %v1540_v63, %s1368_s24  ;;  %661 = vrot.lane.b32.xlu0 %v1513_v57, %s1368_s24 }
 0x1ec   :  { %v802_v17 = vpop.permute.xlu1 %801  ;;  %v849_v18 = vpop.permute.xlu0 %848 }
 0x1ed   :  { %1201 = vst.msk [vmem:[%s2616_s3 + $0x224] sm:$0xf] %vm311_vm0, %v802_v17  ;;  %1208 = vst.msk [vmem:[%s2616_s3 + $0x240] sm:$0xf] %vm311_vm0, %v849_v18 }
 0x1ee   :  { %679 = vrot.lane.b32.xlu1 %v1547_v0, %s1368_s24  ;;  %677 = vrot.lane.b32.xlu0 %v1515_v59, %s1368_s24 }
 0x1f0   :  { %v851_v19 = vpop.permute.xlu1 %850  ;;  %v331_v20 = vpop.permute.xlu0 %330 }
 0x1f1   :  { %1209 = vst.msk [vmem:[%s2616_s3 + $0x244] sm:$0xf] %vm311_vm0, %v851_v19  ;;  %1081 = vst.msk [vmem:[%s2616_s3 + $0x44] sm:$0xf] %vm311_vm0, %v331_v20 }
 0x1f2   :  { %728 = vrot.lane.b32.xlu1 %v1540_v63, %s1369_s25  ;;  %726 = vrot.lane.b32.xlu0 %v1513_v57, %s1369_s25 }
 0x1f4   :  { %v343_v21 = vpop.permute.xlu1 %342  ;;  %v341_v22 = vpop.permute.xlu0 %340 }
 0x1f5   :  { %1087 = vst.msk [vmem:[%s2616_s3 + $0x5c] sm:$0xf] %vm311_vm0, %v343_v21  ;;  %1086 = vst.msk [vmem:[%s2616_s3 + $0x58] sm:$0xf] %vm311_vm0, %v341_v22 }
 0x1f6   :  { %744 = vrot.lane.b32.xlu1 %v1547_v0, %s1369_s25  ;;  %742 = vrot.lane.b32.xlu0 %v1515_v59, %s1369_s25 }
 0x1f8   :  { %v359_v23 = vpop.permute.xlu1 %358  ;;  %v357_v24 = vpop.permute.xlu0 %356 }
 0x1f9   :  { %1095 = vst.msk [vmem:[%s2616_s3 + $0x7c] sm:$0xf] %vm311_vm0, %v359_v23  ;;  %1094 = vst.msk [vmem:[%s2616_s3 + $0x78] sm:$0xf] %vm311_vm0, %v357_v24 }
 0x1fa   :  { %793 = vrot.lane.b32.xlu1 %v1540_v63, %s1370_s26  ;;  %791 = vrot.lane.b32.xlu0 %v1513_v57, %s1370_s26 }
 0x1fc   :  { %v408_v25 = vpop.permute.xlu1 %407  ;;  %v406_v26 = vpop.permute.xlu0 %405 }
 0x1fd   :  { %1103 = vst.msk [vmem:[%s2616_s3 + $0x9c] sm:$0xf] %vm311_vm0, %v408_v25  ;;  %1102 = vst.msk [vmem:[%s2616_s3 + $0x98] sm:$0xf] %vm311_vm0, %v406_v26 }
 0x1fe   :  { %809 = vrot.lane.b32.xlu1 %v1547_v0, %s1370_s26  ;;  %807 = vrot.lane.b32.xlu0 %v1515_v59, %s1370_s26 }
 0x200   :  { %v424_v29 = vpop.permute.xlu1 %423  ;;  %v422_v30 = vpop.permute.xlu0 %421 }
 0x201   :  { %1111 = vst.msk [vmem:[%s2616_s3 + $0xbc] sm:$0xf] %vm311_vm0, %v424_v29  ;;  %1110 = vst.msk [vmem:[%s2616_s3 + $0xb8] sm:$0xf] %vm311_vm0, %v422_v30 }
 0x202   :  { %858 = vrot.lane.b32.xlu1 %v1540_v63, %s1371_s27  ;;  %856 = vrot.lane.b32.xlu0 %v1513_v57, %s1371_s27 }
 0x204   :  { %v473_v31 = vpop.permute.xlu1 %472  ;;  %v471_v32 = vpop.permute.xlu0 %470 }
 0x205   :  { %1119 = vst.msk [vmem:[%s2616_s3 + $0xdc] sm:$0xf] %vm311_vm0, %v473_v31  ;;  %1118 = vst.msk [vmem:[%s2616_s3 + $0xd8] sm:$0xf] %vm311_vm0, %v471_v32 }
 0x206   :  { %862 = vrot.lane.b32.xlu1 %v1526_v61, %s1371_s27  ;;  %860 = vrot.lane.b32.xlu0 %v1509_v51, %s1371_s27 }
 0x208   :  { %v489_v35 = vpop.permute.xlu1 %488  ;;  %v487_v36 = vpop.permute.xlu0 %486 }
 0x209   :  { %1127 = vst.msk [vmem:[%s2616_s3 + $0xfc] sm:$0xf] %vm311_vm0, %v489_v35  ;;  %1126 = vst.msk [vmem:[%s2616_s3 + $0xf8] sm:$0xf] %vm311_vm0, %v487_v36 }
 0x20a   :  { %866 = vrot.lane.b32.xlu1 %v1483_v40, %s1371_s27  ;;  %864 = vrot.lane.b32.xlu0 %v1451_v34, %s1371_s27 }
 0x20c   :  { %v538_v41 = vpop.permute.xlu1 %537  ;;  %v536_v42 = vpop.permute.xlu0 %535 }
 0x20d   :  { %1135 = vst.msk [vmem:[%s2616_s3 + $0x11c] sm:$0xf] %vm311_vm0, %v538_v41  ;;  %1134 = vst.msk [vmem:[%s2616_s3 + $0x118] sm:$0xf] %vm311_vm0, %v536_v42 }
 0x20e   :  { %870 = vrot.lane.b32.xlu1 %v1465_v38, %s1371_s27  ;;  %868 = vrot.lane.b32.xlu0 %v1447_v28, %s1371_s27 }
 0x210   :  { %v554_v43 = vpop.permute.xlu1 %553  ;;  %v552_v44 = vpop.permute.xlu0 %551 }
 0x211   :  { %1143 = vst.msk [vmem:[%s2616_s3 + $0x13c] sm:$0xf] %vm311_vm0, %v554_v43  ;;  %1142 = vst.msk [vmem:[%s2616_s3 + $0x138] sm:$0xf] %vm311_vm0, %v552_v44 }
 0x212   :  { %874 = vrot.lane.b32.xlu1 %v1547_v0, %s1371_s27  ;;  %872 = vrot.lane.b32.xlu0 %v1515_v59, %s1371_s27 }
 0x214   :  { %v603_v45 = vpop.permute.xlu1 %602  ;;  %v601_v46 = vpop.permute.xlu0 %600 }
 0x215   :  { %1151 = vst.msk [vmem:[%s2616_s3 + $0x15c] sm:$0xf] %vm311_vm0, %v603_v45  ;;  %1150 = vst.msk [vmem:[%s2616_s3 + $0x158] sm:$0xf] %vm311_vm0, %v601_v46 }
 0x216   :  { %878 = vrot.lane.b32.xlu1 %v1533_v62, %s1371_s27  ;;  %876 = vrot.lane.b32.xlu0 %v1511_v54, %s1371_s27 }
 0x218   :  { %v619_v47 = vpop.permute.xlu1 %618  ;;  %v617_v48 = vpop.permute.xlu0 %616 }
 0x219   :  { %1159 = vst.msk [vmem:[%s2616_s3 + $0x17c] sm:$0xf] %vm311_vm0, %v619_v47  ;;  %1158 = vst.msk [vmem:[%s2616_s3 + $0x178] sm:$0xf] %vm311_vm0, %v617_v48 }
 0x21a   :  { %915 = vrot.lane.b32.xlu1 %v1481_v39, %s1372_s12  ;;  %913 = vrot.lane.b32.xlu0 %v1449_v33, %s1372_s12 }
 0x21c   :  { %v668_v49 = vpop.permute.xlu1 %667  ;;  %v666_v50 = vpop.permute.xlu0 %665 }
 0x21d   :  { %1167 = vst.msk [vmem:[%s2616_s3 + $0x19c] sm:$0xf] %vm311_vm0, %v668_v49  ;;  %1166 = vst.msk [vmem:[%s2616_s3 + $0x198] sm:$0xf] %vm311_vm0, %v666_v50 }
 0x21e   :  { %919 = vrot.lane.b32.xlu1 %v1463_v37, %s1372_s12  ;;  %917 = vrot.lane.b32.xlu0 %v1445_v27, %s1372_s12 }
 0x220   :  { %v684_v52 = vpop.permute.xlu1 %683  ;;  %v682_v53 = vpop.permute.xlu0 %681 }
 0x221   :  { %1175 = vst.msk [vmem:[%s2616_s3 + $0x1bc] sm:$0xf] %vm311_vm0, %v684_v52  ;;  %1174 = vst.msk [vmem:[%s2616_s3 + $0x1b8] sm:$0xf] %vm311_vm0, %v682_v53 }
 0x222   :  { %923 = vrot.lane.b32.xlu1 %v1540_v63, %s1372_s12  ;;  %921 = vrot.lane.b32.xlu0 %v1513_v57, %s1372_s12 }
 0x224   :  { %v733_v55 = vpop.permute.xlu1 %732  ;;  %v731_v56 = vpop.permute.xlu0 %730 }
 0x225   :  { %1183 = vst.msk [vmem:[%s2616_s3 + $0x1dc] sm:$0xf] %vm311_vm0, %v733_v55  ;;  %1182 = vst.msk [vmem:[%s2616_s3 + $0x1d8] sm:$0xf] %vm311_vm0, %v731_v56 }
 0x226   :  { %927 = vrot.lane.b32.xlu1 %v1526_v61, %s1372_s12  ;;  %925 = vrot.lane.b32.xlu0 %v1509_v51, %s1372_s12 }
 0x228   :  { %v749_v58 = vpop.permute.xlu1 %748  ;;  %v747_v60 = vpop.permute.xlu0 %746 }
 0x229   :  { %1191 = vst.msk [vmem:[%s2616_s3 + $0x1fc] sm:$0xf] %vm311_vm0, %v749_v58  ;;  %1190 = vst.msk [vmem:[%s2616_s3 + $0x1f8] sm:$0xf] %vm311_vm0, %v747_v60 }
 0x22a   :  { %931 = vrot.lane.b32.xlu1 %v1483_v40, %s1372_s12  ;;  %929 = vrot.lane.b32.xlu0 %v1451_v34, %s1372_s12 }
 0x22c   :  { %v798_v1 = vpop.permute.xlu1 %797  ;;  %v796_v2 = vpop.permute.xlu0 %795 }
 0x22d   :  { %1199 = vst.msk [vmem:[%s2616_s3 + $0x21c] sm:$0xf] %vm311_vm0, %v798_v1  ;;  %1198 = vst.msk [vmem:[%s2616_s3 + $0x218] sm:$0xf] %vm311_vm0, %v796_v2 }
 0x22e   :  { %935 = vrot.lane.b32.xlu1 %v1465_v38, %s1372_s12  ;;  %933 = vrot.lane.b32.xlu0 %v1447_v28, %s1372_s12 }
 0x230   :  { %v814_v3 = vpop.permute.xlu1 %813  ;;  %v812_v4 = vpop.permute.xlu0 %811 }
 0x231   :  { %1207 = vst.msk [vmem:[%s2616_s3 + $0x23c] sm:$0xf] %vm311_vm0, %v814_v3  ;;  %1206 = vst.msk [vmem:[%s2616_s3 + $0x238] sm:$0xf] %vm311_vm0, %v812_v4 }
 0x232   :  { %939 = vrot.lane.b32.xlu1 %v1547_v0, %s1372_s12  ;;  %937 = vrot.lane.b32.xlu0 %v1515_v59, %s1372_s12 }
 0x234   :  { %v339_v5 = vpop.permute.xlu1 %338  ;;  %v337_v6 = vpop.permute.xlu0 %336 }
 0x235   :  { %1085 = vst.msk [vmem:[%s2616_s3 + $0x54] sm:$0xf] %vm311_vm0, %v339_v5  ;;  %1084 = vst.msk [vmem:[%s2616_s3 + $0x50] sm:$0xf] %vm311_vm0, %v337_v6 }
 0x236   :  { %943 = vrot.lane.b32.xlu1 %v1533_v62, %s1372_s12  ;;  %941 = vrot.lane.b32.xlu0 %v1511_v54, %s1372_s12 }
 0x238   :  { %v355_v7 = vpop.permute.xlu1 %354  ;;  %v353_v8 = vpop.permute.xlu0 %352 }
 0x239   :  { %1093 = vst.msk [vmem:[%s2616_s3 + $0x74] sm:$0xf] %vm311_vm0, %v355_v7  ;;  %1092 = vst.msk [vmem:[%s2616_s3 + $0x70] sm:$0xf] %vm311_vm0, %v353_v8 }
 0x23a   :  { %980 = vrot.lane.b32.xlu1 %v1481_v39, %s1373_s13  ;;  %978 = vrot.lane.b32.xlu0 %v1449_v33, %s1373_s13 }
 0x23c   :  { %v404_v9 = vpop.permute.xlu1 %403  ;;  %v402_v10 = vpop.permute.xlu0 %401 }
 0x23d   :  { %1101 = vst.msk [vmem:[%s2616_s3 + $0x94] sm:$0xf] %vm311_vm0, %v404_v9  ;;  %1100 = vst.msk [vmem:[%s2616_s3 + $0x90] sm:$0xf] %vm311_vm0, %v402_v10 }
 0x23e   :  { %984 = vrot.lane.b32.xlu1 %v1463_v37, %s1373_s13  ;;  %982 = vrot.lane.b32.xlu0 %v1445_v27, %s1373_s13 }
 0x240   :  { %v420_v39 = vpop.permute.xlu1 %419  ;;  %v418_v33 = vpop.permute.xlu0 %417 }
 0x241   :  { %1109 = vst.msk [vmem:[%s2616_s3 + $0xb4] sm:$0xf] %vm311_vm0, %v420_v39  ;;  %1108 = vst.msk [vmem:[%s2616_s3 + $0xb0] sm:$0xf] %vm311_vm0, %v418_v33 }
 0x242   :  { %988 = vrot.lane.b32.xlu1 %v1540_v63, %s1373_s13  ;;  %986 = vrot.lane.b32.xlu0 %v1513_v57, %s1373_s13 }
 0x244   :  { %v469_v37 = vpop.permute.xlu1 %468  ;;  %v467_v27 = vpop.permute.xlu0 %466 }
 0x245   :  { %1117 = vst.msk [vmem:[%s2616_s3 + $0xd4] sm:$0xf] %vm311_vm0, %v469_v37  ;;  %1116 = vst.msk [vmem:[%s2616_s3 + $0xd0] sm:$0xf] %vm311_vm0, %v467_v27 }
 0x246   :  { %992 = vrot.lane.b32.xlu1 %v1526_v61, %s1373_s13  ;;  %990 = vrot.lane.b32.xlu0 %v1509_v51, %s1373_s13 }
 0x248   :  { %v485_v63 = vpop.permute.xlu1 %484  ;;  %v483_v57 = vpop.permute.xlu0 %482 }
 0x249   :  { %1125 = vst.msk [vmem:[%s2616_s3 + $0xf4] sm:$0xf] %vm311_vm0, %v485_v63  ;;  %1124 = vst.msk [vmem:[%s2616_s3 + $0xf0] sm:$0xf] %vm311_vm0, %v483_v57 }
 0x24a   :  { %996 = vrot.lane.b32.xlu1 %v1483_v40, %s1373_s13  ;;  %994 = vrot.lane.b32.xlu0 %v1451_v34, %s1373_s13 }
 0x24c   :  { %v534_v61 = vpop.permute.xlu1 %533  ;;  %v532_v51 = vpop.permute.xlu0 %531 }
 0x24d   :  { %1133 = vst.msk [vmem:[%s2616_s3 + $0x114] sm:$0xf] %vm311_vm0, %v534_v61  ;;  %1132 = vst.msk [vmem:[%s2616_s3 + $0x110] sm:$0xf] %vm311_vm0, %v532_v51 }
 0x24e   :  { %1000 = vrot.lane.b32.xlu1 %v1465_v38, %s1373_s13  ;;  %998 = vrot.lane.b32.xlu0 %v1447_v28, %s1373_s13 }
 0x250   :  { %v550_v40 = vpop.permute.xlu1 %549  ;;  %v548_v34 = vpop.permute.xlu0 %547 }
 0x251   :  { %1141 = vst.msk [vmem:[%s2616_s3 + $0x134] sm:$0xf] %vm311_vm0, %v550_v40  ;;  %1140 = vst.msk [vmem:[%s2616_s3 + $0x130] sm:$0xf] %vm311_vm0, %v548_v34 }
 0x252   :  { %1004 = vrot.lane.b32.xlu1 %v1547_v0, %s1373_s13  ;;  %1002 = vrot.lane.b32.xlu0 %v1515_v59, %s1373_s13 }
 0x254   :  { %v599_v38 = vpop.permute.xlu1 %598  ;;  %v597_v28 = vpop.permute.xlu0 %596 }
 0x255   :  { %1149 = vst.msk [vmem:[%s2616_s3 + $0x154] sm:$0xf] %vm311_vm0, %v599_v38  ;;  %1148 = vst.msk [vmem:[%s2616_s3 + $0x150] sm:$0xf] %vm311_vm0, %v597_v28 }
 0x256   :  { %1008 = vrot.lane.b32.xlu1 %v1533_v62, %s1373_s13  ;;  %1006 = vrot.lane.b32.xlu0 %v1511_v54, %s1373_s13 }
 0x258   :  { %v615_v0 = vpop.permute.xlu1 %614  ;;  %v613_v59 = vpop.permute.xlu0 %612 }
 0x259   :  { %1157 = vst.msk [vmem:[%s2616_s3 + $0x174] sm:$0xf] %vm311_vm0, %v615_v0  ;;  %1156 = vst.msk [vmem:[%s2616_s3 + $0x170] sm:$0xf] %vm311_vm0, %v613_v59 }
 0x25c   :  { %v664_v11 = vpop.permute.xlu1 %663  ;;  %v662_v12 = vpop.permute.xlu0 %661 }
 0x25d   :  { %1165 = vst.msk [vmem:[%s2616_s3 + $0x194] sm:$0xf] %vm311_vm0, %v664_v11  ;;  %1164 = vst.msk [vmem:[%s2616_s3 + $0x190] sm:$0xf] %vm311_vm0, %v662_v12 }
 0x260   :  { %v680_v54 = vpop.permute.xlu1 %679  ;;  %v678_v62 = vpop.permute.xlu0 %677 }
 0x261   :  { %1173 = vst.msk [vmem:[%s2616_s3 + $0x1b4] sm:$0xf] %vm311_vm0, %v680_v54  ;;  %1172 = vst.msk [vmem:[%s2616_s3 + $0x1b0] sm:$0xf] %vm311_vm0, %v678_v62 }
 0x264   :  { %v729_v13 = vpop.permute.xlu1 %728  ;;  %v727_v14 = vpop.permute.xlu0 %726 }
 0x265   :  { %1181 = vst.msk [vmem:[%s2616_s3 + $0x1d4] sm:$0xf] %vm311_vm0, %v729_v13  ;;  %1180 = vst.msk [vmem:[%s2616_s3 + $0x1d0] sm:$0xf] %vm311_vm0, %v727_v14 }
 0x268   :  { %v745_v15 = vpop.permute.xlu1 %744  ;;  %v743_v16 = vpop.permute.xlu0 %742 }
 0x269   :  { %1189 = vst.msk [vmem:[%s2616_s3 + $0x1f4] sm:$0xf] %vm311_vm0, %v745_v15  ;;  %1188 = vst.msk [vmem:[%s2616_s3 + $0x1f0] sm:$0xf] %vm311_vm0, %v743_v16 }
 0x26c   :  { %v794_v17 = vpop.permute.xlu1 %793  ;;  %v792_v18 = vpop.permute.xlu0 %791 }
 0x26d   :  { %1197 = vst.msk [vmem:[%s2616_s3 + $0x214] sm:$0xf] %vm311_vm0, %v794_v17  ;;  %1196 = vst.msk [vmem:[%s2616_s3 + $0x210] sm:$0xf] %vm311_vm0, %v792_v18 }
 0x270   :  { %v810_v19 = vpop.permute.xlu1 %809  ;;  %v808_v20 = vpop.permute.xlu0 %807 }
 0x271   :  { %1205 = vst.msk [vmem:[%s2616_s3 + $0x234] sm:$0xf] %vm311_vm0, %v810_v19  ;;  %1204 = vst.msk [vmem:[%s2616_s3 + $0x230] sm:$0xf] %vm311_vm0, %v808_v20 }
 0x274   :  { %v859_v21 = vpop.permute.xlu1 %858  ;;  %v857_v22 = vpop.permute.xlu0 %856 }
 0x275   :  { %1213 = vst.msk [vmem:[%s2616_s3 + $0x254] sm:$0xf] %vm311_vm0, %v859_v21  ;;  %1212 = vst.msk [vmem:[%s2616_s3 + $0x250] sm:$0xf] %vm311_vm0, %v857_v22 }
 0x278   :  { %v863_v23 = vpop.permute.xlu1 %862  ;;  %v861_v24 = vpop.permute.xlu0 %860 }
 0x279   :  { %1215 = vst.msk [vmem:[%s2616_s3 + $0x25c] sm:$0xf] %vm311_vm0, %v863_v23  ;;  %1214 = vst.msk [vmem:[%s2616_s3 + $0x258] sm:$0xf] %vm311_vm0, %v861_v24 }
 0x27c   :  { %v867_v25 = vpop.permute.xlu1 %866  ;;  %v865_v26 = vpop.permute.xlu0 %864 }
 0x27d   :  { %1217 = vst.msk [vmem:[%s2616_s3 + $0x264] sm:$0xf] %vm311_vm0, %v867_v25  ;;  %1216 = vst.msk [vmem:[%s2616_s3 + $0x260] sm:$0xf] %vm311_vm0, %v865_v26 }
 0x280   :  { %v871_v29 = vpop.permute.xlu1 %870  ;;  %v869_v30 = vpop.permute.xlu0 %868 }
 0x281   :  { %1219 = vst.msk [vmem:[%s2616_s3 + $0x26c] sm:$0xf] %vm311_vm0, %v871_v29  ;;  %1218 = vst.msk [vmem:[%s2616_s3 + $0x268] sm:$0xf] %vm311_vm0, %v869_v30 }
 0x284   :  { %v875_v31 = vpop.permute.xlu1 %874  ;;  %v873_v32 = vpop.permute.xlu0 %872 }
 0x285   :  { %1221 = vst.msk [vmem:[%s2616_s3 + $0x274] sm:$0xf] %vm311_vm0, %v875_v31  ;;  %1220 = vst.msk [vmem:[%s2616_s3 + $0x270] sm:$0xf] %vm311_vm0, %v873_v32 }
 0x288   :  { %v879_v35 = vpop.permute.xlu1 %878  ;;  %v877_v36 = vpop.permute.xlu0 %876 }
 0x289   :  { %1223 = vst.msk [vmem:[%s2616_s3 + $0x27c] sm:$0xf] %vm311_vm0, %v879_v35  ;;  %1222 = vst.msk [vmem:[%s2616_s3 + $0x278] sm:$0xf] %vm311_vm0, %v877_v36 }
 0x28c   :  { %v916_v41 = vpop.permute.xlu1 %915  ;;  %v914_v42 = vpop.permute.xlu0 %913 }
 0x28d   :  { %1225 = vst.msk [vmem:[%s2616_s3 + $0x284] sm:$0xf] %vm311_vm0, %v916_v41  ;;  %1224 = vst.msk [vmem:[%s2616_s3 + $0x280] sm:$0xf] %vm311_vm0, %v914_v42 }
 0x290   :  { %v920_v43 = vpop.permute.xlu1 %919  ;;  %v918_v44 = vpop.permute.xlu0 %917 }
 0x291   :  { %1227 = vst.msk [vmem:[%s2616_s3 + $0x28c] sm:$0xf] %vm311_vm0, %v920_v43  ;;  %1226 = vst.msk [vmem:[%s2616_s3 + $0x288] sm:$0xf] %vm311_vm0, %v918_v44 }
 0x294   :  { %v924_v45 = vpop.permute.xlu1 %923  ;;  %v922_v46 = vpop.permute.xlu0 %921 }
 0x295   :  { %1229 = vst.msk [vmem:[%s2616_s3 + $0x294] sm:$0xf] %vm311_vm0, %v924_v45  ;;  %1228 = vst.msk [vmem:[%s2616_s3 + $0x290] sm:$0xf] %vm311_vm0, %v922_v46 }
 0x298   :  { %v928_v47 = vpop.permute.xlu1 %927  ;;  %v926_v48 = vpop.permute.xlu0 %925 }
 0x299   :  { %1231 = vst.msk [vmem:[%s2616_s3 + $0x29c] sm:$0xf] %vm311_vm0, %v928_v47  ;;  %1230 = vst.msk [vmem:[%s2616_s3 + $0x298] sm:$0xf] %vm311_vm0, %v926_v48 }
 0x29c   :  { %v932_v49 = vpop.permute.xlu1 %931  ;;  %v930_v50 = vpop.permute.xlu0 %929 }
 0x29d   :  { %1233 = vst.msk [vmem:[%s2616_s3 + $0x2a4] sm:$0xf] %vm311_vm0, %v932_v49  ;;  %1232 = vst.msk [vmem:[%s2616_s3 + $0x2a0] sm:$0xf] %vm311_vm0, %v930_v50 }
 0x2a0   :  { %v936_v52 = vpop.permute.xlu1 %935  ;;  %v934_v53 = vpop.permute.xlu0 %933 }
 0x2a1   :  { %1235 = vst.msk [vmem:[%s2616_s3 + $0x2ac] sm:$0xf] %vm311_vm0, %v936_v52  ;;  %1234 = vst.msk [vmem:[%s2616_s3 + $0x2a8] sm:$0xf] %vm311_vm0, %v934_v53 }
 0x2a4   :  { %v940_v55 = vpop.permute.xlu1 %939  ;;  %v938_v56 = vpop.permute.xlu0 %937 }
 0x2a5   :  { %1237 = vst.msk [vmem:[%s2616_s3 + $0x2b4] sm:$0xf] %vm311_vm0, %v940_v55  ;;  %1236 = vst.msk [vmem:[%s2616_s3 + $0x2b0] sm:$0xf] %vm311_vm0, %v938_v56 }
 0x2a8   :  { %v944_v58 = vpop.permute.xlu1 %943  ;;  %v942_v60 = vpop.permute.xlu0 %941 }
 0x2a9   :  { %1239 = vst.msk [vmem:[%s2616_s3 + $0x2bc] sm:$0xf] %vm311_vm0, %v944_v58  ;;  %1238 = vst.msk [vmem:[%s2616_s3 + $0x2b8] sm:$0xf] %vm311_vm0, %v942_v60 }
 0x2ac   :  { %v981_v1 = vpop.permute.xlu1 %980  ;;  %v979_v2 = vpop.permute.xlu0 %978 }
 0x2ad   :  { %1241 = vst.msk [vmem:[%s2616_s3 + $0x2c4] sm:$0xf] %vm311_vm0, %v981_v1  ;;  %1240 = vst.msk [vmem:[%s2616_s3 + $0x2c0] sm:$0xf] %vm311_vm0, %v979_v2 }
 0x2b0   :  { %v985_v3 = vpop.permute.xlu1 %984  ;;  %v983_v4 = vpop.permute.xlu0 %982 }
 0x2b1   :  { %1243 = vst.msk [vmem:[%s2616_s3 + $0x2cc] sm:$0xf] %vm311_vm0, %v985_v3  ;;  %1242 = vst.msk [vmem:[%s2616_s3 + $0x2c8] sm:$0xf] %vm311_vm0, %v983_v4 }
 0x2b4   :  { %v989_v5 = vpop.permute.xlu1 %988  ;;  %v987_v6 = vpop.permute.xlu0 %986 }
 0x2b5   :  { %1245 = vst.msk [vmem:[%s2616_s3 + $0x2d4] sm:$0xf] %vm311_vm0, %v989_v5  ;;  %1244 = vst.msk [vmem:[%s2616_s3 + $0x2d0] sm:$0xf] %vm311_vm0, %v987_v6 }
 0x2b8   :  { %v993_v7 = vpop.permute.xlu1 %992  ;;  %v991_v8 = vpop.permute.xlu0 %990 }
 0x2b9   :  { %1247 = vst.msk [vmem:[%s2616_s3 + $0x2dc] sm:$0xf] %vm311_vm0, %v993_v7  ;;  %1246 = vst.msk [vmem:[%s2616_s3 + $0x2d8] sm:$0xf] %vm311_vm0, %v991_v8 }
 0x2bc   :  { %v997_v9 = vpop.permute.xlu1 %996  ;;  %v995_v10 = vpop.permute.xlu0 %994 }
 0x2bd   :  { %1249 = vst.msk [vmem:[%s2616_s3 + $0x2e4] sm:$0xf] %vm311_vm0, %v997_v9  ;;  %1248 = vst.msk [vmem:[%s2616_s3 + $0x2e0] sm:$0xf] %vm311_vm0, %v995_v10 }
 0x2c0   :  { %v1001_v39 = vpop.permute.xlu1 %1000  ;;  %v999_v33 = vpop.permute.xlu0 %998 }
 0x2c1   :  { %1251 = vst.msk [vmem:[%s2616_s3 + $0x2ec] sm:$0xf] %vm311_vm0, %v1001_v39  ;;  %1250 = vst.msk [vmem:[%s2616_s3 + $0x2e8] sm:$0xf] %vm311_vm0, %v999_v33 }
 0x2c4   :  { %v1005_v37 = vpop.permute.xlu1 %1004  ;;  %v1003_v27 = vpop.permute.xlu0 %1002 }
 0x2c5   :  { %1253 = vst.msk [vmem:[%s2616_s3 + $0x2f4] sm:$0xf] %vm311_vm0, %v1005_v37  ;;  %1252 = vst.msk [vmem:[%s2616_s3 + $0x2f0] sm:$0xf] %vm311_vm0, %v1003_v27 }
 0x2c8   :  { %v1009_v63 = vpop.permute.xlu1 %1008  ;;  %v1007_v57 = vpop.permute.xlu0 %1006 }
 0x2c9   :  { %1255 = vst.msk [vmem:[%s2616_s3 + $0x2fc] sm:$0xf] %vm311_vm0, %v1009_v63  ;;  %1254 = vst.msk [vmem:[%s2616_s3 + $0x2f8] sm:$0xf] %vm311_vm0, %v1007_v57 }

// kernel: graph_attention_forward.3
= control target key start
LH: loop header
LB: loop body
LE: loop exit
PB: predicated region body
PF: predicated region fallthrough
CT: control target
= control target key end

     0   :  { %s4199_s0 = inlined_call_operand.vmem [shape: s32[2], index: 0, kind: input, shape index: {}]   ;;  %s4200_s1 = inlined_call_operand.vmem [shape: bf16[12,128,8], index: 1, kind: input, shape index: {}, may-alias: {1,2,3}]   ;;  %s4201_s2 = inlined_call_operand.vmem [shape: bf16[12,128,8], index: 2, kind: input, shape index: {}, may-alias: {1,2,3}]   ;;  %s4202_s3 = inlined_call_operand.vmem [shape: bf16[12,128,8], index: 3, kind: input, shape index: {}, may-alias: {1,2,3}]   ;;  %s4203_s4 = inlined_call_operand.vmem [shape: bf16[4,256,128], index: 4, kind: input, shape index: {}]   ;;  %s4204_s5 = inlined_call_operand.vmem [shape: bf16[4,8,128], index: 5, kind: input, shape index: {}]   ;;  %s4205_s6 = inlined_call_operand.vmem [shape: f32[1,128], index: 6, kind: input, shape index: {}]   ;;  %s4206_s7 = inlined_call_operand.vmem [shape: f32[1,128], index: 7, kind: input, shape index: {}]   ;;  %s4207_s8 = inlined_call_operand.vmem [shape: f32[1,128], index: 8, kind: input, shape index: {}]   ;;  %s4208_s9 = inlined_call_operand.vmem [shape: f32[128,128], index: 9, kind: input, shape index: {}]   ;;  %s4209_s10 = inlined_call_operand.vmem [shape: f32[128,128], index: 10, kind: output, shape index: {}]  }
   0x1   :  { %4210 = sst [smem:[#allocation8_spill]] %s4200_s1  ;;  %s15_s15 = sshll.u32 %s4199_s0, 4  ;;  %s16_s15 = int_to_ptr.vmem [resolvable:$true] %s15_s15 }
   0x2   :  { %4211 = sst [smem:[#allocation9_spill]] %s4201_s2  ;;  %s2940_s16 = scalar_lea.vmem %s16_s15, 16 }
   0x3   :  { %p2941_p0 = scmp.ne.s32.totalorder %s16_s15, %s2940_s16  ;;  %p2945_p1 = scmp.lt.s32.totalorder %s16_s15, %s16_s15 }
   0x4   :  { %p2946_p2 = scmp.lt.s32.totalorder %s2940_s16, %s2940_s16 }
   0x6   :  { %p2947_p3 = por %p2946_p2, %p2945_p1 }
   0x8   :  { %p2948_p4 = pnand %p2947_p3, %p2941_p0 }
   0xa   :  { %2951 = shalt.err (!%p2948_p4)  }
   0xb   :  { %s2978_s17 = smov [#allocation6]  }
   0xc   :  { %18 = dma.vmem_to_smem %s16_s15, 16, %s2978_s17, [#allocation5] }
   0xd   :  { %2964 = dma.done.wait [#allocation5], 16 }
   0xe   :  { %2965 = vsyncadd [#allocation5], 4294967280 }
   0xf   :  { %20 = sfence }
  0x10   :  { %s3042_s18 = smov 0   ;;  %s3044_s19 = smov 0  }
  0x11   :  { %s3046_s20 = smov 0  }
  0x12 LB: > { %s41_s0 = sadd.s32 1, %s2972_s19  ;;  %p2494_p5 = scmp.ge.s32.totalorder %s2976_s20, 1  ;;  %s2976_s20 = sphi %s3046_s20, %s26_s20   ;;  %s2972_s19 = sphi %s3044_s19, %s4222_s19   ;;  %s2968_s18 = sphi %s3042_s18, %s4221_s18  }
  0x13   : > { %p43_p6 = scmp.ge.s32.totalorder %s41_s0, 4  ;;  %p424_p7 = scmp.lt.s32.totalorder %s2976_s20, 5 }
  0x15   : > { %s4224_s0 = smov (%p43_p6, %s41_s0), 0  ;;  %p425_p8 = pnand %p2494_p5, %p424_p7 }
  0x16   : > { %p511_p9 = scmp.lt.s32.totalorder (!%p425_p8), %s2968_s18, 11  ;;  %s520_s21 = sadd.s32 (!%p425_p8), 4, %s2968_s18 }
  0x17   : > { %428 = sbr.rel (%p425_p8) target bundleno = 1509 (0x5e5), region = 56  ;;  %p522_p10 = scmp.lt.s32.totalorder (!%p425_p8), %s520_s21, 11 }
  0x18   : > { %s532_s22 = sadd.s32 (!%p425_p8), 8, %s2968_s18  ;;  %s4212_s1 = sld [smem:[#allocation8_spill]] (!%p425_p8) }
  0x19   : > { %p534_p11 = scmp.lt.s32.totalorder (!%p425_p8), %s532_s22, 11  ;;  %s4213_s2 = sld [smem:[#allocation9_spill]] (!%p425_p8) }
  0x1a   : > { %s545_s12 = sld [smem:[#allocation6]] (!%p425_p8)  ;;  %s2501_s13 = sld [smem:[#allocation6 + $0x1]] (!%p425_p8) }
  0x1b   : > { %p550_p12 = scmp.lt.s32.totalorder (!%p425_p8), %s2968_s18, 3  ;;  %p584_p13 = scmp.eq.s32.totalorder (!%p425_p8), %s2968_s18, 0 }
  0x1e   : > { %s512_s23 = scalar_select %p511_p9, %s2968_s18, 11 }
  0x1f   : > { %s4226_s21 = smov (!%p522_p10, %s520_s21), 11  ;;  %s4228_s22 = smov (!%p534_p11, %s532_s22), 11 }
  0x20   : > { %s2580_s24 = sshll.u32 %s512_s23, 6  ;;  %s2581_s28 = sshll.u32 %s4226_s21, 6  ;;  %v2979_v0 = vmov (%p584_p13), 0.0  }
  0x21   : > { %s3069_s27 = scalar_lea.vmem %s4212_s1, %s2580_s24  ;;  %s3074_s11 = scalar_lea.vmem %s4213_s2, %s2581_s28  ;;  %590 = vst [vmem:[%s4209_s10] sm:$0xff] (%p584_p13), %v2979_v0  ;;  %591 = vst [vmem:[%s4209_s10 + $0x8] sm:$0xff] (%p584_p13), %v2979_v0 }
  0x22   : > { %s2582_s14 = sshll.u32 %s4228_s22, 6  ;;  %s2502_s24 = sshll.u32 %s545_s12, 4  ;;  %592 = vst [vmem:[%s4209_s10 + $0x10] sm:$0xff] (%p584_p13), %v2979_v0  ;;  %593 = vst [vmem:[%s4209_s10 + $0x18] sm:$0xff] (%p584_p13), %v2979_v0 }
  0x23   : > { %s3081_s17 = scalar_lea.vmem %s4202_s3, %s2582_s14  ;;  %p552_p0 = scmp.lt.s32.totalorder %s2502_s24, 31  ;;  %594 = vst [vmem:[%s4209_s10 + $0x20] sm:$0xff] (%p584_p13), %v2979_v0  ;;  %595 = vst [vmem:[%s4209_s10 + $0x28] sm:$0xff] (%p584_p13), %v2979_v0 }
  0x24   : > { %s551_s23 = scalar_select %p550_p12, %s2968_s18, 3 }
  0x25   : > { %p554_p1 = scmp.lt.s32.totalorder %s2501_s13, 0  ;;  %s4230_s24 = smov (!%p552_p0, %s2502_s24), 31  ;;  %596 = vst [vmem:[%s4209_s10 + $0x30] sm:$0xff] (%p584_p13), %v2979_v0  ;;  %597 = vst [vmem:[%s4209_s10 + $0x38] sm:$0xff] (%p584_p13), %v2979_v0 }
  0x26   : > { %s2503_s21 = sshll.u32 %s551_s23, 5  ;;  %s2505_s25 = sshll.u32 %s551_s23, 2  ;;  %598 = vst [vmem:[%s4209_s10 + $0x40] sm:$0xff] (%p584_p13), %v2979_v0  ;;  %599 = vst [vmem:[%s4209_s10 + $0x48] sm:$0xff] (%p584_p13), %v2979_v0 }
  0x27   : > { %s4232_s13 = smov (!%p554_p1, %s2501_s13), 0  ;;  %s3087_s29 = scalar_lea.vmem %s4204_s5, %s2505_s25  ;;  %600 = vst [vmem:[%s4209_s10 + $0x50] sm:$0xff] (%p584_p13), %v2979_v0  ;;  %601 = vst [vmem:[%s4209_s10 + $0x58] sm:$0xff] (%p584_p13), %v2979_v0 }
  0x28   : > { %s556_s22 = sadd.s32 %s4232_s13, %s4230_s24  ;;  %589 = sbr.rel (!%p584_p13) target bundleno = 47 (0x2f), region = 60  ;;  %602 = vst [vmem:[%s4209_s10 + $0x60] sm:$0xff] (%p584_p13), %v2979_v0  ;;  %603 = vst [vmem:[%s4209_s10 + $0x68] sm:$0xff] (%p584_p13), %v2979_v0 }
  0x29   : > { %s558_s30 = sadd.s32 %s2503_s21, %s556_s22  ;;  %604 = vst [vmem:[%s4209_s10 + $0x70] sm:$0xff] (%p584_p13), %v2979_v0  ;;  %605 = vst [vmem:[%s4209_s10 + $0x78] sm:$0xff] (%p584_p13), %v2979_v0 }
  0x2a   : > { %s2504_s1 = sshll.u32 %s558_s30, 2 }
  0x2b   : > { %s3092_s14 = scalar_lea.vmem %s4203_s4, %s2504_s1 }
  0x2f PF: > { %vm642_vm0 = vcmask 64512   ;;  %v2788_v1 = vld [vmem:[%s3074_s11] sm:$0xff]   ;;  %v2789_v2 = vld [vmem:[%s3074_s11 + $0x8] sm:$0xff]   ;;  %v2790_v4 = vld [vmem:[%s3074_s11 + $0x10] sm:$0xff]   ;;  %v966_v25 = vlaneseq  ;;  %vm609_vm2 = vcmask 7168   ;;  %v2980_v55 = vmov -inf  }
  0x30   : > { %2747 = vmatprep.subr.msk.bf16.mxu0 %vm642_vm0, %v2788_v1  ;;  %v845_v3 = vsel %vm642_vm0, %v2788_v1, 0  ;;  %v848_v5 = vsel %vm642_vm0, %v2789_v2, 0  ;;  %v2796_v6 = vld [vmem:[%s3069_s27] sm:$0xff]   ;;  %v851_v7 = vsel %vm642_vm0, %v2790_v4, 0  ;;  %v2791_v8 = vld [vmem:[%s3074_s11 + $0x18] sm:$0xff]   ;;  %v2793_v12 = vld [vmem:[%s3074_s11 + $0x28] sm:$0xff]  }
  0x31   : > { %2666 = vmatpush3.bf16.xpose.msra.mxu0 %v845_v3  ;;  %2681 = vmatprep.mubr.msk.bf16.mxu0 %vm642_vm0, %v2796_v6  ;;  %v854_v9 = vsel %vm642_vm0, %v2791_v8, 0  ;;  %v2792_v10 = vld [vmem:[%s3074_s11 + $0x20] sm:$0xff]   ;;  %v860_v13 = vsel %vm642_vm0, %v2793_v12, 0  ;;  %v2794_v14 = vld [vmem:[%s3074_s11 + $0x30] sm:$0xff]   ;;  %v2795_v16 = vld [vmem:[%s3074_s11 + $0x38] sm:$0xff]   ;;  %v3186_v28 = vand.u32 127, %v966_v25 }
  0x32   : > { %2748 = vmatprep.subr.msk.bf16.mxu0 %vm642_vm0, %v2789_v2  ;;  %v857_v11 = vsel %vm642_vm0, %v2792_v10, 0  ;;  %v863_v15 = vsel %vm642_vm0, %v2794_v14, 0  ;;  %v866_v17 = vsel %vm642_vm0, %v2795_v16, 0  ;;  %v2797_v18 = vld [vmem:[%s3069_s27 + $0x8] sm:$0xff]   ;;  %v2798_v19 = vld [vmem:[%s3069_s27 + $0x10] sm:$0xff]   ;;  %v2799_v20 = vld [vmem:[%s3069_s27 + $0x18] sm:$0xff]  }
  0x33   : > { %v2800_v21 = vld [vmem:[%s3069_s27 + $0x20] sm:$0xff]   ;;  %v2801_v22 = vld [vmem:[%s3069_s27 + $0x28] sm:$0xff]   ;;  %v2802_v23 = vld [vmem:[%s3069_s27 + $0x30] sm:$0xff]   ;;  %vm970_vm1 = vcmp.lt.s32.totalorder %v3186_v28, 16  ;;  %612 = vst.msk [vmem:[#allocation2 + $0x10] sm:$0xff] %vm609_vm2, %v2980_v55  ;;  %vm1851_vm4 = vcmask 1043456  }
  0x34   : > { %v2803_v24 = vld [vmem:[%s3069_s27 + $0x38] sm:$0xff]   ;;  %v2617_v26 = vld [vmem:[%s3092_s14 + $0x8] sm:$0xff]   ;;  %v2586_v27 = vld [vmem:[%s3092_s14] sm:$0xff]   ;;  %610 = vst.msk [vmem:[#allocation2] sm:$0xff] %vm609_vm2, %v2980_v55  ;;  %p1984_p2 = scmp.eq.s32.totalorder %s2968_s18, 3 }
  0x35   : > { %v2591_v29 = vunpack.c.l.bf16 %v2617_v26  ;;  %v2587_v30 = vunpack.c.l.bf16 %v2586_v27  ;;  %v2592_v31 = vunpack.c.h.bf16 %v2617_v26  ;;  %v2588_v33 = vunpack.c.h.bf16 %v2586_v27  ;;  %v2618_v41 = vld [vmem:[%s3092_s14 + $0x10] sm:$0xff]   ;;  %v2619_v44 = vld [vmem:[%s3092_s14 + $0x18] sm:$0xff]   ;;  %611 = vst.msk [vmem:[#allocation2 + $0x8] sm:$0xff] %vm609_vm2, %v2980_v55  ;;  %613 = vst.msk [vmem:[#allocation2 + $0x18] sm:$0xff] %vm609_vm2, %v2980_v55 }
  0x36   : > { %v2595_v45 = vunpack.c.l.bf16 %v2618_v41  ;;  %v2600_v47 = vunpack.c.h.bf16 %v2619_v44  ;;  %v2599_v48 = vunpack.c.l.bf16 %v2619_v44  ;;  %v2596_v52 = vunpack.c.h.bf16 %v2618_v41  ;;  %614 = vst.msk [vmem:[#allocation2 + $0x20] sm:$0xff] %vm609_vm2, %v2980_v55  ;;  %615 = vst.msk [vmem:[#allocation2 + $0x28] sm:$0xff] %vm609_vm2, %v2980_v55  ;;  %v2620_v58 = vld [vmem:[%s3092_s14 + $0x20] sm:$0xff]   ;;  %v2621_v61 = vld [vmem:[%s3092_s14 + $0x28] sm:$0xff]  }
  0x37   : > { %616 = vst.msk [vmem:[#allocation2 + $0x30] sm:$0xff] %vm609_vm2, %v2980_v55  ;;  %617 = vst.msk [vmem:[#allocation2 + $0x38] sm:$0xff] %vm609_vm2, %v2980_v55  ;;  %v2607_v0 = vunpack.c.l.bf16 %v2621_v61  ;;  %v2603_v1 = vunpack.c.l.bf16 %v2620_v58  ;;  %v2608_v2 = vunpack.c.h.bf16 %v2621_v61  ;;  %v2805_v41 = vld [vmem:[%s3081_s17 + $0x8] sm:$0xff]   ;;  %vm2060_vm5 = vcmp.lt.s32.totalorder (%p1984_p2), %v3186_v28, 32 }
  0x38   : > { %618 = vst.msk [vmem:[#allocation2 + $0x40] sm:$0xff] %vm609_vm2, %v2980_v55  ;;  %619 = vst.msk [vmem:[#allocation2 + $0x48] sm:$0xff] %vm609_vm2, %v2980_v55 }
  0x39   : > { %2668 = vmatpush3.bf16.xpose.msra.mxu0 %v848_v5  ;;  %620 = vst.msk [vmem:[#allocation2 + $0x50] sm:$0xff] %vm609_vm2, %v2980_v55  ;;  %621 = vst.msk [vmem:[#allocation2 + $0x58] sm:$0xff] %vm609_vm2, %v2980_v55  ;;  %v2604_v5 = vunpack.c.h.bf16 %v2620_v58 }
  0x3a   : > { %2749 = vmatprep.subr.msk.bf16.mxu0 %vm642_vm0, %v2790_v4  ;;  %622 = vst.msk [vmem:[#allocation2 + $0x60] sm:$0xff] %vm609_vm2, %v2980_v55  ;;  %623 = vst.msk [vmem:[#allocation2 + $0x68] sm:$0xff] %vm609_vm2, %v2980_v55 }
  0x3b   : > { %624 = vst.msk [vmem:[#allocation2 + $0x70] sm:$0xff] %vm609_vm2, %v2980_v55  ;;  %625 = vst.msk [vmem:[#allocation2 + $0x78] sm:$0xff] %vm609_vm2, %v2980_v55  ;;  %v3327_v44 = vld [vmem:[#allocation2] sm:$0xff] }
  0x3c   : > { %vm3522_vm3 = vmpackc.low %vm970_vm1, %vm970_vm1 }
  0x3d   : > { %v3355_v58 = vld [vmem:[#allocation2 + $0x20] sm:$0xff] }
  0x3e   : > { %v3360_v61 = vld [vmem:[#allocation2 + $0x38] sm:$0xff] }
  0x41   : > { %2670 = vmatpush3.bf16.xpose.msra.mxu0 %v851_v7 }
  0x42   : > { %2750 = vmatprep.subr.msk.bf16.mxu0 %vm642_vm0, %v2791_v8 }
  0x49   : > { %2672 = vmatpush3.bf16.xpose.msra.mxu0 %v854_v9 }
  0x4a   : > { %2751 = vmatprep.subr.msk.bf16.mxu0 %vm642_vm0, %v2792_v10 }
  0x51   : > { %2674 = vmatpush3.bf16.xpose.msra.mxu0 %v857_v11 }
  0x52   : > { %2752 = vmatprep.subr.msk.bf16.mxu0 %vm642_vm0, %v2793_v12 }
  0x59   : > { %2676 = vmatpush3.bf16.xpose.msra.mxu0 %v860_v13  ;;  %v2622_v13 = vld [vmem:[%s3092_s14 + $0x30] sm:$0xff]  }
  0x5a   : > { %2753 = vmatprep.subr.msk.bf16.mxu0 %vm642_vm0, %v2794_v14  ;;  %v2981_v14 = vmov 0   ;;  %v2612_v25 = vunpack.c.h.bf16 %v2622_v13 }
  0x5b   : > { %2787 = vset.pattern.permute.xlu1 %v2981_v14  ;;  %2786 = vset.pattern.permute.xlu0 %v2981_v14  ;;  %v2809_v14 = vld [vmem:[%s3081_s17 + $0x28] sm:$0xff]  }
  0x61   : > { %2678 = vmatpush3.bf16.xpose.msra.mxu0 %v863_v15 }
  0x62   : > { %2754 = vmatprep.subr.msk.bf16.mxu0 %vm642_vm0, %v2795_v16 }
  0x69   : > { %2680 = vmatpush3.bf16.xpose.msra.mxu0 %v866_v17  ;;  %v2623_v17 = vld [vmem:[%s3092_s14 + $0x38] sm:$0xff]  }
  0x70   : > { %2682 = vmatmul.mubr.msk.bf16.vlgmr.msra.gmra.mrb[0].mxu0 %vm642_vm0, %v2797_v18 }
  0x71   : > { %2685 = vmatprep.mubr.msk.bf16.mxu0 %vm642_vm0, %v2798_v19  ;;  %v2615_v19 = vunpack.c.l.bf16 %v2623_v17 }
  0x78   : > { %2686 = vmatmul.mubr.msk.bf16.gmra.mrb[4].mxu0 %vm642_vm0, %v2799_v20  ;;  %v2611_v20 = vunpack.c.l.bf16 %v2622_v13  ;;  %v3386_v13 = vld [vmem:[#allocation2 + $0x40] sm:$0xff] }
  0x79   : > { %2689 = vmatprep.mubr.msk.bf16.mxu0 %vm642_vm0, %v2800_v21 }
  0x80   : > { %2690 = vmatmul.mubr.msk.bf16.gmra.mrb[8].mxu0 %vm642_vm0, %v2801_v22  ;;  %v2616_v22 = vunpack.c.h.bf16 %v2623_v17  ;;  %v3394_v17 = vld [vmem:[#allocation2 + $0x58] sm:$0xff] }
  0x81   : > { %2693 = vmatprep.mubr.msk.bf16.mxu0 %vm642_vm0, %v2802_v23 }
  0x88   : > { %2694 = vmatmul.mubr.msk.bf16.gmra.mrb[12].mxu0 %vm642_vm0, %v2803_v24 }
 0x143   : > { %v2683_v32 = vpop.f32.mrb[0].mxu0 }
 0x144   : > { %v911_v34 = vadd.f32 %v2683_v32, %v2591_v29  ;;  %v902_v35 = vpop.f32.mrb[1].mxu0 }
 0x145   : > { %v903_v36 = vadd.f32 %v2587_v30, %v902_v35  ;;  %v2684_v37 = vpop.f32.mrb[2].mxu0 }
 0x146   : > { %v914_v38 = vadd.f32 %v2684_v37, %v2592_v31  ;;  %v905_v39 = vpop.f32.mrb[3].mxu0  ;;  %v3191_v40 = vsel %vm970_vm1, %v911_v34, -1e+30 }
 0x147   : > { %v906_v42 = vadd.f32 %v2588_v33, %v905_v39  ;;  %1009 = vmax.xlane.f32.xlu1 %v3191_v40  ;;  %v3197_v43 = vsel %vm970_vm1, %v903_v36, -1e+30  ;;  %v2982_v33 = vmov 0.0   ;;  %v2804_v39 = vld [vmem:[%s3081_s17] sm:$0xff]  }
 0x148   : > { %1005 = vmax.xlane.f32.xlu0 %v3197_v43  ;;  %v3203_v46 = vsel %vm970_vm1, %v914_v38, -1e+30  ;;  %643 = vst.msk [vmem:[#allocation4] sm:$0xff] %vm642_vm0, %v2982_v33  ;;  %644 = vst.msk [vmem:[#allocation4 + $0x8] sm:$0xff] %vm642_vm0, %v2982_v33  ;;  %2697 = vmatprep.subr.bf16.mxu1 %v2804_v39 }
 0x149   : > { %v3208_v50 = vsel %vm970_vm1, %v906_v42, -1e+30  ;;  %626 = vst.msk [vmem:[#allocation3] sm:$0xff] %vm609_vm2, %v2982_v33  ;;  %627 = vst.msk [vmem:[#allocation3 + $0x8] sm:$0xff] %vm609_vm2, %v2982_v33  ;;  %2698 = vmatpush3.bf16.msra.mxu1 %v2804_v39  ;;  %v3325_v42 = vld [vmem:[#allocation2 + $0x10] sm:$0xff] }
 0x14a   : > { %628 = vst.msk [vmem:[#allocation3 + $0x10] sm:$0xff] %vm609_vm2, %v2982_v33  ;;  %629 = vst.msk [vmem:[#allocation3 + $0x18] sm:$0xff] %vm609_vm2, %v2982_v33  ;;  %2699 = vmatprep.subr.bf16.mxu1 %v2805_v41 }
 0x14b   : > { %1011 = vmax.xlane.f32.xlu1 %v3203_v46  ;;  %v2687_v49 = vpop.f32.mrb[4].mxu0  ;;  %630 = vst.msk [vmem:[#allocation3 + $0x20] sm:$0xff] %vm609_vm2, %v2982_v33  ;;  %631 = vst.msk [vmem:[#allocation3 + $0x28] sm:$0xff] %vm609_vm2, %v2982_v33 }
 0x14c   : > { %v918_v51 = vpop.f32.mrb[5].mxu0  ;;  %1007 = vmax.xlane.f32.xlu0 %v3208_v50  ;;  %v927_v59 = vadd.f32 %v2687_v49, %v2599_v48  ;;  %632 = vst.msk [vmem:[#allocation3 + $0x30] sm:$0xff] %vm609_vm2, %v2982_v33  ;;  %633 = vst.msk [vmem:[#allocation3 + $0x38] sm:$0xff] %vm609_vm2, %v2982_v33 }
 0x14d   : > { %v919_v53 = vadd.f32 %v2595_v45, %v918_v51  ;;  %v2688_v54 = vpop.f32.mrb[6].mxu0  ;;  %634 = vst.msk [vmem:[#allocation3 + $0x40] sm:$0xff] %vm609_vm2, %v2982_v33  ;;  %635 = vst.msk [vmem:[#allocation3 + $0x48] sm:$0xff] %vm609_vm2, %v2982_v33  ;;  %2700 = vmatpush3.bf16.msra.mxu1 %v2805_v41  ;;  %v3335_v51 = vld [vmem:[#allocation2 + $0x18] sm:$0xff] }
 0x14e   : > { %v930_v56 = vadd.f32 %v2688_v54, %v2600_v47  ;;  %v921_v57 = vpop.f32.mrb[7].mxu0  ;;  %v3241_v4 = vsel %vm970_vm1, %v927_v59, -1e+30  ;;  %636 = vst.msk [vmem:[#allocation3 + $0x50] sm:$0xff] %vm609_vm2, %v2982_v33  ;;  %637 = vst.msk [vmem:[#allocation3 + $0x58] sm:$0xff] %vm609_vm2, %v2982_v33  ;;  %v2807_v59 = vld [vmem:[%s3081_s17 + $0x18] sm:$0xff]  }
 0x14f   : > { %v3230_v60 = vsel %vm970_vm1, %v919_v53, -1e+30  ;;  %v922_v62 = vadd.f32 %v2596_v52, %v921_v57  ;;  %638 = vst.msk [vmem:[#allocation3 + $0x60] sm:$0xff] %vm609_vm2, %v2982_v33  ;;  %639 = vst.msk [vmem:[#allocation3 + $0x68] sm:$0xff] %vm609_vm2, %v2982_v33  ;;  %v3340_v52 = vld [vmem:[#allocation2 + $0x8] sm:$0xff]  ;;  %v2806_v53 = vld [vmem:[%s3081_s17 + $0x10] sm:$0xff]  }
 0x150   : > { %1013 = vmax.xlane.f32.xlu0 %v3230_v60  ;;  %v3236_v63 = vsel %vm970_vm1, %v930_v56, -1e+30  ;;  %640 = vst.msk [vmem:[#allocation3 + $0x70] sm:$0xff] %vm609_vm2, %v2982_v33  ;;  %641 = vst.msk [vmem:[#allocation3 + $0x78] sm:$0xff] %vm609_vm2, %v2982_v33  ;;  %2701 = vmatprep.subr.bf16.mxu1 %v2806_v53 }
 0x151   : > { %1019 = vmax.xlane.f32.xlu1 %v3236_v63  ;;  %v3246_v7 = vsel %vm970_vm1, %v922_v62, -1e+30  ;;  %645 = vst.msk [vmem:[#allocation4 + $0x10] sm:$0xff] %vm642_vm0, %v2982_v33  ;;  %646 = vst.msk [vmem:[#allocation4 + $0x18] sm:$0xff] %vm642_vm0, %v2982_v33  ;;  %2702 = vmatpush3.bf16.msra.mxu1 %v2806_v53 }
 0x152   : > { %647 = vst.msk [vmem:[#allocation4 + $0x20] sm:$0xff] %vm642_vm0, %v2982_v33  ;;  %648 = vst.msk [vmem:[#allocation4 + $0x28] sm:$0xff] %vm642_vm0, %v2982_v33  ;;  %2703 = vmatprep.subr.bf16.mxu1 %v2807_v59 }
 0x153   : > { %v2691_v3 = vpop.f32.mrb[8].mxu0  ;;  %649 = vst.msk [vmem:[#allocation4 + $0x30] sm:$0xff] %vm642_vm0, %v2982_v33  ;;  %650 = vst.msk [vmem:[#allocation4 + $0x38] sm:$0xff] %vm642_vm0, %v2982_v33 }
 0x154   : > { %v934_v6 = vpop.f32.mrb[9].mxu0  ;;  %1017 = vmax.xlane.f32.xlu0 %v3241_v4  ;;  %v943_v8 = vadd.f32 %v2691_v3, %v2607_v0  ;;  %651 = vst.msk [vmem:[#allocation4 + $0x40] sm:$0xff] %vm642_vm0, %v2982_v33  ;;  %652 = vst.msk [vmem:[#allocation4 + $0x48] sm:$0xff] %vm642_vm0, %v2982_v33  ;;  %v3369_v3 = vld [vmem:[#allocation2 + $0x30] sm:$0xff] }
 0x155   : > { %v935_v9 = vadd.f32 %v2603_v1, %v934_v6  ;;  %v2692_v10 = vpop.f32.mrb[10].mxu0  ;;  %1015 = vmax.xlane.f32.xlu1 %v3246_v7  ;;  %653 = vst.msk [vmem:[#allocation4 + $0x50] sm:$0xff] %vm642_vm0, %v2982_v33  ;;  %654 = vst.msk [vmem:[#allocation4 + $0x58] sm:$0xff] %vm642_vm0, %v2982_v33  ;;  %2704 = vmatpush3.bf16.msra.mxu1 %v2807_v59  ;;  %v3374_v6 = vld [vmem:[#allocation2 + $0x28] sm:$0xff] }
 0x156   : > { %v946_v11 = vadd.f32 %v2692_v10, %v2608_v2  ;;  %v937_v12 = vpop.f32.mrb[11].mxu0  ;;  %v3263_v21 = vsel %vm970_vm1, %v943_v8, -1e+30  ;;  %655 = vst.msk [vmem:[#allocation4 + $0x60] sm:$0xff] %vm642_vm0, %v2982_v33  ;;  %656 = vst.msk [vmem:[#allocation4 + $0x68] sm:$0xff] %vm642_vm0, %v2982_v33 }
 0x157   : > { %v938_v15 = vadd.f32 %v2604_v5, %v937_v12  ;;  %v3252_v16 = vsel %vm970_vm1, %v935_v9, -1e+30  ;;  %657 = vst.msk [vmem:[#allocation4 + $0x70] sm:$0xff] %vm642_vm0, %v2982_v33  ;;  %658 = vst.msk [vmem:[#allocation4 + $0x78] sm:$0xff] %vm642_vm0, %v2982_v33  ;;  %v2808_v5 = vld [vmem:[%s3081_s17 + $0x20] sm:$0xff]  }
 0x158   : > { %v3257_v18 = vsel %vm970_vm1, %v946_v11, -1e+30  ;;  %1021 = vmax.xlane.f32.xlu0 %v3252_v16  ;;  %2705 = vmatprep.subr.bf16.mxu1 %v2808_v5 }
 0x159   : > { %1027 = vmax.xlane.f32.xlu1 %v3257_v18  ;;  %v3267_v23 = vsel %vm970_vm1, %v938_v15, -1e+30  ;;  %2706 = vmatpush3.bf16.msra.mxu1 %v2808_v5 }
 0x15a   : > { %2707 = vmatprep.subr.bf16.mxu1 %v2809_v14 }
 0x15b   : > { %v2695_v24 = vpop.f32.mrb[12].mxu0 }
 0x15c   : > { %v950_v26 = vpop.f32.mrb[13].mxu0  ;;  %1025 = vmax.xlane.f32.xlu0 %v3263_v21  ;;  %v959_v27 = vadd.f32 %v2695_v24, %v2615_v19 }
 0x15d   : > { %v951_v29 = vadd.f32 %v2611_v20, %v950_v26  ;;  %v2696_v30 = vpop.f32.mrb[14].mxu0  ;;  %1023 = vmax.xlane.f32.xlu1 %v3267_v23  ;;  %2708 = vmatpush3.bf16.msra.mxu1 %v2809_v14  ;;  %v3406_v26 = vld [vmem:[#allocation2 + $0x50] sm:$0xff]  ;;  %v3458_v14 = vld [vmem:[#allocation2 + $0x68] sm:$0xff] }
 0x15e   : > { %v962_v31 = vadd.f32 %v2696_v30, %v2616_v22  ;;  %v953_v32 = vpop.f32.mrb[15].mxu0  ;;  %v3315_v37 = vsel %vm970_vm1, %v959_v27, -1e+30  ;;  %v2810_v27 = vld [vmem:[%s3081_s17 + $0x30] sm:$0xff]   ;;  %v3414_v30 = vld [vmem:[#allocation2 + $0x48] sm:$0xff] }
 0x15f   : > { %v954_v34 = vadd.f32 %v2612_v25, %v953_v32  ;;  %v3305_v35 = vsel %vm970_vm1, %v951_v29, -1e+30  ;;  %2709 = vmatprep.subr.bf16.mxu1 %v2810_v27 }
 0x160   : > { %v3309_v36 = vsel %vm970_vm1, %v962_v31, -1e+30  ;;  %1029 = vmax.xlane.f32.xlu0 %v3305_v35 }
 0x161   : > { %1035 = vmax.xlane.f32.xlu1 %v3309_v36  ;;  %v3319_v38 = vsel %vm970_vm1, %v954_v34, -1e+30  ;;  %2710 = vmatpush3.bf16.msra.mxu1 %v2810_v27 }
 0x164   : > { %1033 = vmax.xlane.f32.xlu0 %v3315_v37 }
 0x165   : > { %1031 = vmax.xlane.f32.xlu1 %v3319_v38 }
 0x1d4   : > { %v1010_v45 = vpop.xlane.xlu1 %1009 }
 0x1d5   : > { %v3330_v47 = vmax.f32 %v3325_v42, %v1010_v45  ;;  %v1006_v48 = vpop.xlane.xlu0 %1005  ;;  %v3428_v45 = vld [vmem:[#allocation2 + $0x60] sm:$0xff] }
 0x1d6   : > { %v3333_v49 = vmax.f32 %v3327_v44, %v1006_v48  ;;  %v2811_v48 = vld [vmem:[%s3081_s17 + $0x38] sm:$0xff]  }
 0x1d7   : > { %1641 = vst.msk [vmem:[#allocation2 + $0x10] sm:$0xff] %vm609_vm2, %v3330_v47  ;;  %1113 = vperm.xlu1 %2787, %v3330_v47   ;;  %2711 = vmatprep.subr.bf16.mxu1 %v2811_v48 }
 0x1d8   : > { %1639 = vst.msk [vmem:[#allocation2] sm:$0xff] %vm609_vm2, %v3333_v49  ;;  %v1012_v54 = vpop.xlane.xlu1 %1011  ;;  %1103 = vperm.xlu0 %2786, %v3333_v49   ;;  %v1053_v33 = vsub.f32 %v3327_v44, %v3333_v49  ;;  %v3436_v44 = vld [vmem:[#allocation2 + $0x78] sm:$0xff]  ;;  %2712 = vmatpush3.bf16.msra.mxu1 %v2811_v48 }
 0x1d9   : > { %v3347_v55 = vmax.f32 %v3335_v51, %v1012_v54  ;;  %v1008_v56 = vpop.xlane.xlu0 %1007 }
 0x1da   : > { %v3350_v57 = vmax.f32 %v3340_v52, %v1008_v56  ;;  %v1069_v56 = vmul.f32 1.442695, %v1053_v33 }
 0x1db   : > { %1642 = vst.msk [vmem:[#allocation2 + $0x18] sm:$0xff] %vm609_vm2, %v3347_v55  ;;  %1118 = vperm.xlu1 %2787, %v3347_v55   ;;  %v1056_v59 = vsub.f32 %v3335_v51, %v3347_v55 }
 0x1dc   : > { %1640 = vst.msk [vmem:[#allocation2 + $0x8] sm:$0xff] %vm609_vm2, %v3350_v57  ;;  %v1054_v51 = vsub.f32 %v3340_v52, %v3350_v57  ;;  %2812 = vpow2.f32 %v1069_v56 }
 0x1dd   : > { %v1014_v62 = vpop.xlane.xlu0 %1013 }
 0x1de   : > { %v3363_v0 = vmax.f32 %v3355_v58, %v1014_v62  ;;  %v1020_v1 = vpop.xlane.xlu1 %1019 }
 0x1df   : > { %v3366_v2 = vmax.f32 %v3360_v61, %v1020_v1  ;;  %1108 = vperm.xlu1 %2787, %v3350_v57   ;;  %v1055_v57 = vsub.f32 %v3325_v42, %v3330_v47 }
 0x1e0   : > { %1643 = vst.msk [vmem:[#allocation2 + $0x20] sm:$0xff] %vm609_vm2, %v3363_v0  ;;  %v1057_v56 = vsub.f32 %v3355_v58, %v3363_v0 }
 0x1e1   : > { %v1060_v8 = vsub.f32 %v3360_v61, %v3366_v2  ;;  %1646 = vst.msk [vmem:[#allocation2 + $0x38] sm:$0xff] %vm609_vm2, %v3366_v2  ;;  %v1018_v9 = vpop.xlane.xlu0 %1017 }
 0x1e2   : > { %v3381_v10 = vmax.f32 %v3369_v3, %v1018_v9  ;;  %v1016_v11 = vpop.xlane.xlu1 %1015  ;;  %v3451_v9 = vld [vmem:[#allocation2 + $0x70] sm:$0xff]  ;;  %v1077_v47 = vmul.f32 1.442695, %v1057_v56 }
 0x1e3   : > { %v3384_v12 = vmax.f32 %v3374_v6, %v1016_v11 }
 0x1e4   : > { %v1059_v15 = vsub.f32 %v3369_v3, %v3381_v10  ;;  %1645 = vst.msk [vmem:[#allocation2 + $0x30] sm:$0xff] %vm609_vm2, %v3381_v10  ;;  %1133 = vperm.xlu1 %2787, %v3381_v10  }
 0x1e5   : > { %v1058_v19 = vsub.f32 %v3374_v6, %v3384_v12  ;;  %1644 = vst.msk [vmem:[#allocation2 + $0x28] sm:$0xff] %vm609_vm2, %v3384_v12  ;;  %v1022_v20 = vpop.xlane.xlu0 %1021 }
 0x1e6   : > { %v1028_v22 = vpop.xlane.xlu1 %1027  ;;  %v3401_v24 = vmax.f32 %v3386_v13, %v1022_v20  ;;  %v3489_v42 = vpop.eup %2812 }
 0x1e7   : > { %v3404_v25 = vmax.f32 %v3394_v17, %v1028_v22  ;;  %v1075_v22 = vmul.f32 1.442695, %v1056_v59 }
 0x1e8   : > { %v1061_v29 = vsub.f32 %v3386_v13, %v3401_v24  ;;  %1647 = vst.msk [vmem:[#allocation2 + $0x40] sm:$0xff] %vm609_vm2, %v3401_v24  ;;  %1123 = vperm.xlu1 %2787, %v3363_v0  }
 0x1e9   : > { %1650 = vst.msk [vmem:[#allocation2 + $0x58] sm:$0xff] %vm609_vm2, %v3404_v25  ;;  %v1026_v32 = vpop.xlane.xlu0 %1025  ;;  %2814 = vpow2.f32 %v1075_v22  ;;  %v4217_v13 = vsub.f32 %v3394_v17, %v3404_v25 }
 0x1ea   : > { %v1024_v34 = vpop.xlane.xlu1 %1023  ;;  %v3423_v39 = vmax.f32 %v3406_v26, %v1026_v32 }
 0x1eb   : > { %v3426_v41 = vmax.f32 %v3414_v30, %v1024_v34  ;;  %v1071_v34 = vmul.f32 1.442695, %v1054_v51 }
 0x1ec   : > { %v1063_v53 = vsub.f32 %v3406_v26, %v3423_v39  ;;  %1649 = vst.msk [vmem:[#allocation2 + $0x50] sm:$0xff] %vm609_vm2, %v3423_v39  ;;  %1128 = vperm.xlu1 %2787, %v3384_v12  }
 0x1ed   : > { %1648 = vst.msk [vmem:[#allocation2 + $0x48] sm:$0xff] %vm609_vm2, %v3426_v41  ;;  %1148 = vperm.xlu0 %2786, %v3426_v41   ;;  %v1030_v54 = vpop.xlane.xlu0 %1029  ;;  %2816 = vpow2.f32 %v1071_v34  ;;  %v4216_v6 = vsub.f32 %v3414_v30, %v3426_v41 }
 0x1ee   : > { %v1036_v62 = vpop.xlane.xlu1 %1035  ;;  %v3446_v1 = vmax.f32 %v3428_v45, %v1030_v54  ;;  %v1073_v54 = vmul.f32 1.442695, %v1055_v57 }
 0x1ef   : > { %v3449_v5 = vmax.f32 %v3436_v44, %v1036_v62  ;;  %v1087_v10 = vmul.f32 1.442695, %v4216_v6  ;;  %v1256_v6 = vld [vmem:[#allocation3 + $0x58] sm:$0xff] }
 0x1f0   : > { %v1065_v11 = vsub.f32 %v3428_v45, %v3446_v1  ;;  %1651 = vst.msk [vmem:[#allocation2 + $0x60] sm:$0xff] %vm609_vm2, %v3446_v1  ;;  %1138 = vperm.xlu1 %2787, %v3366_v2   ;;  %2818 = vpow2.f32 %v1073_v54 }
 0x1f1   : > { %1654 = vst.msk [vmem:[#allocation2 + $0x78] sm:$0xff] %vm609_vm2, %v3449_v5  ;;  %1158 = vperm.xlu0 %2786, %v3404_v25   ;;  %v1034_v20 = vpop.xlane.xlu0 %1033  ;;  %2820 = vpow2.f32 %v1077_v47 }
 0x1f2   : > { %v1032_v27 = vpop.xlane.xlu1 %1031  ;;  %v3468_v32 = vmax.f32 %v3451_v9, %v1034_v20  ;;  %v1093_v3 = vmul.f32 1.442695, %v1065_v11 }
 0x1f3   : > { %v3471_v33 = vmax.f32 %v3458_v14, %v1032_v27  ;;  %v3493_v59 = vpop.eup %2814 }
 0x1f4   : > { %1653 = vst.msk [vmem:[#allocation2 + $0x70] sm:$0xff] %vm609_vm2, %v3468_v32  ;;  %1143 = vperm.xlu1 %2787, %v3401_v24  }
 0x1f5   : > { %1652 = vst.msk [vmem:[#allocation2 + $0x68] sm:$0xff] %vm609_vm2, %v3471_v33  ;;  %1168 = vperm.xlu0 %2786, %v3471_v33  }
 0x1f7   : > { %v3497_v62 = vpop.eup %2816 }
 0x1f8   : > { %1153 = vperm.xlu1 %2787, %v3423_v39  }
 0x1f9   : > { %1178 = vperm.xlu0 %2786, %v3449_v5  }
 0x1fa   : > { %v3500_v58 = vpop.eup %2818 }
 0x1fb   : > { %v3503_v0 = vpop.eup %2820 }
 0x1fc   : > { %1163 = vperm.xlu1 %2787, %v3446_v1   ;;  %v1247_v1 = vld [vmem:[#allocation3 + $0x10] sm:$0xff] }
 0x1fd   : > { %1360 = vperm.xlu0 %2786, %v3489_v42  }
 0x200   : > { %1173 = vperm.xlu1 %2787, %v3468_v32  }
 0x201   : > { %1375 = vperm.xlu0 %2786, %v3493_v59  }
 0x204   : > { %1365 = vperm.xlu1 %2787, %v3497_v62  }
 0x208   : > { %1370 = vperm.xlu1 %2787, %v3500_v58  }
 0x20c   : > { %1380 = vperm.xlu1 %2787, %v3503_v0  }
 0x256   : > { %v1114_v51 = vpop.permute.xlu1 %1113 }
 0x257   : > { %v1183_v20 = vsub.f32 %v3191_v40, %v1114_v51  ;;  %v1104_v22 = vpop.permute.xlu0 %1103 }
 0x258   : > { %v1181_v27 = vsub.f32 %v3197_v43, %v1104_v22 }
 0x259   : > { %v1201_v57 = vmul.f32 1.442695, %v1183_v20 }
 0x25a   : > { %v1197_v34 = vmul.f32 1.442695, %v1181_v27  ;;  %v1119_v54 = vpop.permute.xlu1 %1118 }
 0x25b   : > { %2822 = vpow2.f32 %v1201_v57  ;;  %v1184_v56 = vsub.f32 %v3203_v46, %v1119_v54 }
 0x25c   : > { %2824 = vpow2.f32 %v1197_v34  ;;  %v1079_v34 = vmul.f32 1.442695, %v1058_v19 }
 0x25d   : > { %v1203_v47 = vmul.f32 1.442695, %v1184_v56 }
 0x25e   : > { %v1109_v52 = vpop.permute.xlu1 %1108 }
 0x25f   : > { %2826 = vpow2.f32 %v1203_v47  ;;  %v1182_v55 = vsub.f32 %v3208_v50, %v1109_v52 }
 0x261   : > { %v1199_v48 = vmul.f32 1.442695, %v1182_v55 }
 0x263   : > { %2828 = vpow2.f32 %v1199_v48  ;;  %v1134_v31 = vpop.permute.xlu1 %1133 }
 0x264   : > { %v1187_v40 = vsub.f32 %v3241_v4, %v1134_v31 }
 0x265   : > { %v2823_v51 = vpop.eup %2822 }
 0x266   : > { %v2825_v49 = vpop.eup %2824  ;;  %v1209_v43 = vmul.f32 1.442695, %v1187_v40  ;;  %v1231_v20 = vsel %vm970_vm1, %v2823_v51, 0.0 }
 0x267   : > { %v1124_v22 = vpop.permute.xlu1 %1123  ;;  %1281 = vadd.xlane.f32.xlu0 %v1231_v20  ;;  %v1229_v46 = vsel %vm970_vm1, %v2825_v49, 0.0 }
 0x268   : > { %2830 = vpow2.f32 %v1209_v43  ;;  %v1185_v27 = vsub.f32 %v3230_v60, %v1124_v22  ;;  %1277 = vadd.xlane.f32.xlu1 %v1229_v46 }
 0x269   : > { %v2827_v50 = vpop.eup %2826 }
 0x26a   : > { %v1205_v55 = vmul.f32 1.442695, %v1185_v27  ;;  %v1232_v4 = vsel %vm970_vm1, %v2827_v50, 0.0 }
 0x26b   : > { %v1129_v31 = vpop.permute.xlu1 %1128 }
 0x26c   : > { %2832 = vpow2.f32 %v1205_v55  ;;  %v1186_v52 = vsub.f32 %v3246_v7, %v1129_v31  ;;  %1283 = vadd.xlane.f32.xlu1 %v1232_v4  ;;  %v1149_v48 = vpop.permute.xlu0 %1148  ;;  %v2543_v7 = vpack.c.bf16 %v2827_v50, %v2823_v51 }
 0x26d   : > { %v2829_v57 = vpop.eup %2828  ;;  %v1190_v47 = vsub.f32 %v3267_v23, %v1149_v48 }
 0x26e   : > { %v1207_v60 = vmul.f32 1.442695, %v1186_v52  ;;  %v1230_v54 = vsel %vm970_vm1, %v2829_v57, 0.0  ;;  %v2540_v56 = vpack.c.bf16 %v2829_v57, %v2825_v49 }
 0x26f   : > { %v1139_v40 = vpop.permute.xlu1 %1138  ;;  %1279 = vadd.xlane.f32.xlu0 %v1230_v54  ;;  %v1215_v49 = vmul.f32 1.442695, %v1190_v47 }
 0x270   : > { %2834 = vpow2.f32 %v1207_v60  ;;  %v1188_v43 = vsub.f32 %v3236_v63, %v1139_v40  ;;  %2713 = vmatprep.mubr.msk.bf16.mxu1 %vm3522_vm3, %v2540_v56  ;;  %v1159_v20 = vpop.permute.xlu0 %1158 }
 0x271   : > { %2714 = vmatmul.mubr.msk.bf16.vlgmr.msra.gmra.mrb[0].mxu1 %vm3522_vm3, %v2543_v7  ;;  %v1192_v27 = vsub.f32 %v3257_v18, %v1159_v20 }
 0x272   : > { %v2831_v22 = vpop.eup %2830  ;;  %v1211_v46 = vmul.f32 1.442695, %v1188_v43 }
 0x273   : > { %v1144_v55 = vpop.permute.xlu1 %1143  ;;  %v1235_v23 = vsel %vm970_vm1, %v2831_v22, 0.0  ;;  %v1219_v4 = vmul.f32 1.442695, %v1192_v27 }
 0x274   : > { %2836 = vpow2.f32 %v1211_v46  ;;  %v1189_v51 = vsub.f32 %v3252_v16, %v1144_v55  ;;  %v1169_v63 = vpop.permute.xlu0 %1168  ;;  %1289 = vadd.xlane.f32.xlu0 %v1235_v23 }
 0x275   : > { %2838 = vpow2.f32 %v1215_v49  ;;  %v1194_v52 = vsub.f32 %v3319_v38, %v1169_v63 }
 0x276   : > { %v2833_v50 = vpop.eup %2832  ;;  %v1213_v31 = vmul.f32 1.442695, %v1189_v51 }
 0x277   : > { %v1154_v48 = vpop.permute.xlu1 %1153  ;;  %v1233_v18 = vsel %vm970_vm1, %v2833_v50, 0.0  ;;  %v1223_v47 = vmul.f32 1.442695, %v1194_v52 }
 0x278   : > { %2840 = vpow2.f32 %v1213_v31  ;;  %v1191_v57 = vsub.f32 %v3263_v21, %v1154_v48  ;;  %v1179_v60 = vpop.permute.xlu0 %1178  ;;  %1285 = vadd.xlane.f32.xlu0 %v1233_v18 }
 0x279   : > { %2842 = vpow2.f32 %v1219_v4  ;;  %v1196_v56 = vsub.f32 %v3309_v36, %v1179_v60 }
 0x27a   : > { %v2835_v54 = vpop.eup %2834  ;;  %v1217_v16 = vmul.f32 1.442695, %v1191_v57 }
 0x27b   : > { %v1164_v40 = vpop.permute.xlu1 %1163  ;;  %v2546_v7 = vpack.c.bf16 %v2835_v54, %v2833_v50  ;;  %v1227_v20 = vmul.f32 1.442695, %v1196_v56  ;;  %v1234_v51 = vsel %vm970_vm1, %v2835_v54, 0.0 }
 0x27c   : > { %2844 = vpow2.f32 %v1217_v16  ;;  %v1193_v38 = vsub.f32 %v3305_v35, %v1164_v40  ;;  %v3627_v41 = vpop.permute.xlu0 %1360 }
 0x27d   : > { %2717 = vmatprep.mubr.msk.bf16.mxu1 %vm3522_vm3, %v2546_v7  ;;  %2846 = vpow2.f32 %v1223_v47 }
 0x27e   : > { %v2837_v43 = vpop.eup %2836  ;;  %v1221_v46 = vmul.f32 1.442695, %v1193_v38 }
 0x27f   : > { %v1174_v21 = vpop.permute.xlu1 %1173  ;;  %v1236_v27 = vsel %vm970_vm1, %v2837_v43, 0.0  ;;  %v2549_v49 = vpack.c.bf16 %v2837_v43, %v2831_v22  ;;  %v2839_v55 = vpop.eup %2838  ;;  %v1081_v43 = vmul.f32 1.442695, %v1059_v15  ;;  %v1091_v15 = vmul.f32 1.442695, %v4217_v13 }
 0x280   : > { %2848 = vpow2.f32 %v1221_v46  ;;  %v1195_v36 = vsub.f32 %v3315_v37, %v1174_v21  ;;  %1291 = vadd.xlane.f32.xlu1 %v1236_v27  ;;  %v1238_v18 = vsel %vm970_vm1, %v2839_v55, 0.0  ;;  %v1089_v46 = vmul.f32 1.442695, %v1063_v53  ;;  %v3631_v53 = vpop.permute.xlu0 %1375 }
 0x281   : > { %2718 = vmatmul.mubr.msk.bf16.gmra.mrb[4].mxu1 %vm3522_vm3, %v2549_v49  ;;  %2850 = vpow2.f32 %v1227_v20  ;;  %v1085_v20 = vmul.f32 1.442695, %v1061_v29  ;;  %v1083_v21 = vmul.f32 1.442695, %v1060_v8  ;;  %v4218_v8 = vsub.f32 %v3458_v14, %v3471_v33  ;;  %v1245_v14 = vld [vmem:[#allocation3] sm:$0xff] }
 0x282   : > { %v2841_v35 = vpop.eup %2840  ;;  %v1225_v23 = vmul.f32 1.442695, %v1195_v36  ;;  %v1263_v33 = vmul.f32 %v3500_v58, %v1247_v1  ;;  %v1261_v49 = vmul.f32 %v3489_v42, %v1245_v14  ;;  %v1251_v42 = vld [vmem:[#allocation3 + $0x30] sm:$0xff]  ;;  %v1253_v1 = vld [vmem:[#allocation3 + $0x40] sm:$0xff] }
 0x283   : > { %v2552_v63 = vpack.c.bf16 %v2839_v55, %v2841_v35  ;;  %v2843_v50 = vpop.eup %2842  ;;  %v1237_v57 = vsel %vm970_vm1, %v2841_v35, 0.0  ;;  %v1095_v19 = vmul.f32 1.442695, %v4218_v8  ;;  %v3625_v39 = vpop.permute.xlu1 %1365  ;;  %v1248_v35 = vld [vmem:[#allocation3 + $0x18] sm:$0xff] }
 0x284   : > { %2852 = vpow2.f32 %v1225_v23  ;;  %1287 = vadd.xlane.f32.xlu1 %v1234_v51  ;;  %v1240_v37 = vsel %vm970_vm1, %v2843_v50, 0.0  ;;  %v1264_v51 = vmul.f32 %v3493_v59, %v1248_v35  ;;  %v1260_v35 = vld [vmem:[#allocation3 + $0x78] sm:$0xff] }
 0x285   : > { %2721 = vmatprep.mubr.msk.bf16.mxu1 %vm3522_vm3, %v2552_v63  ;;  %2854 = vpow2.f32 %v1081_v43  ;;  %v1246_v63 = vld [vmem:[#allocation3 + $0x8] sm:$0xff] }
 0x286   : > { %v2845_v22 = vpop.eup %2844  ;;  %2856 = vpow2.f32 %v1085_v20 }
 0x287   : > { %v1239_v4 = vsel %vm970_vm1, %v2845_v22, 0.0  ;;  %v2555_v31 = vpack.c.bf16 %v2843_v50, %v2845_v22  ;;  %v2847_v52 = vpop.eup %2846  ;;  %2858 = vpow2.f32 %v1079_v34  ;;  %v3629_v45 = vpop.permute.xlu1 %1370 }
 0x288   : > { %1299 = vadd.xlane.f32.xlu1 %v1240_v37  ;;  %1297 = vadd.xlane.f32.xlu0 %v1239_v4  ;;  %v1242_v7 = vsel %vm970_vm1, %v2847_v52, 0.0  ;;  %2860 = vpow2.f32 %v1089_v46  ;;  %v1262_v37 = vmul.f32 %v3497_v62, %v1246_v63  ;;  %v1250_v46 = vld [vmem:[#allocation3 + $0x28] sm:$0xff] }
 0x289   : > { %2722 = vmatmul.mubr.msk.bf16.gmra.mrb[8].mxu1 %vm3522_vm3, %v2555_v31  ;;  %2862 = vpow2.f32 %v1083_v21 }
 0x28a   : > { %v2849_v48 = vpop.eup %2848  ;;  %2864 = vpow2.f32 %v1093_v3 }
 0x28b   : > { %v2558_v60 = vpack.c.bf16 %v2847_v52, %v2849_v48  ;;  %v2851_v54 = vpop.eup %2850  ;;  %v1241_v38 = vsel %vm970_vm1, %v2849_v48, 0.0  ;;  %2866 = vpow2.f32 %v1087_v10  ;;  %v3633_v11 = vpop.permute.xlu1 %1380  ;;  %v1255_v10 = vld [vmem:[#allocation3 + $0x50] sm:$0xff] }
 0x28c   : > { %1295 = vadd.xlane.f32.xlu1 %v1238_v18  ;;  %1293 = vadd.xlane.f32.xlu0 %v1237_v57  ;;  %v1244_v56 = vsel %vm970_vm1, %v2851_v54, 0.0  ;;  %2868 = vpow2.f32 %v1091_v15  ;;  %v1249_v18 = vld [vmem:[#allocation3 + $0x20] sm:$0xff] }
 0x28d   : > { %2725 = vmatprep.mubr.msk.bf16.mxu1 %vm3522_vm3, %v2558_v60  ;;  %2870 = vpow2.f32 %v1095_v19  ;;  %v1265_v62 = vmul.f32 %v3503_v0, %v1249_v18 }
 0x28e   : > { %v2853_v16 = vpop.eup %2852 }
 0x28f   : > { %v1243_v47 = vsel %vm970_vm1, %v2853_v16, 0.0  ;;  %v2561_v40 = vpack.c.bf16 %v2851_v54, %v2853_v16  ;;  %v2855_v12 = vpop.eup %2854 }
 0x290   : > { %1307 = vadd.xlane.f32.xlu1 %v1244_v56  ;;  %1305 = vadd.xlane.f32.xlu0 %v1243_v47  ;;  %v3601_v61 = vpop.eup %2856  ;;  %v1267_v52 = vmul.f32 %v2855_v12, %v1251_v42  ;;  %v1252_v47 = vld [vmem:[#allocation3 + $0x38] sm:$0xff]  ;;  %v1257_v42 = vld [vmem:[#allocation3 + $0x60] sm:$0xff] }
 0x291   : > { %2726 = vmatmul.mubr.msk.bf16.gmra.mrb[12].mxu1 %vm3522_vm3, %v2561_v40  ;;  %v3603_v2 = vpop.eup %2858  ;;  %v4219_v40 = vsub.f32 %v3436_v44, %v3449_v5 }
 0x292   : > { %v3610_v24 = vpop.eup %2860  ;;  %v1266_v44 = vmul.f32 %v3603_v2, %v1250_v46 }
 0x293   : > { %v2863_v26 = vpop.eup %2862  ;;  %v1271_v15 = vmul.f32 %v3610_v24, %v1255_v10 }
 0x294   : > { %1303 = vadd.xlane.f32.xlu1 %v1242_v7  ;;  %1301 = vadd.xlane.f32.xlu0 %v1241_v38  ;;  %v3613_v17 = vpop.eup %2864  ;;  %v1099_v7 = vmul.f32 1.442695, %v4219_v40  ;;  %v4220_v38 = vsub.f32 %v3451_v9, %v3468_v32  ;;  %v1268_v34 = vmul.f32 %v2863_v26, %v1252_v47  ;;  %v1826_v9 = vld [vmem:[%s3087_s29] sm:$0xf] }
 0x295   : > { %v3615_v25 = vpop.eup %2866  ;;  %2755 = vmatprep.subr.msk.bf16.mxu1 %vm1851_vm4, %v1826_v9 }
 0x296   : > { %v3619_v29 = vpop.eup %2868  ;;  %v1097_v43 = vmul.f32 1.442695, %v4220_v38  ;;  %2872 = vpow2.f32 %v1099_v7  ;;  %v1344_v7 = vld [vmem:[#allocation4 + $0x10] sm:$0xff]  ;;  %v1342_v38 = vld [vmem:[#allocation4] sm:$0xff] }
 0x297   : > { %v3622_v30 = vpop.eup %2870  ;;  %v1272_v13 = vmul.f32 %v3619_v29, %v1256_v6 }
 0x298   : > { %2874 = vpow2.f32 %v1097_v43  ;;  %v1345_v43 = vld [vmem:[#allocation4 + $0x18] sm:$0xff] }
 0x2a5   : > { %1390 = vperm.xlu1 %2787, %v2855_v12   ;;  %v1853_v12 = vsel %vm1851_vm4, %v1826_v9, 0 }
 0x2a6   : > { %2730 = vmatpush3.bf16.msra.mxu1 %v1853_v12 }
 0x2a9   : > { %1400 = vperm.xlu1 %2787, %v3601_v61  }
 0x2aa   : > { %1385 = vperm.xlu0 %2786, %v3603_v2  }
 0x2ad   : > { %1410 = vperm.xlu1 %2787, %v3610_v24  }
 0x2ae   : > { %1395 = vperm.xlu0 %2786, %v2863_v26   ;;  %v1254_v26 = vld [vmem:[#allocation3 + $0x48] sm:$0xff] }
 0x2b1   : > { %1420 = vperm.xlu1 %2787, %v3613_v17  }
 0x2b2   : > { %1405 = vperm.xlu0 %2786, %v3615_v25  }
 0x2b6   : > { %1415 = vperm.xlu0 %2786, %v3619_v29  }
 0x2ba   : > { %1425 = vperm.xlu0 %2786, %v3622_v30  }
 0x2f4   : > { %v1282_v27 = vpop.xlane.xlu0 %1281 }
 0x2f5   : > { %v1311_v36 = vadd.f32 %v1282_v27, %v1263_v33  ;;  %v1278_v55 = vpop.xlane.xlu1 %1277  ;;  %v2873_v27 = vpop.eup %2872 }
 0x2f6   : > { %v1309_v23 = vadd.f32 %v1278_v55, %v1261_v49  ;;  %v1270_v49 = vmul.f32 %v3615_v25, %v1254_v26  ;;  %v2875_v29 = vpop.eup %2874  ;;  %v1258_v25 = vld [vmem:[#allocation3 + $0x68] sm:$0xff] }
 0x2f7   : > { %1328 = vst.msk [vmem:[#allocation3 + $0x10] sm:$0xff] %vm609_vm2, %v1311_v36  ;;  %v1269_v36 = vmul.f32 %v3601_v61, %v1253_v1  ;;  %v1274_v18 = vmul.f32 %v3622_v30, %v1258_v25  ;;  %v1347_v26 = vld [vmem:[#allocation4 + $0x28] sm:$0xff] }
 0x2f8   : > { %1326 = vst.msk [vmem:[#allocation3] sm:$0xff] %vm609_vm2, %v1309_v23  ;;  %v1259_v23 = vld [vmem:[#allocation3 + $0x70] sm:$0xff] }
 0x2f9   : > { %v1284_v50 = vpop.xlane.xlu1 %1283 }
 0x2fa   : > { %v1312_v22 = vadd.f32 %v1284_v50, %v1264_v51 }
 0x2fc   : > { %1329 = vst.msk [vmem:[#allocation3 + $0x18] sm:$0xff] %vm609_vm2, %v1312_v22  ;;  %v1280_v58 = vpop.xlane.xlu0 %1279  ;;  %v1276_v22 = vmul.f32 %v2873_v27, %v1260_v35 }
 0x2fd   : > { %v1310_v4 = vadd.f32 %v1280_v58, %v1262_v37  ;;  %v1275_v37 = vmul.f32 %v2875_v29, %v1259_v23  ;;  %v1352_v23 = vld [vmem:[#allocation4 + $0x50] sm:$0xff] }
 0x2fe   : > { %v1676_v31 = vld [vmem:[#allocation3 + $0x10] sm:$0xff] }
 0x2ff   : > { %1327 = vst.msk [vmem:[#allocation3 + $0x8] sm:$0xff] %vm609_vm2, %v1310_v4  ;;  %1702 = vperm.xlu1 %2787, %v1676_v31   ;;  %v1674_v60 = vld [vmem:[#allocation3] sm:$0xff] }
 0x301   : > { %v1290_v48 = vpop.xlane.xlu0 %1289 }
 0x302   : > { %v1315_v57 = vadd.f32 %v1290_v48, %v1267_v52 }
 0x303   : > { %1692 = vperm.xlu1 %2787, %v1674_v60   ;;  %v1677_v59 = vld [vmem:[#allocation3 + $0x18] sm:$0xff] }
 0x304   : > { %1332 = vst.msk [vmem:[#allocation3 + $0x30] sm:$0xff] %vm609_vm2, %v1315_v57  ;;  %1707 = vperm.xlu0 %2786, %v1677_v59   ;;  %v1273_v57 = vmul.f32 %v3613_v17, %v1257_v42 }
 0x305   : > { %v1286_v54 = vpop.xlane.xlu0 %1285 }
 0x306   : > { %v1313_v16 = vadd.f32 %v1286_v54, %v1265_v62  ;;  %v1675_v56 = vld [vmem:[#allocation3 + $0x8] sm:$0xff] }
 0x308   : > { %1330 = vst.msk [vmem:[#allocation3 + $0x20] sm:$0xff] %vm609_vm2, %v1313_v16  ;;  %1697 = vperm.xlu0 %2786, %v1675_v56  }
 0x30b   : > { %v1680_v20 = vld [vmem:[#allocation3 + $0x30] sm:$0xff] }
 0x30c   : > { %1722 = vperm.xlu1 %2787, %v1680_v20   ;;  %v1343_v20 = vld [vmem:[#allocation4 + $0x8] sm:$0xff] }
 0x30d   : > { %v1292_v0 = vpop.xlane.xlu1 %1291 }
 0x30e   : > { %v1316_v21 = vadd.f32 %v1292_v0, %v1268_v34  ;;  %v1440_v34 = vmul.f32 %v3629_v45, %v1344_v7  ;;  %v1438_v0 = vmul.f32 %v3627_v41, %v1342_v38 }
 0x30f   : > { %v1678_v3 = vld [vmem:[#allocation3 + $0x20] sm:$0xff] }
 0x310   : > { %1333 = vst.msk [vmem:[#allocation3 + $0x38] sm:$0xff] %vm609_vm2, %v1316_v21  ;;  %1712 = vperm.xlu1 %2787, %v1678_v3   ;;  %v1441_v21 = vmul.f32 %v3631_v53, %v1345_v43  ;;  %v1348_v53 = vld [vmem:[#allocation4 + $0x30] sm:$0xff] }
 0x311   : > { %v1288_v5 = vpop.xlane.xlu1 %1287 }
 0x312   : > { %v1314_v32 = vadd.f32 %v1288_v5, %v1266_v44  ;;  %v1439_v5 = vmul.f32 %v3625_v39, %v1343_v20  ;;  %v1349_v39 = vld [vmem:[#allocation4 + $0x38] sm:$0xff] }
 0x314   : > { %1331 = vst.msk [vmem:[#allocation3 + $0x28] sm:$0xff] %vm609_vm2, %v1314_v32 }
 0x315   : > { %v1300_v8 = vpop.xlane.xlu1 %1299  ;;  %v1298_v19 = vpop.xlane.xlu0 %1297 }
 0x316   : > { %v1320_v2 = vadd.f32 %v1300_v8, %v1272_v13  ;;  %v1319_v14 = vadd.f32 %v1298_v19, %v1271_v15  ;;  %v1346_v15 = vld [vmem:[#allocation4 + $0x20] sm:$0xff] }
 0x317   : > { %v1681_v33 = vld [vmem:[#allocation3 + $0x38] sm:$0xff]  ;;  %v1442_v1 = vmul.f32 %v3633_v11, %v1346_v15 }
 0x318   : > { %1337 = vst.msk [vmem:[#allocation3 + $0x58] sm:$0xff] %vm609_vm2, %v1320_v2  ;;  %1336 = vst.msk [vmem:[#allocation3 + $0x50] sm:$0xff] %vm609_vm2, %v1319_v14  ;;  %1727 = vperm.xlu0 %2786, %v1681_v33   ;;  %v1353_v11 = vld [vmem:[#allocation4 + $0x58] sm:$0xff] }
 0x319   : > { %v1296_v55 = vpop.xlane.xlu1 %1295  ;;  %v1294_v24 = vpop.xlane.xlu0 %1293 }
 0x31a   : > { %v1318_v51 = vadd.f32 %v1296_v55, %v1270_v49  ;;  %v1317_v63 = vadd.f32 %v1294_v24, %v1269_v36 }
 0x31b   : > { %v1679_v50 = vld [vmem:[#allocation3 + $0x28] sm:$0xff] }
 0x31c   : > { %1335 = vst.msk [vmem:[#allocation3 + $0x48] sm:$0xff] %vm609_vm2, %v1318_v51  ;;  %1334 = vst.msk [vmem:[#allocation3 + $0x40] sm:$0xff] %vm609_vm2, %v1317_v63  ;;  %1717 = vperm.xlu0 %2786, %v1679_v50   ;;  %v1350_v50 = vld [vmem:[#allocation4 + $0x40] sm:$0xff] }
 0x31d   : > { %v1308_v58 = vpop.xlane.xlu1 %1307  ;;  %v1306_v4 = vpop.xlane.xlu0 %1305 }
 0x31e   : > { %v1324_v61 = vadd.f32 %v1308_v58, %v1276_v22  ;;  %v1323_v31 = vadd.f32 %v1306_v4, %v1275_v37  ;;  %v1351_v58 = vld [vmem:[#allocation4 + $0x48] sm:$0xff] }
 0x31f   : > { %v1685_v52 = vld [vmem:[#allocation3 + $0x58] sm:$0xff]  ;;  %v1684_v48 = vld [vmem:[#allocation3 + $0x50] sm:$0xff] }
 0x320   : > { %1341 = vst.msk [vmem:[#allocation3 + $0x78] sm:$0xff] %vm609_vm2, %v1324_v61  ;;  %1340 = vst.msk [vmem:[#allocation3 + $0x70] sm:$0xff] %vm609_vm2, %v1323_v31  ;;  %1747 = vperm.xlu0 %2786, %v1685_v52   ;;  %1742 = vperm.xlu1 %2787, %v1684_v48  }
 0x321   : > { %v1304_v60 = vpop.xlane.xlu1 %1303  ;;  %v1302_v59 = vpop.xlane.xlu0 %1301 }
 0x322   : > { %v1322_v62 = vadd.f32 %v1304_v60, %v1274_v18  ;;  %v1321_v54 = vadd.f32 %v1302_v59, %v1273_v57 }
 0x323   : > { %v1683_v16 = vld [vmem:[#allocation3 + $0x48] sm:$0xff]  ;;  %v1682_v56 = vld [vmem:[#allocation3 + $0x40] sm:$0xff] }
 0x324   : > { %1339 = vst.msk [vmem:[#allocation3 + $0x68] sm:$0xff] %vm609_vm2, %v1322_v62  ;;  %1338 = vst.msk [vmem:[#allocation3 + $0x60] sm:$0xff] %vm609_vm2, %v1321_v54  ;;  %1737 = vperm.xlu0 %2786, %v1683_v16   ;;  %1732 = vperm.xlu1 %2787, %v1682_v56   ;;  %v1354_v62 = vld [vmem:[#allocation4 + $0x60] sm:$0xff]  ;;  %v1355_v16 = vld [vmem:[#allocation4 + $0x68] sm:$0xff] }
 0x325   : > { %v1391_v41 = vpop.permute.xlu1 %1390 }
 0x326   : > { %v1444_v19 = vmul.f32 %v1391_v41, %v1348_v53 }
 0x327   : > { %v1689_v30 = vld [vmem:[#allocation3 + $0x78] sm:$0xff]  ;;  %v1688_v17 = vld [vmem:[#allocation3 + $0x70] sm:$0xff] }
 0x328   : > { %1435 = vperm.xlu0 %2786, %v2873_v27   ;;  %1430 = vperm.xlu1 %2787, %v2875_v29  }
 0x329   : > { %v1386_v12 = vpop.permute.xlu0 %1385  ;;  %v1401_v8 = vpop.permute.xlu1 %1400 }
 0x32a   : > { %v1443_v36 = vmul.f32 %v1386_v12, %v1347_v26  ;;  %v1446_v4 = vmul.f32 %v1401_v8, %v1350_v50 }
 0x32b   : > { %v1687_v47 = vld [vmem:[#allocation3 + $0x68] sm:$0xff]  ;;  %v1686_v40 = vld [vmem:[#allocation3 + $0x60] sm:$0xff] }
 0x32c   : > { %1757 = vperm.xlu0 %2786, %v1687_v47   ;;  %1752 = vperm.xlu1 %2787, %v1686_v40  }
 0x32d   : > { %v1396_v45 = vpop.permute.xlu0 %1395  ;;  %v1411_v51 = vpop.permute.xlu1 %1410 }
 0x32e   : > { %v1445_v33 = vmul.f32 %v1396_v45, %v1349_v39  ;;  %v1448_v37 = vmul.f32 %v1411_v51, %v1352_v23 }
 0x330   : > { %1767 = vperm.xlu0 %2786, %v1689_v30   ;;  %1762 = vperm.xlu1 %2787, %v1688_v17  }
 0x331   : > { %v1406_v2 = vpop.permute.xlu0 %1405  ;;  %v1421_v54 = vpop.permute.xlu1 %1420 }
 0x332   : > { %v1447_v52 = vmul.f32 %v1406_v2, %v1351_v58  ;;  %v1450_v47 = vmul.f32 %v1421_v54, %v1354_v62 }
 0x335   : > { %v1416_v22 = vpop.permute.xlu0 %1415 }
 0x336   : > { %v1449_v42 = vmul.f32 %v1416_v22, %v1353_v11 }
 0x339   : > { %v1426_v56 = vpop.permute.xlu0 %1425 }
 0x33a   : > { %v1451_v17 = vmul.f32 %v1426_v56, %v1355_v16 }
 0x344   : > { %v2715_v46 = vpop.f32.mrb[0].mxu1 }
 0x345   : > { %v1609_v3 = vadd.f32 %v2715_v46, %v1440_v34  ;;  %v1544_v44 = vpop.f32.mrb[1].mxu1 }
 0x346   : > { %v1607_v6 = vadd.f32 %v1544_v44, %v1438_v0  ;;  %v2716_v10 = vpop.f32.mrb[2].mxu1 }
 0x347   : > { %1625 = vst.msk [vmem:[#allocation4 + $0x10] sm:$0xff] %vm642_vm0, %v1609_v3  ;;  %v1610_v9 = vadd.f32 %v2716_v10, %v1441_v21  ;;  %v1547_v32 = vpop.f32.mrb[3].mxu1 }
 0x348   : > { %1623 = vst.msk [vmem:[#allocation4] sm:$0xff] %vm642_vm0, %v1607_v6  ;;  %v1608_v13 = vadd.f32 %v1547_v32, %v1439_v5 }
 0x349   : > { %1626 = vst.msk [vmem:[#allocation4 + $0x18] sm:$0xff] %vm642_vm0, %v1610_v9 }
 0x34a   : > { %1624 = vst.msk [vmem:[#allocation4 + $0x8] sm:$0xff] %vm642_vm0, %v1608_v13 }
 0x34e   : > { %v1660_v41 = vld [vmem:[#allocation4 + $0x10] sm:$0xff] }
 0x34f   : > { %v1658_v12 = vld [vmem:[#allocation4] sm:$0xff] }
 0x350   : > { %v1661_v6 = vld [vmem:[#allocation4 + $0x18] sm:$0xff] }
 0x351   : > { %v1659_v13 = vld [vmem:[#allocation4 + $0x8] sm:$0xff] }
 0x354   : > { %v2719_v14 = vpop.f32.mrb[4].mxu1 }
 0x355   : > { %v1613_v27 = vadd.f32 %v2719_v14, %v1444_v19  ;;  %v1560_v49 = vpop.f32.mrb[5].mxu1 }
 0x356   : > { %v1611_v29 = vadd.f32 %v1560_v49, %v1442_v1  ;;  %v2720_v55 = vpop.f32.mrb[6].mxu1 }
 0x357   : > { %1629 = vst.msk [vmem:[#allocation4 + $0x30] sm:$0xff] %vm642_vm0, %v1613_v27  ;;  %v1614_v24 = vadd.f32 %v2720_v55, %v1445_v33  ;;  %v1563_v35 = vpop.f32.mrb[7].mxu1  ;;  %v1357_v55 = vld [vmem:[#allocation4 + $0x78] sm:$0xff] }
 0x358   : > { %1627 = vst.msk [vmem:[#allocation4 + $0x20] sm:$0xff] %vm642_vm0, %v1611_v29  ;;  %v1612_v63 = vadd.f32 %v1563_v35, %v1443_v36 }
 0x359   : > { %1630 = vst.msk [vmem:[#allocation4 + $0x38] sm:$0xff] %vm642_vm0, %v1614_v24  ;;  %v1356_v24 = vld [vmem:[#allocation4 + $0x70] sm:$0xff] }
 0x35a   : > { %1628 = vst.msk [vmem:[#allocation4 + $0x28] sm:$0xff] %vm642_vm0, %v1612_v63 }
 0x35c   : > { %v2723_v25 = vpop.f32.mrb[8].mxu1 }
 0x35d   : > { %v1617_v61 = vadd.f32 %v2723_v25, %v1448_v37  ;;  %v1576_v31 = vpop.f32.mrb[9].mxu1 }
 0x35e   : > { %v1615_v48 = vadd.f32 %v1576_v31, %v1446_v4  ;;  %v2724_v18 = vpop.f32.mrb[10].mxu1  ;;  %v1664_v4 = vld [vmem:[#allocation4 + $0x30] sm:$0xff] }
 0x35f   : > { %1633 = vst.msk [vmem:[#allocation4 + $0x50] sm:$0xff] %vm642_vm0, %v1617_v61  ;;  %v1618_v57 = vadd.f32 %v2724_v18, %v1449_v42  ;;  %v1579_v60 = vpop.f32.mrb[11].mxu1  ;;  %v1662_v51 = vld [vmem:[#allocation4 + $0x20] sm:$0xff] }
 0x360   : > { %1631 = vst.msk [vmem:[#allocation4 + $0x40] sm:$0xff] %vm642_vm0, %v1615_v48  ;;  %v1616_v59 = vadd.f32 %v1579_v60, %v1447_v52  ;;  %v1665_v35 = vld [vmem:[#allocation4 + $0x38] sm:$0xff] }
 0x361   : > { %1634 = vst.msk [vmem:[#allocation4 + $0x58] sm:$0xff] %vm642_vm0, %v1618_v57  ;;  %v1663_v63 = vld [vmem:[#allocation4 + $0x28] sm:$0xff] }
 0x362   : > { %1632 = vst.msk [vmem:[#allocation4 + $0x48] sm:$0xff] %vm642_vm0, %v1616_v59 }
 0x364   : > { %v3687_v40 = vpop.f32.mrb[12].mxu1 }
 0x365   : > { %v1592_v30 = vpop.f32.mrb[13].mxu1 }
 0x366   : > { %v1619_v7 = vadd.f32 %v1592_v30, %v1450_v47  ;;  %v3689_v38 = vpop.f32.mrb[14].mxu1  ;;  %v1668_v56 = vld [vmem:[#allocation4 + $0x50] sm:$0xff] }
 0x367   : > { %v1595_v43 = vpop.f32.mrb[15].mxu1 }
 0x368   : > { %1635 = vst.msk [vmem:[#allocation4 + $0x60] sm:$0xff] %vm642_vm0, %v1619_v7  ;;  %v1620_v20 = vadd.f32 %v1595_v43, %v1451_v17  ;;  %v1669_v47 = vld [vmem:[#allocation4 + $0x58] sm:$0xff]  ;;  %v1666_v7 = vld [vmem:[#allocation4 + $0x40] sm:$0xff] }
 0x369   : > { %v1667_v16 = vld [vmem:[#allocation4 + $0x48] sm:$0xff] }
 0x36a   : > { %1636 = vst.msk [vmem:[#allocation4 + $0x68] sm:$0xff] %vm642_vm0, %v1620_v20 }
 0x37e   : > { %v1703_v34 = vpop.permute.xlu1 %1702 }
 0x382   : > { %v1693_v0 = vpop.permute.xlu1 %1692 }
 0x383   : > { %v1708_v46 = vpop.permute.xlu0 %1707 }
 0x384   : > { %2876 = vrcp.f32 %v1708_v46 }
 0x385   : > { %2878 = vrcp.f32 %v1693_v0 }
 0x386   : > { %2880 = vrcp.f32 %v1703_v34 }
 0x387   : > { %v1698_v21 = vpop.permute.xlu0 %1697 }
 0x388   : > { %2882 = vrcp.f32 %v1698_v21 }
 0x38b   : > { %v1723_v10 = vpop.permute.xlu1 %1722 }
 0x38e   : > { %v2877_v3 = vpop.eup %2876 }
 0x38f   : > { %v2879_v44 = vpop.eup %2878  ;;  %v1777_v32 = vmul.f32 %v2877_v3, %v1661_v6  ;;  %v1713_v19 = vpop.permute.xlu1 %1712  ;;  %v1671_v3 = vld [vmem:[#allocation4 + $0x68] sm:$0xff] }
 0x390   : > { %v2881_v5 = vpop.eup %2880  ;;  %v1771_v45 = vmul.f32 %v2879_v44, %v1658_v12 }
 0x391   : > { %v1775_v15 = vmul.f32 %v2881_v5, %v1660_v41  ;;  %v1670_v5 = vld [vmem:[#allocation4 + $0x60] sm:$0xff] }
 0x392   : > { %v2883_v9 = vpop.eup %2882 }
 0x393   : > { %v1773_v53 = vmul.f32 %v2883_v9, %v1659_v13  ;;  %v1803_v39 = vpack.c.bf16 %v1777_v32, %v1775_v15 }
 0x395   : > { %v1802_v8 = vpack.c.bf16 %v1773_v53, %v1771_v45 }
 0x397   : > { %v1728_v26 = vpop.permute.xlu0 %1727  ;;  %2731 = vmatprep.mubr.msk.bf16.mxu1 %vm642_vm0, %v1802_v8  ;;  %v1812_v8 = vld [vmem:[%s4209_s10 + $0x10] sm:$0xff] }
 0x398   : > { %2732 = vmatmul.mubr.msk.bf16.vlgmr.msra.gmra.mrb[16].mxu1 %vm642_vm0, %v1803_v39  ;;  %2884 = vrcp.f32 %v1728_v26  ;;  %v1810_v39 = vld [vmem:[%s4209_s10] sm:$0xff]  ;;  %v1813_v26 = vld [vmem:[%s4209_s10 + $0x18] sm:$0xff] }
 0x399   : > { %2886 = vrcp.f32 %v1713_v19 }
 0x39a   : > { %2888 = vrcp.f32 %v1723_v10 }
 0x39b   : > { %v1718_v1 = vpop.permute.xlu0 %1717 }
 0x39c   : > { %2890 = vrcp.f32 %v1718_v1 }
 0x39f   : > { %v1748_v2 = vpop.permute.xlu0 %1747  ;;  %v1743_v14 = vpop.permute.xlu1 %1742 }
 0x3a0   : > { %2892 = vrcp.f32 %v1748_v2 }
 0x3a1   : > { %2894 = vrcp.f32 %v1743_v14  ;;  %v1811_v14 = vld [vmem:[%s4209_s10 + $0x8] sm:$0xff] }
 0x3a2   : > { %v2885_v33 = vpop.eup %2884 }
 0x3a3   : > { %v1738_v27 = vpop.permute.xlu0 %1737  ;;  %v1733_v49 = vpop.permute.xlu1 %1732  ;;  %v1785_v50 = vmul.f32 %v2885_v33, %v1665_v35 }
 0x3a4   : > { %v2887_v36 = vpop.eup %2886  ;;  %2896 = vrcp.f32 %v1738_v27 }
 0x3a5   : > { %v2889_v29 = vpop.eup %2888  ;;  %2898 = vrcp.f32 %v1733_v49  ;;  %v1779_v37 = vmul.f32 %v2887_v36, %v1662_v51 }
 0x3a6   : > { %v2891_v23 = vpop.eup %2890  ;;  %v1783_v61 = vmul.f32 %v2889_v29, %v1664_v4 }
 0x3a7   : > { %v1436_v11 = vpop.permute.xlu0 %1435  ;;  %v1431_v22 = vpop.permute.xlu1 %1430  ;;  %v1781_v58 = vmul.f32 %v2891_v23, %v1663_v63  ;;  %v1817_v23 = vld [vmem:[%s4209_s10 + $0x38] sm:$0xff] }
 0x3a8   : > { %v1453_v25 = vmul.f32 %v1436_v11, %v1357_v55  ;;  %v1452_v42 = vmul.f32 %v1431_v22, %v1356_v24  ;;  %v1805_v18 = vpack.c.bf16 %v1785_v50, %v1783_v61  ;;  %v1816_v55 = vld [vmem:[%s4209_s10 + $0x30] sm:$0xff]  ;;  %v1814_v24 = vld [vmem:[%s4209_s10 + $0x20] sm:$0xff]  ;;  %v1815_v50 = vld [vmem:[%s4209_s10 + $0x28] sm:$0xff] }
 0x3a9   : > { %v1804_v31 = vpack.c.bf16 %v1781_v58, %v1779_v37 }
 0x3aa   : > { %v1622_v52 = vadd.f32 %v3689_v38, %v1453_v25  ;;  %v1621_v48 = vadd.f32 %v3687_v40, %v1452_v42  ;;  %v2893_v57 = vpop.eup %2892  ;;  %v1820_v25 = vld [vmem:[%s4209_s10 + $0x50] sm:$0xff]  ;;  %v1818_v42 = vld [vmem:[%s4209_s10 + $0x40] sm:$0xff] }
 0x3ab   : > { %v1758_v60 = vpop.permute.xlu0 %1757  ;;  %2735 = vmatprep.mubr.msk.bf16.mxu1 %vm642_vm0, %v1804_v31  ;;  %v1753_v59 = vpop.permute.xlu1 %1752  ;;  %v1793_v20 = vmul.f32 %v2893_v57, %v1669_v47  ;;  %v1821_v31 = vld [vmem:[%s4209_s10 + $0x58] sm:$0xff] }
 0x3ac   : > { %v2895_v62 = vpop.eup %2894  ;;  %1638 = vst.msk [vmem:[#allocation4 + $0x78] sm:$0xff] %vm642_vm0, %v1622_v52  ;;  %1637 = vst.msk [vmem:[#allocation4 + $0x70] sm:$0xff] %vm642_vm0, %v1621_v48  ;;  %2900 = vrcp.f32 %v1758_v60  ;;  %2736 = vmatmul.mubr.msk.bf16.gmra.mrb[20].mxu1 %vm642_vm0, %v1805_v18  ;;  %v1819_v18 = vld [vmem:[%s4209_s10 + $0x48] sm:$0xff] }
 0x3ad   : > { %2902 = vrcp.f32 %v1753_v59  ;;  %v1791_v43 = vmul.f32 %v2895_v62, %v1668_v56  ;;  %v1822_v56 = vld [vmem:[%s4209_s10 + $0x60] sm:$0xff] }
 0x3ae   : > { %v2897_v54 = vpop.eup %2896 }
 0x3af   : > { %v2899_v40 = vpop.eup %2898  ;;  %v1768_v30 = vpop.permute.xlu0 %1767  ;;  %v1789_v38 = vmul.f32 %v2897_v54, %v1667_v16  ;;  %v1807_v46 = vpack.c.bf16 %v1793_v20, %v1791_v43  ;;  %v1824_v16 = vld [vmem:[%s4209_s10 + $0x70] sm:$0xff] }
 0x3b0   : > { %v1763_v17 = vpop.permute.xlu1 %1762  ;;  %2904 = vrcp.f32 %v1768_v30  ;;  %v1787_v34 = vmul.f32 %v2899_v40, %v1666_v7  ;;  %v1825_v40 = vld [vmem:[%s4209_s10 + $0x78] sm:$0xff]  ;;  %v1823_v7 = vld [vmem:[%s4209_s10 + $0x68] sm:$0xff] }
 0x3b1   : > { %2906 = vrcp.f32 %v1763_v17 }
 0x3b2   : > { %v1806_v0 = vpack.c.bf16 %v1789_v38, %v1787_v34 }
 0x3b3   : > { %v1673_v12 = vld [vmem:[#allocation4 + $0x78] sm:$0xff]  ;;  %v1672_v41 = vld [vmem:[#allocation4 + $0x70] sm:$0xff] }
 0x3b4   : > { %2739 = vmatprep.mubr.msk.bf16.mxu1 %vm642_vm0, %v1806_v0 }
 0x3b5   : > { %2740 = vmatmul.mubr.msk.bf16.gmra.mrb[24].mxu1 %vm642_vm0, %v1807_v46 }
 0x3b6   : > { %v2901_v21 = vpop.eup %2900 }
 0x3b7   : > { %v2903_v44 = vpop.eup %2902  ;;  %v1797_v6 = vmul.f32 %v2901_v21, %v1671_v3  ;;  %v3810_v21 = vld [vmem:[%s4205_s6] ss:$0 sm:$0xff] (%p1984_p2) }
 0x3b8   : > { %v1795_v10 = vmul.f32 %v2903_v44, %v1670_v5  ;;  %v2028_v3 = vld [vmem:[%s4208_s9] sm:$0xff] (%p1984_p2) }
 0x3ba   : > { %v2905_v9 = vpop.eup %2904  ;;  %v1808_v32 = vpack.c.bf16 %v1797_v6, %v1795_v10  ;;  %v2030_v6 = vld [vmem:[%s4208_s9 + $0x10] sm:$0xff] (%p1984_p2) }
 0x3bb   : > { %v2907_v13 = vpop.eup %2906  ;;  %v1801_v45 = vmul.f32 %v2905_v9, %v1673_v12  ;;  %v2983_v9 = vmov (%p1984_p2), 0.0  }
 0x3bc   : > { %2743 = vmatprep.mubr.msk.bf16.mxu1 %vm642_vm0, %v1808_v32  ;;  %v1799_v53 = vmul.f32 %v2907_v13, %v1672_v41  ;;  %v3826_v32 = vsel (%p1984_p2), %vm2060_vm5, 1.0, %v2983_v9  ;;  %v2029_v13 = vld [vmem:[%s4208_s9 + $0x8] sm:$0xff] (%p1984_p2) }
 0x3be   : > { %v1809_v15 = vpack.c.bf16 %v1801_v45, %v1799_v53  ;;  %v2031_v45 = vld [vmem:[%s4208_s9 + $0x18] sm:$0xff] (%p1984_p2) }
 0x3c0   : > { %2744 = vmatmul.mubr.msk.bf16.gmra.mrb[28].mxu1 %vm642_vm0, %v1809_v15 }
 0x46b   : > { %v2733_v19 = vpop.f32.mrb[16].mxu1 }
 0x46c   : > { %v1954_v1 = vadd.f32 %v2733_v19, %v1812_v8  ;;  %v1889_v2 = vpop.f32.mrb[17].mxu1 }
 0x46d   : > { %v1952_v33 = vadd.f32 %v1889_v2, %v1810_v39  ;;  %v2734_v27 = vpop.f32.mrb[18].mxu1  ;;  %v2032_v2 = vld [vmem:[%s4208_s9 + $0x20] sm:$0xff] (%p1984_p2) }
 0x46e   : > { %1970 = vst [vmem:[%s4209_s10 + $0x10] sm:$0xff] %v1954_v1  ;;  %v1955_v49 = vadd.f32 %v2734_v27, %v1813_v26  ;;  %v1892_v36 = vpop.f32.mrb[19].mxu1 }
 0x46f   : > { %1968 = vst [vmem:[%s4209_s10] sm:$0xff] %v1952_v33  ;;  %v1953_v29 = vadd.f32 %v1892_v36, %v1811_v14  ;;  %v2033_v36 = vld [vmem:[%s4208_s9 + $0x28] sm:$0xff] (%p1984_p2) }
 0x470   : > { %1971 = vst [vmem:[%s4209_s10 + $0x18] sm:$0xff] %v1955_v49 }
 0x471   : > { %1969 = vst [vmem:[%s4209_s10 + $0x8] sm:$0xff] %v1953_v29 }
 0x475   : > { %v1991_v5 = vld [vmem:[%s4209_s10 + $0x10] sm:$0xff] (%p1984_p2) }
 0x476   : > { %v1989_v46 = vld [vmem:[%s4209_s10] sm:$0xff] (%p1984_p2)  ;;  %v2014_v12 = vadd.f32 (%p1984_p2), %v3810_v21, %v1991_v5  ;;  %v2041_v5 = vld [vmem:[%s4208_s9 + $0x68] sm:$0xff] (%p1984_p2) }
 0x477   : > { %v2012_v44 = vadd.f32 (%p1984_p2), %v3810_v21, %v1989_v46  ;;  %v1992_v41 = vld [vmem:[%s4209_s10 + $0x18] sm:$0xff] (%p1984_p2)  ;;  %v2040_v46 = vld [vmem:[%s4208_s9 + $0x60] sm:$0xff] (%p1984_p2) }
 0x478   : > { %v1990_v10 = vld [vmem:[%s4209_s10 + $0x8] sm:$0xff] (%p1984_p2)  ;;  %v2015_v15 = vadd.f32 (%p1984_p2), %v3810_v21, %v1992_v41  ;;  %v2046_v19 = vadd.f32 (%p1984_p2), %v2030_v6, %v2014_v12  ;;  %v2042_v41 = vld [vmem:[%s4208_s9 + $0x70] sm:$0xff] (%p1984_p2) }
 0x479   : > { %v2013_v28 = vadd.f32 (%p1984_p2), %v3810_v21, %v1990_v10  ;;  %v2044_v53 = vadd.f32 (%p1984_p2), %v2028_v3, %v2012_v44 }
 0x47a   : > { %v2047_v49 = vadd.f32 (%p1984_p2), %v2031_v45, %v2015_v15 }
 0x47b   : > { %v2045_v26 = vadd.f32 (%p1984_p2), %v2029_v13, %v2013_v28  ;;  %v3855_v27 = vmul.f32 (%p1984_p2), %v3826_v32, %v2044_v53  ;;  %v2043_v53 = vld [vmem:[%s4208_s9 + $0x78] sm:$0xff] (%p1984_p2) }
 0x47d   : > { %2079 = vadd.xlane.f32.xlu0 (%p1984_p2), %v3855_v27 }
 0x47f   : > { %v2737_v35 = vpop.f32.mrb[20].mxu1 }
 0x480   : > { %v1958_v51 = vadd.f32 %v2737_v35, %v1816_v55  ;;  %v1905_v63 = vpop.f32.mrb[21].mxu1  ;;  %v3864_v55 = vmul.f32 (%p1984_p2), %v3826_v32, %v2046_v19 }
 0x481   : > { %v1956_v11 = vadd.f32 %v1905_v63, %v1814_v24  ;;  %v2738_v22 = vpop.f32.mrb[22].mxu1  ;;  %v3868_v24 = vmul.f32 (%p1984_p2), %v3826_v32, %v2045_v26 }
 0x482   : > { %1974 = vst [vmem:[%s4209_s10 + $0x30] sm:$0xff] %v1958_v51  ;;  %v1959_v37 = vadd.f32 %v2738_v22, %v1817_v23  ;;  %v1908_v58 = vpop.f32.mrb[23].mxu1  ;;  %2083 = vadd.xlane.f32.xlu1 (%p1984_p2), %v3864_v55  ;;  %v3873_v51 = vmul.f32 (%p1984_p2), %v3826_v32, %v2047_v49 }
 0x483   : > { %1972 = vst [vmem:[%s4209_s10 + $0x20] sm:$0xff] %v1956_v11  ;;  %v1957_v4 = vadd.f32 %v1908_v58, %v1815_v50  ;;  %v2034_v50 = vld [vmem:[%s4208_s9 + $0x30] sm:$0xff] (%p1984_p2)  ;;  %2081 = vadd.xlane.f32.xlu0 (%p1984_p2), %v3868_v24 }
 0x484   : > { %1975 = vst [vmem:[%s4209_s10 + $0x38] sm:$0xff] %v1959_v37  ;;  %v2035_v37 = vld [vmem:[%s4208_s9 + $0x38] sm:$0xff] (%p1984_p2) }
 0x485   : > { %1973 = vst [vmem:[%s4209_s10 + $0x28] sm:$0xff] %v1957_v4 }
 0x486   : > { %2085 = vadd.xlane.f32.xlu1 (%p1984_p2), %v3873_v51 }
 0x488   : > { %v2741_v61 = vpop.f32.mrb[24].mxu1 }
 0x489   : > { %v1962_v52 = vadd.f32 %v2741_v61, %v1820_v25  ;;  %v1921_v48 = vpop.f32.mrb[25].mxu1  ;;  %v1995_v33 = vld [vmem:[%s4209_s10 + $0x30] sm:$0xff] (%p1984_p2) }
 0x48a   : > { %v1960_v57 = vadd.f32 %v1921_v48, %v1818_v42  ;;  %v2742_v60 = vpop.f32.mrb[26].mxu1  ;;  %v1993_v8 = vld [vmem:[%s4209_s10 + $0x20] sm:$0xff] (%p1984_p2)  ;;  %v2018_v23 = vadd.f32 (%p1984_p2), %v3810_v21, %v1995_v33 }
 0x48b   : > { %1978 = vst [vmem:[%s4209_s10 + $0x50] sm:$0xff] %v1962_v52  ;;  %v1963_v59 = vadd.f32 %v2742_v60, %v1821_v31  ;;  %v1924_v62 = vpop.f32.mrb[27].mxu1  ;;  %v2016_v1 = vadd.f32 (%p1984_p2), %v3810_v21, %v1993_v8  ;;  %v1996_v29 = vld [vmem:[%s4209_s10 + $0x38] sm:$0xff] (%p1984_p2)  ;;  %v2036_v52 = vld [vmem:[%s4208_s9 + $0x40] sm:$0xff] (%p1984_p2) }
 0x48c   : > { %1976 = vst [vmem:[%s4209_s10 + $0x40] sm:$0xff] %v1960_v57  ;;  %v1961_v54 = vadd.f32 %v1924_v62, %v1819_v18  ;;  %v1994_v39 = vld [vmem:[%s4209_s10 + $0x28] sm:$0xff] (%p1984_p2)  ;;  %v2019_v11 = vadd.f32 (%p1984_p2), %v3810_v21, %v1996_v29  ;;  %v2050_v25 = vadd.f32 (%p1984_p2), %v2034_v50, %v2018_v23 }
 0x48d   : > { %1979 = vst [vmem:[%s4209_s10 + $0x58] sm:$0xff] %v1963_v59  ;;  %v2017_v14 = vadd.f32 (%p1984_p2), %v3810_v21, %v1994_v39  ;;  %v2048_v35 = vadd.f32 (%p1984_p2), %v2032_v2, %v2016_v1  ;;  %v2037_v57 = vld [vmem:[%s4208_s9 + $0x48] sm:$0xff] (%p1984_p2) }
 0x48e   : > { %1977 = vst [vmem:[%s4209_s10 + $0x48] sm:$0xff] %v1961_v54  ;;  %v2051_v31 = vadd.f32 (%p1984_p2), %v2035_v37, %v2019_v11  ;;  %v3912_v59 = vmul.f32 (%p1984_p2), %v3826_v32, %v2050_v25 }
 0x48f   : > { %v2049_v63 = vadd.f32 (%p1984_p2), %v2033_v36, %v2017_v14  ;;  %v3890_v4 = vmul.f32 (%p1984_p2), %v3826_v32, %v2048_v35 }
 0x491   : > { %v3895_v61 = vmul.f32 (%p1984_p2), %v3826_v32, %v2049_v63  ;;  %2087 = vadd.xlane.f32.xlu0 (%p1984_p2), %v3890_v4 }
 0x492   : > { %v1999_v18 = vld [vmem:[%s4209_s10 + $0x50] sm:$0xff] (%p1984_p2) }
 0x493   : > { %v2745_v47 = vpop.f32.mrb[28].mxu1  ;;  %1988 = sbr.rel (!%p1984_p2) target bundleno = 1509 (0x5e5), region = 72  ;;  %v1997_v22 = vld [vmem:[%s4209_s10 + $0x40] sm:$0xff] (%p1984_p2)  ;;  %v2022_v54 = vadd.f32 (%p1984_p2), %v3810_v21, %v1999_v18  ;;  %2089 = vadd.xlane.f32.xlu1 (%p1984_p2), %v3895_v61 }
 0x494   : > { %v1966_v30 = vadd.f32 %v2745_v47, %v1824_v16  ;;  %v1937_v17 = vpop.f32.mrb[29].mxu1  ;;  %v2020_v42 = vadd.f32 (%p1984_p2), %v3810_v21, %v1997_v22  ;;  %v2000_v60 = vld [vmem:[%s4209_s10 + $0x58] sm:$0xff] (%p1984_p2)  ;;  %v3917_v16 = vmul.f32 (%p1984_p2), %v3826_v32, %v2051_v31  ;;  %v2038_v47 = vld [vmem:[%s4208_s9 + $0x50] sm:$0xff] (%p1984_p2) }
 0x495   : > { %v1964_v38 = vadd.f32 %v1937_v17, %v1822_v56  ;;  %v2746_v43 = vpop.f32.mrb[30].mxu1  ;;  %v1998_v58 = vld [vmem:[%s4209_s10 + $0x48] sm:$0xff] (%p1984_p2)  ;;  %v2039_v17 = vld [vmem:[%s4208_s9 + $0x58] sm:$0xff] (%p1984_p2)  ;;  %2091 = vadd.xlane.f32.xlu0 (%p1984_p2), %v3912_v59 }
 0x496   : > { %1982 = vst [vmem:[%s4209_s10 + $0x70] sm:$0xff] %v1966_v30  ;;  %v1967_v20 = vadd.f32 %v2746_v43, %v1825_v40  ;;  %v1940_v34 = vpop.f32.mrb[31].mxu1  ;;  %v2021_v48 = vadd.f32 (%p1984_p2), %v3810_v21, %v1998_v58  ;;  %v2052_v62 = vadd.f32 (%p1984_p2), %v2036_v52, %v2020_v42  ;;  %v2023_v40 = vadd.f32 (%p1984_p2), %v3810_v21, %v2000_v60 }
 0x497   : > { %1980 = vst [vmem:[%s4209_s10 + $0x60] sm:$0xff] %v1964_v38  ;;  %v1965_v0 = vadd.f32 %v1940_v34, %v1823_v7  ;;  %v2054_v43 = vadd.f32 (%p1984_p2), %v2038_v47, %v2022_v54  ;;  %2093 = vadd.xlane.f32.xlu1 (%p1984_p2), %v3917_v16 }
 0x498   : > { %1983 = vst [vmem:[%s4209_s10 + $0x78] sm:$0xff] %v1967_v20  ;;  %v2053_v56 = vadd.f32 (%p1984_p2), %v2037_v57, %v2021_v48  ;;  %v3934_v38 = vmul.f32 (%p1984_p2), %v3826_v32, %v2052_v62 }
 0x499   : > { %1981 = vst [vmem:[%s4209_s10 + $0x68] sm:$0xff] %v1965_v0  ;;  %v2055_v0 = vadd.f32 (%p1984_p2), %v2039_v17, %v2023_v40  ;;  %v3956_v10 = vmul.f32 (%p1984_p2), %v3826_v32, %v2054_v43 }
 0x49a   : > { %v3939_v34 = vmul.f32 %v3826_v32, %v2053_v56  ;;  %2095 = vadd.xlane.f32.xlu0 %v3934_v38 }
 0x49b   : > { %v3961_v28 = vmul.f32 %v3826_v32, %v2055_v0 }
 0x49c   : > { %2097 = vadd.xlane.f32.xlu1 %v3939_v34 }
 0x49d   : > { %v2003_v44 = vld [vmem:[%s4209_s10 + $0x70] sm:$0xff] }
 0x49e   : > { %v2001_v30 = vld [vmem:[%s4209_s10 + $0x60] sm:$0xff]  ;;  %v2026_v12 = vadd.f32 %v3810_v21, %v2003_v44  ;;  %2099 = vadd.xlane.f32.xlu0 %v3956_v10 }
 0x49f   : > { %v2024_v20 = vadd.f32 %v3810_v21, %v2001_v30  ;;  %v2004_v6 = vld [vmem:[%s4209_s10 + $0x78] sm:$0xff] }
 0x4a0   : > { %v2002_v7 = vld [vmem:[%s4209_s10 + $0x68] sm:$0xff]  ;;  %v2027_v45 = vadd.f32 %v3810_v21, %v2004_v6  ;;  %v2058_v8 = vadd.f32 %v2042_v41, %v2026_v12  ;;  %2101 = vadd.xlane.f32.xlu1 %v3961_v28 }
 0x4a1   : > { %v2025_v3 = vadd.f32 %v3810_v21, %v2002_v7  ;;  %v2056_v9 = vadd.f32 %v2040_v46, %v2024_v20 }
 0x4a2   : > { %v2059_v19 = vadd.f32 %v2043_v53, %v2027_v45  ;;  %v3980_v21 = vmul.f32 %v3826_v32, %v2058_v8 }
 0x4a3   : > { %v2057_v13 = vadd.f32 %v2041_v5, %v2025_v3  ;;  %v3972_v15 = vmul.f32 %v3826_v32, %v2056_v9 }
 0x4a4   : > { %v3984_v26 = vmul.f32 %v3826_v32, %v2059_v19 }
 0x4a5   : > { %v3976_v39 = vmul.f32 %v3826_v32, %v2057_v13  ;;  %2103 = vadd.xlane.f32.xlu0 %v3972_v15 }
 0x4a7   : > { %2105 = vadd.xlane.f32.xlu1 %v3976_v39 }
 0x4a9   : > { %2107 = vadd.xlane.f32.xlu0 %v3980_v21 }
 0x4ab   : > { %2109 = vadd.xlane.f32.xlu1 %v3984_v26 }
 0x50a   : > { %v2080_v1 = vpop.xlane.xlu0 %2079 }
 0x50b   : > { %v2111_v2 = vmul.f32 0.03125, %v2080_v1 }
 0x50d   : > { %v2127_v49 = vsub.f32 %v3855_v27, %v2111_v2 }
 0x50f   : > { %v2084_v14 = vpop.xlane.xlu1 %2083  ;;  %v3991_v63 = vmul.f32 %v3826_v32, %v2127_v49 }
 0x510   : > { %v2113_v33 = vmul.f32 0.03125, %v2084_v14  ;;  %v2082_v29 = vpop.xlane.xlu0 %2081 }
 0x511   : > { %v2112_v35 = vmul.f32 0.03125, %v2082_v29  ;;  %v2159_v37 = vmul.f32 %v3991_v63, %v3991_v63 }
 0x512   : > { %v2129_v36 = vsub.f32 %v3864_v55, %v2113_v33 }
 0x513   : > { %v2086_v23 = vpop.xlane.xlu1 %2085  ;;  %v2128_v22 = vsub.f32 %v3868_v24, %v2112_v35  ;;  %2175 = vadd.xlane.f32.xlu0 %v2159_v37 }
 0x514   : > { %v2114_v50 = vmul.f32 0.03125, %v2086_v23  ;;  %v3994_v11 = vmul.f32 %v3826_v32, %v2129_v36 }
 0x515   : > { %v4003_v31 = vmul.f32 %v3826_v32, %v2128_v22 }
 0x516   : > { %v2130_v58 = vsub.f32 %v3873_v51, %v2114_v50  ;;  %v2161_v42 = vmul.f32 %v3994_v11, %v3994_v11 }
 0x517   : > { %v2160_v18 = vmul.f32 %v4003_v31, %v4003_v31 }
 0x518   : > { %v4006_v48 = vmul.f32 %v3826_v32, %v2130_v58  ;;  %2179 = vadd.xlane.f32.xlu0 %v2161_v42 }
 0x519   : > { %2177 = vadd.xlane.f32.xlu1 %v2160_v18 }
 0x51a   : > { %v2162_v54 = vmul.f32 %v4006_v48, %v4006_v48 }
 0x51d   : > { %2181 = vadd.xlane.f32.xlu1 %v2162_v54 }
 0x51e   : > { %v2088_v27 = vpop.xlane.xlu0 %2087 }
 0x51f   : > { %v2115_v25 = vmul.f32 0.03125, %v2088_v27 }
 0x520   : > { %v2090_v55 = vpop.xlane.xlu1 %2089 }
 0x521   : > { %v2116_v52 = vmul.f32 0.03125, %v2090_v55  ;;  %v2131_v24 = vsub.f32 %v3890_v4, %v2115_v25 }
 0x522   : > { %v2092_v57 = vpop.xlane.xlu0 %2091 }
 0x523   : > { %v2132_v51 = vsub.f32 %v3895_v61, %v2116_v52  ;;  %v2117_v60 = vmul.f32 0.03125, %v2092_v57  ;;  %v4015_v56 = vmul.f32 %v3826_v32, %v2131_v24 }
 0x524   : > { %v2094_v62 = vpop.xlane.xlu1 %2093 }
 0x525   : > { %v2118_v47 = vmul.f32 0.03125, %v2094_v62  ;;  %v4018_v40 = vmul.f32 %v3826_v32, %v2132_v51  ;;  %v2133_v4 = vsub.f32 %v3912_v59, %v2117_v60  ;;  %v2163_v61 = vmul.f32 %v4015_v56, %v4015_v56 }
 0x527   : > { %v2134_v30 = vsub.f32 %v3917_v16, %v2118_v47  ;;  %v2096_v17 = vpop.xlane.xlu0 %2095  ;;  %2183 = vadd.xlane.f32.xlu0 %v2163_v61  ;;  %v2164_v20 = vmul.f32 %v4018_v40, %v4018_v40  ;;  %v4027_v0 = vmul.f32 %v3826_v32, %v2133_v4 }
 0x528   : > { %v2119_v7 = vmul.f32 0.03125, %v2096_v17 }
 0x529   : > { %v2098_v43 = vpop.xlane.xlu1 %2097  ;;  %v4030_v3 = vmul.f32 %v3826_v32, %v2134_v30  ;;  %v2165_v16 = vmul.f32 %v4027_v0, %v4027_v0  ;;  %2185 = vadd.xlane.f32.xlu1 %v2164_v20 }
 0x52a   : > { %v2120_v46 = vmul.f32 0.03125, %v2098_v43  ;;  %v2135_v59 = vsub.f32 %v3934_v38, %v2119_v7 }
 0x52b   : > { %v2100_v5 = vpop.xlane.xlu0 %2099  ;;  %2187 = vadd.xlane.f32.xlu0 %v2165_v16  ;;  %v2166_v12 = vmul.f32 %v4030_v3, %v4030_v3 }
 0x52c   : > { %v2136_v44 = vsub.f32 %v3939_v34, %v2120_v46  ;;  %v2121_v6 = vmul.f32 0.03125, %v2100_v5  ;;  %v4039_v13 = vmul.f32 %v3826_v32, %v2135_v59 }
 0x52d   : > { %v2102_v9 = vpop.xlane.xlu1 %2101  ;;  %2189 = vadd.xlane.f32.xlu1 %v2166_v12 }
 0x52e   : > { %v2122_v41 = vmul.f32 0.03125, %v2102_v9  ;;  %v4042_v45 = vmul.f32 %v3826_v32, %v2136_v44  ;;  %v2137_v38 = vsub.f32 %v3956_v10, %v2121_v6  ;;  %v2167_v34 = vmul.f32 %v4039_v13, %v4039_v13  ;;  %v4087_v44 = vld [vmem:[%s4206_s7] ss:$0 sm:$0xff] }
 0x530   : > { %v2138_v53 = vsub.f32 %v3961_v28, %v2122_v41  ;;  %2191 = vadd.xlane.f32.xlu0 %v2167_v34  ;;  %v2168_v2 = vmul.f32 %v4042_v45, %v4042_v45  ;;  %v4051_v14 = vmul.f32 %v3826_v32, %v2137_v38  ;;  %v4093_v38 = vld [vmem:[%s4207_s8] ss:$0 sm:$0xff] }
 0x532   : > { %v2104_v8 = vpop.xlane.xlu0 %2103  ;;  %v4054_v49 = vmul.f32 %v3826_v32, %v2138_v53  ;;  %v2169_v28 = vmul.f32 %v4051_v14, %v4051_v14  ;;  %2193 = vadd.xlane.f32.xlu1 %v2168_v2 }
 0x533   : > { %v2123_v19 = vmul.f32 0.03125, %v2104_v8 }
 0x534   : > { %v2106_v1 = vpop.xlane.xlu1 %2105  ;;  %2195 = vadd.xlane.f32.xlu0 %v2169_v28  ;;  %v2170_v50 = vmul.f32 %v4054_v49, %v4054_v49 }
 0x535   : > { %v2124_v33 = vmul.f32 0.03125, %v2106_v1  ;;  %v2139_v10 = vsub.f32 %v3972_v15, %v2123_v19 }
 0x536   : > { %v2108_v29 = vpop.xlane.xlu0 %2107  ;;  %2197 = vadd.xlane.f32.xlu1 %v2170_v50 }
 0x537   : > { %v2140_v36 = vsub.f32 %v3976_v39, %v2124_v33  ;;  %v2125_v35 = vmul.f32 0.03125, %v2108_v29  ;;  %v4063_v22 = vmul.f32 %v3826_v32, %v2139_v10 }
 0x538   : > { %v2110_v23 = vpop.xlane.xlu1 %2109 }
 0x539   : > { %v2126_v37 = vmul.f32 0.03125, %v2110_v23  ;;  %v4066_v58 = vmul.f32 %v3826_v32, %v2140_v36  ;;  %v2141_v15 = vsub.f32 %v3980_v21, %v2125_v35  ;;  %v2171_v39 = vmul.f32 %v4063_v22, %v4063_v22 }
 0x53b   : > { %v2142_v27 = vsub.f32 %v3984_v26, %v2126_v37  ;;  %2199 = vadd.xlane.f32.xlu0 %v2171_v39  ;;  %v2172_v25 = vmul.f32 %v4066_v58, %v4066_v58  ;;  %v4075_v55 = vmul.f32 %v3826_v32, %v2141_v15 }
 0x53d   : > { %v4078_v42 = vmul.f32 %v3826_v32, %v2142_v27  ;;  %v2173_v52 = vmul.f32 %v4075_v55, %v4075_v55  ;;  %2201 = vadd.xlane.f32.xlu1 %v2172_v25 }
 0x53f   : > { %2203 = vadd.xlane.f32.xlu0 %v2173_v52  ;;  %v2174_v21 = vmul.f32 %v4078_v42, %v4078_v42 }
 0x541   : > { %2205 = vadd.xlane.f32.xlu1 %v2174_v21 }
 0x5a0   : > { %v2176_v26 = vpop.xlane.xlu0 %2175 }
 0x5a1   : > { %v2207_v24 = vmul.f32 0.03125, %v2176_v26 }
 0x5a3   : > { %v2223_v18 = vadd.f32 1e-05, %v2207_v24 }
 0x5a5   : > { %v2180_v57 = vpop.xlane.xlu0 %2179  ;;  %2908 = vrsqrt.f32 %v2223_v18 }
 0x5a6   : > { %v2178_v51 = vpop.xlane.xlu1 %2177  ;;  %v2209_v62 = vmul.f32 0.03125, %v2180_v57 }
 0x5a7   : > { %v2208_v60 = vmul.f32 0.03125, %v2178_v51 }
 0x5a8   : > { %v2225_v32 = vadd.f32 1e-05, %v2209_v62 }
 0x5a9   : > { %v2224_v54 = vadd.f32 1e-05, %v2208_v60 }
 0x5aa   : > { %v2182_v47 = vpop.xlane.xlu1 %2181 }
 0x5ab   : > { %2910 = vrsqrt.f32 %v2224_v54  ;;  %v2210_v61 = vmul.f32 0.03125, %v2182_v47 }
 0x5ac   : > { %2912 = vrsqrt.f32 %v2225_v32 }
 0x5ad   : > { %v2226_v17 = vadd.f32 1e-05, %v2210_v61 }
 0x5af   : > { %2914 = vrsqrt.f32 %v2226_v17  ;;  %v2909_v16 = vpop.eup %2908 }
 0x5b0   : > { %v2255_v9 = vmul.f32 %v2909_v16, %v3991_v63 }
 0x5b2   : > { %v2278_v8 = vmul.f32 %v4087_v44, %v2255_v9 }
 0x5b4   : > { %v2184_v4 = vpop.xlane.xlu0 %2183  ;;  %v2301_v10 = vadd.f32 %v4093_v38, %v2278_v8 }
 0x5b5   : > { %v2211_v30 = vmul.f32 0.03125, %v2184_v4  ;;  %v2911_v19 = vpop.eup %2910 }
 0x5b6   : > { %v2186_v43 = vpop.xlane.xlu1 %2185  ;;  %v2913_v33 = vpop.eup %2912  ;;  %v2256_v63 = vmul.f32 %v2911_v19, %v4003_v31  ;;  %2317 = vst [vmem:[%s4209_s10] sm:$0xff] %v2301_v10 }
 0x5b7   : > { %v2227_v7 = vadd.f32 1e-05, %v2211_v30  ;;  %v2212_v46 = vmul.f32 0.03125, %v2186_v43  ;;  %v2257_v29 = vmul.f32 %v2913_v33, %v3994_v11 }
 0x5b8   : > { %v2188_v20 = vpop.xlane.xlu0 %2187  ;;  %v2279_v50 = vmul.f32 %v4087_v44, %v2256_v63 }
 0x5b9   : > { %v2213_v59 = vmul.f32 0.03125, %v2188_v20  ;;  %2916 = vrsqrt.f32 %v2227_v7  ;;  %v2228_v5 = vadd.f32 1e-05, %v2212_v46  ;;  %v2915_v37 = vpop.eup %2914  ;;  %v2280_v15 = vmul.f32 %v4087_v44, %v2257_v29 }
 0x5ba   : > { %v2190_v12 = vpop.xlane.xlu1 %2189  ;;  %v2302_v25 = vadd.f32 %v4093_v38, %v2279_v50  ;;  %v2258_v11 = vmul.f32 %v2915_v37, %v4006_v48 }
 0x5bb   : > { %v2229_v6 = vadd.f32 1e-05, %v2213_v59  ;;  %2918 = vrsqrt.f32 %v2228_v5  ;;  %v2214_v34 = vmul.f32 0.03125, %v2190_v12  ;;  %v2303_v26 = vadd.f32 %v4093_v38, %v2280_v15 }
 0x5bc   : > { %2318 = vst [vmem:[%s4209_s10 + $0x8] sm:$0xff] %v2302_v25  ;;  %v2281_v51 = vmul.f32 %v4087_v44, %v2258_v11 }
 0x5bd   : > { %v2192_v41 = vpop.xlane.xlu0 %2191  ;;  %2920 = vrsqrt.f32 %v2229_v6  ;;  %v2230_v1 = vadd.f32 1e-05, %v2214_v34  ;;  %2319 = vst [vmem:[%s4209_s10 + $0x10] sm:$0xff] %v2303_v26 }
 0x5be   : > { %v2215_v53 = vmul.f32 0.03125, %v2192_v41 }
 0x5bf   : > { %v2194_v28 = vpop.xlane.xlu1 %2193  ;;  %2922 = vrsqrt.f32 %v2230_v1 }
 0x5c0   : > { %v2231_v2 = vadd.f32 1e-05, %v2215_v53  ;;  %v2216_v35 = vmul.f32 0.03125, %v2194_v28 }
 0x5c1   : > { %v2196_v36 = vpop.xlane.xlu0 %2195 }
 0x5c2   : > { %v2217_v23 = vmul.f32 0.03125, %v2196_v36  ;;  %2924 = vrsqrt.f32 %v2231_v2  ;;  %v2232_v39 = vadd.f32 1e-05, %v2216_v35 }
 0x5c3   : > { %v2917_v31 = vpop.eup %2916  ;;  %v2198_v52 = vpop.xlane.xlu1 %2197 }
 0x5c4   : > { %v2233_v27 = vadd.f32 1e-05, %v2217_v23  ;;  %v2259_v24 = vmul.f32 %v2917_v31, %v4015_v56  ;;  %2926 = vrsqrt.f32 %v2232_v39  ;;  %v2218_v18 = vmul.f32 0.03125, %v2198_v52 }
 0x5c5   : > { %v2919_v60 = vpop.eup %2918  ;;  %v2304_v56 = vadd.f32 %v4093_v38, %v2281_v51 }
 0x5c6   : > { %2928 = vrsqrt.f32 %v2233_v27  ;;  %v2282_v48 = vmul.f32 %v4087_v44, %v2259_v24  ;;  %v2234_v62 = vadd.f32 1e-05, %v2218_v18  ;;  %v2260_v32 = vmul.f32 %v2919_v60, %v4018_v40 }
 0x5c7   : > { %v2921_v54 = vpop.eup %2920  ;;  %2320 = vst [vmem:[%s4209_s10 + $0x18] sm:$0xff] %v2304_v56 }
 0x5c8   : > { %v2200_v21 = vpop.xlane.xlu0 %2199  ;;  %v2305_v30 = vadd.f32 %v4093_v38, %v2282_v48  ;;  %v2261_v17 = vmul.f32 %v2921_v54, %v4027_v0  ;;  %2930 = vrsqrt.f32 %v2234_v62  ;;  %v2283_v43 = vmul.f32 %v4087_v44, %v2260_v32 }
 0x5c9   : > { %v2219_v57 = vmul.f32 0.03125, %v2200_v21  ;;  %v2923_v46 = vpop.eup %2922 }
 0x5ca   : > { %v2202_v4 = vpop.xlane.xlu1 %2201  ;;  %2321 = vst [vmem:[%s4209_s10 + $0x20] sm:$0xff] %v2305_v30  ;;  %v2284_v40 = vmul.f32 %v4087_v44, %v2261_v17  ;;  %v2306_v0 = vadd.f32 %v4093_v38, %v2283_v43  ;;  %v2262_v5 = vmul.f32 %v2923_v46, %v4030_v3 }
 0x5cb   : > { %v2235_v47 = vadd.f32 1e-05, %v2219_v57  ;;  %v2220_v7 = vmul.f32 0.03125, %v2202_v4 }
 0x5cc   : > { %v2204_v61 = vpop.xlane.xlu0 %2203  ;;  %v2925_v16 = vpop.eup %2924  ;;  %v2307_v12 = vadd.f32 %v4093_v38, %v2284_v40  ;;  %2322 = vst [vmem:[%s4209_s10 + $0x28] sm:$0xff] %v2306_v0  ;;  %v2285_v53 = vmul.f32 %v4087_v44, %v2262_v5 }
 0x5cd   : > { %2932 = vrsqrt.f32 %v2235_v47  ;;  %v2221_v20 = vmul.f32 0.03125, %v2204_v61  ;;  %v2236_v59 = vadd.f32 1e-05, %v2220_v7  ;;  %v2263_v41 = vmul.f32 %v2925_v16, %v4039_v13 }
 0x5ce   : > { %v2206_v9 = vpop.xlane.xlu1 %2205  ;;  %v2927_v8 = vpop.eup %2926  ;;  %2323 = vst [vmem:[%s4209_s10 + $0x30] sm:$0xff] %v2307_v12  ;;  %v2308_v13 = vadd.f32 %v4093_v38, %v2285_v53 }
 0x5cf   : > { %v2237_v6 = vadd.f32 1e-05, %v2221_v20  ;;  %2934 = vrsqrt.f32 %v2236_v59  ;;  %v2222_v34 = vmul.f32 0.03125, %v2206_v9  ;;  %v2286_v3 = vmul.f32 %v4087_v44, %v2263_v41 }
 0x5d0   : > { %v2929_v1 = vpop.eup %2928  ;;  %v2264_v2 = vmul.f32 %v2927_v8, %v4042_v45  ;;  %2324 = vst [vmem:[%s4209_s10 + $0x38] sm:$0xff] %v2308_v13 }
 0x5d1   : > { %2936 = vrsqrt.f32 %v2237_v6  ;;  %v2238_v19 = vadd.f32 1e-05, %v2222_v34  ;;  %v2309_v33 = vadd.f32 %v4093_v38, %v2286_v3  ;;  %v2265_v10 = vmul.f32 %v2929_v1, %v4051_v14 }
 0x5d2   : > { %v2287_v63 = vmul.f32 %v4087_v44, %v2264_v2  ;;  %v2931_v28 = vpop.eup %2930 }
 0x5d3   : > { %2938 = vrsqrt.f32 %v2238_v19  ;;  %2325 = vst [vmem:[%s4209_s10 + $0x40] sm:$0xff] %v2309_v33  ;;  %v2288_v36 = vmul.f32 %v4087_v44, %v2265_v10  ;;  %v2266_v35 = vmul.f32 %v2931_v28, %v4054_v49 }
 0x5d4   : > { %v2310_v45 = vadd.f32 %v4093_v38, %v2287_v63 }
 0x5d5   : > { %v2311_v14 = vadd.f32 %v4093_v38, %v2288_v36  ;;  %v2289_v50 = vmul.f32 %v4087_v44, %v2266_v35 }
 0x5d6   : > { %2326 = vst [vmem:[%s4209_s10 + $0x48] sm:$0xff] %v2310_v45 }
 0x5d7   : > { %v2933_v29 = vpop.eup %2932  ;;  %2327 = vst [vmem:[%s4209_s10 + $0x50] sm:$0xff] %v2311_v14  ;;  %v2312_v49 = vadd.f32 %v4093_v38, %v2289_v50 }
 0x5d8   : > { %v2267_v23 = vmul.f32 %v2933_v29, %v4063_v22 }
 0x5d9   : > { %v2935_v37 = vpop.eup %2934  ;;  %2328 = vst [vmem:[%s4209_s10 + $0x58] sm:$0xff] %v2312_v49 }
 0x5da   : > { %v2290_v15 = vmul.f32 %v4087_v44, %v2267_v23  ;;  %v2268_v27 = vmul.f32 %v2935_v37, %v4066_v58 }
 0x5db   : > { %v2937_v39 = vpop.eup %2936 }
 0x5dc   : > { %v2313_v22 = vadd.f32 %v4093_v38, %v2290_v15  ;;  %v2269_v31 = vmul.f32 %v2937_v39, %v4075_v55  ;;  %v2291_v25 = vmul.f32 %v4087_v44, %v2268_v27 }
 0x5dd   : > { %v2939_v11 = vpop.eup %2938 }
 0x5de   : > { %2329 = vst [vmem:[%s4209_s10 + $0x60] sm:$0xff] %v2313_v22  ;;  %v2292_v52 = vmul.f32 %v4087_v44, %v2269_v31  ;;  %v2314_v21 = vadd.f32 %v4093_v38, %v2291_v25  ;;  %v2270_v58 = vmul.f32 %v2939_v11, %v4078_v42 }
 0x5e0   : > { %v2315_v26 = vadd.f32 %v4093_v38, %v2292_v52  ;;  %2330 = vst [vmem:[%s4209_s10 + $0x68] sm:$0xff] %v2314_v21  ;;  %v2293_v55 = vmul.f32 %v4087_v44, %v2270_v58 }
 0x5e2   : > { %2331 = vst [vmem:[%s4209_s10 + $0x70] sm:$0xff] %v2315_v26  ;;  %v2316_v24 = vadd.f32 %v4093_v38, %v2293_v55 }
 0x5e4   : > { %2332 = vst [vmem:[%s4209_s10 + $0x78] sm:$0xff] %v2316_v24 }
 0x5e5 PF: > { %s26_s20 = sadd.s32 1, %s2976_s20   ;;  %s4221_s18 = smov %s2972_s19 }
 0x5e6   : > { %p23_p3 = scmp.ge.s32.totalorder %s26_s20, 6   ;;  %s4222_s19 = smov %s4224_s0 }
 0x5e8   :  { %25 = sbr.rel (!%p23_p3) target bundleno = 18 (0x12), region = 117 }

</bundles_post_ra>
